<compile_context>
chip_gen: v7x
topology: tpu7x:2x2x1
jax: 0.10.0
libtpu: 0.0.40
codegen_flags: <defaults>
</compile_context>

<pallas_src>
import math

import jax
import jax.numpy as jnp
from jax.experimental import pallas as pl
from jax.experimental.pallas import tpu as pltpu


def _txtnet_kernel(alpha_ref, x_ref, w1_ref, b1_ref, w2_ref, b2_ref,
                   hid_ref, code_ref):
    """Whole forward pass in one grid step.

    alpha_ref: (1,)   f32 in SMEM (scalar prefetch)
    x_ref:     (B, D) bf16    w1_ref: (D, H) bf16    b1_ref: (1, H) f32
    w2_ref:    (H, C) bf16    b2_ref: (1, C) f32
    hid_ref, code_ref: (B, C) f32
    """
    # First linear + ReLU (bf16 operands, f32 accumulation on the MXU).
    h = jnp.dot(x_ref[...], w1_ref[...], preferred_element_type=jnp.float32)
    h = jnp.maximum(h + b1_ref[...], 0.0)           # b1 broadcasts over batch

    # Second linear: cast activation back to bf16 for the MXU, accumulate f32.
    hid = jnp.dot(h.astype(w2_ref.dtype), w2_ref[...],
                  preferred_element_type=jnp.float32)
    hid = hid + b2_ref[...]

    alpha = alpha_ref[0]                             # runtime scalar from SMEM
    hid_ref[...] = hid
    code_ref[...] = jnp.tanh(alpha * hid)            # tanh goes to the EUP


def txtnet_forward(x, w1, b1, w2, b2, *, alpha=1.0):
    """Pallas implementation of TxtNet.forward.

    x:  (B, txt_feat_len) float32
    w1: (txt_feat_len, 4096), b1: (4096,)
    w2: (4096, code_len),     b2: (code_len,)
    alpha: python float or scalar array (runtime value; no recompile on change)
    returns (hid, code), each (B, code_len) float32
    """
    B, D = x.shape
    H = w1.shape[1]
    C = w2.shape[1]

    # Stream the large operands as bf16 (halves HBM traffic); biases stay f32
    # and are added to the f32 accumulator inside the kernel.
    x_bf = x.astype(jnp.bfloat16)
    w1_bf = w1.astype(jnp.bfloat16)
    w2_bf = w2.astype(jnp.bfloat16)
    b1_2d = b1.reshape(1, H).astype(jnp.float32)
    b2_2d = b2.reshape(1, C).astype(jnp.float32)
    alpha_arr = jnp.asarray(alpha, dtype=jnp.float32).reshape((1,))

    hid, code = pl.pallas_call(
        _txtnet_kernel,
        out_shape=(jax.ShapeDtypeStruct((B, C), jnp.float32),
                   jax.ShapeDtypeStruct((B, C), jnp.float32)),
        grid_spec=pltpu.PrefetchScalarGridSpec(
            num_scalar_prefetch=1,                 # alpha -> SMEM
            grid=(1,),                             # whole layer in one step
            in_specs=[
                pl.BlockSpec((B, D), lambda i, a: (0, 0)),   # x
                pl.BlockSpec((D, H), lambda i, a: (0, 0)),   # W1
                pl.BlockSpec((1, H), lambda i, a: (0, 0)),   # b1
                pl.BlockSpec((H, C), lambda i, a: (0, 0)),   # W2
                pl.BlockSpec((1, C), lambda i, a: (0, 0)),   # b2
            ],
            out_specs=[
                pl.BlockSpec((B, C), lambda i, a: (0, 0)),   # hid
                pl.BlockSpec((B, C), lambda i, a: (0, 0)),   # code
            ],
        ),
        compiler_params=pltpu.CompilerParams(
            dimension_semantics=("arbitrary",)),
    )(alpha_arr, x_bf, w1_bf, b1_2d, w2_bf, b2_2d)
    return hid, code


def txtnet_reference_f32(x, w1, b1, w2, b2, alpha):
    hid = jnp.maximum(x @ w1 + b1, 0.0) @ w2 + b2
    return hid, jnp.tanh(alpha * hid)


def txtnet_reference_bf16(x, w1, b1, w2, b2, alpha):
    """Reference using identical bf16 casts (isolates kernel-vs-XLA diffs)."""
    h = jnp.dot(x.astype(jnp.bfloat16), w1.astype(jnp.bfloat16),
                preferred_element_type=jnp.float32) + b1
    h = jnp.maximum(h, 0.0)
    hid = jnp.dot(h.astype(jnp.bfloat16), w2.astype(jnp.bfloat16),
                  preferred_element_type=jnp.float32) + b2
    return hid, jnp.tanh(alpha * hid)


def init_params(key, txt_feat_len=512, hidden=4096, code_len=64):
    """Deterministic init mirroring nn.Linear default (uniform +/- 1/sqrt(fan_in))."""
    k1, k2, k3, k4 = jax.random.split(key, 4)
    lim1 = 1.0 / math.sqrt(txt_feat_len)
    lim2 = 1.0 / math.sqrt(hidden)
    w1 = jax.random.uniform(k1, (txt_feat_len, hidden), jnp.float32, -lim1, lim1)
    b1 = jax.random.uniform(k2, (hidden,), jnp.float32, -lim1, lim1)
    w2 = jax.random.uniform(k3, (hidden, code_len), jnp.float32, -lim2, lim2)
    b2 = jax.random.uniform(k4, (code_len,), jnp.float32, -lim2, lim2)
    return w1, b1, w2, b2


if __name__ == "__main__":
    key = jax.random.PRNGKey(0)
    kx, kp = jax.random.split(key)

    batch = 8
    txt_feat_len = 512   # module default
    hidden = 4096        # hardcoded in the module
    code_len = 64

    x = jax.random.normal(kx, (batch, txt_feat_len), jnp.float32)
    w1, b1, w2, b2 = init_params(kp, txt_feat_len, hidden, code_len)

    fwd = jax.jit(txtnet_forward)

    # alpha = 1.0 (TxtNet default)
    hid, code = fwd(x, w1, b1, w2, b2, alpha=1.0)
    jax.block_until_ready((hid, code))

    # Tight check against a reference that uses the same bf16 casts.
    hid_m, code_m = txtnet_reference_bf16(x, w1, b1, w2, b2, 1.0)
    assert jnp.allclose(hid, hid_m, atol=2e-3, rtol=2e-3), "hid mismatch (bf16 ref)"
    assert jnp.allclose(code, code_m, atol=2e-3, rtol=2e-3), "code mismatch (bf16 ref)"

    # Loose check against the pure-f32 reference (bf16 weight rounding only).
    hid_f, code_f = txtnet_reference_f32(x, w1, b1, w2, b2, 1.0)
    assert jnp.allclose(hid, hid_f, atol=5e-2, rtol=5e-2), "hid mismatch (f32 ref)"
    assert jnp.allclose(code, code_f, atol=5e-2, rtol=5e-2), "code mismatch (f32 ref)"

    # set_alpha(epoch=3) -> alpha = sqrt(4); runtime scalar, no recompile.
    alpha2 = math.pow(3.0 + 1.0, 0.5)
    hid2, code2 = fwd(x, w1, b1, w2, b2, alpha=alpha2)
    jax.block_until_ready((hid2, code2))
    _, code2_m = txtnet_reference_bf16(x, w1, b1, w2, b2, alpha2)
    assert jnp.allclose(code2, code2_m, atol=2e-3, rtol=2e-3), "code mismatch (alpha2)"

    print("KERNEL_OK")
</pallas_src>

<mosaic_0001>
module attributes {stable_mosaic.version = 11 : i64} {
  func.func @_txtnet_kernel(%arg0: i32, %arg1: memref<1xf32, #tpu.memory_space<smem>>, %arg2: memref<8x512xbf16, #tpu.memory_space<vmem>>, %arg3: memref<512x4096xbf16, #tpu.memory_space<vmem>>, %arg4: memref<1x4096xf32, #tpu.memory_space<vmem>>, %arg5: memref<4096x64xbf16, #tpu.memory_space<vmem>>, %arg6: memref<1x64xf32, #tpu.memory_space<vmem>>, %arg7: memref<8x64xf32, #tpu.memory_space<vmem>>, %arg8: memref<8x64xf32, #tpu.memory_space<vmem>>) attributes {dimension_semantics = [#tpu.dimension_semantics<arbitrary>], iteration_bounds = array<i64: 1>, scalar_prefetch = 1 : i64, scratch_operands = 0 : i64, tpu.core_type = #tpu.core_type<tc>, window_params = [{pipeline_mode = #tpu.pipeline_mode<synchronous>, transform_indices = @transform_0, window_bounds = array<i64: 8, 512>}, {pipeline_mode = #tpu.pipeline_mode<synchronous>, transform_indices = @transform_1, window_bounds = array<i64: 512, 4096>}, {pipeline_mode = #tpu.pipeline_mode<synchronous>, transform_indices = @transform_2, window_bounds = array<i64: 1, 4096>}, {pipeline_mode = #tpu.pipeline_mode<synchronous>, transform_indices = @transform_3, window_bounds = array<i64: 4096, 64>}, {pipeline_mode = #tpu.pipeline_mode<synchronous>, transform_indices = @transform_4, window_bounds = array<i64: 1, 64>}, {pipeline_mode = #tpu.pipeline_mode<synchronous>, transform_indices = @transform_5, window_bounds = array<i64: 8, 64>}, {pipeline_mode = #tpu.pipeline_mode<synchronous>, transform_indices = @transform_6, window_bounds = array<i64: 8, 64>}]} {
    %c0 = arith.constant 0 : index
    %c0_0 = arith.constant 0 : index
    %0 = vector.load %arg2[%c0, %c0_0] : memref<8x512xbf16, #tpu.memory_space<vmem>>, vector<8x512xbf16>
    %c0_1 = arith.constant 0 : index
    %c0_2 = arith.constant 0 : index
    %1 = vector.load %arg3[%c0_1, %c0_2] : memref<512x4096xbf16, #tpu.memory_space<vmem>>, vector<512x4096xbf16>
    %cst = arith.constant dense<0.000000e+00> : vector<8x4096xf32>
    %2 = tpu.matmul %0, %1, %cst {dimension_numbers = #tpu.dot_dimension_numbers<[1], [0], [0], [1], [0, 0, 1, 1], [], []>} : vector<8x512xbf16>, vector<512x4096xbf16>, vector<8x4096xf32> -> vector<8x4096xf32>
    %c0_3 = arith.constant 0 : index
    %c0_4 = arith.constant 0 : index
    %3 = vector.load %arg4[%c0_3, %c0_4] : memref<1x4096xf32, #tpu.memory_space<vmem>>, vector<1x4096xf32>
    %4 = vector.broadcast %3 : vector<1x4096xf32> to vector<8x4096xf32>
    %5 = arith.addf %2, %4 : vector<8x4096xf32>
    %cst_5 = arith.constant 0.000000e+00 : f32
    %6 = vector.broadcast %cst_5 : f32 to vector<8x4096xf32>
    %7 = arith.maximumf %5, %6 : vector<8x4096xf32>
    %8 = arith.truncf %7 : vector<8x4096xf32> to vector<8x4096xbf16>
    %c0_6 = arith.constant 0 : index
    %c0_7 = arith.constant 0 : index
    %9 = vector.load %arg5[%c0_6, %c0_7] : memref<4096x64xbf16, #tpu.memory_space<vmem>>, vector<4096x64xbf16>
    %cst_8 = arith.constant dense<0.000000e+00> : vector<8x64xf32>
    %10 = tpu.matmul %8, %9, %cst_8 {dimension_numbers = #tpu.dot_dimension_numbers<[1], [0], [0], [1], [0, 0, 1, 1], [], []>} : vector<8x4096xbf16>, vector<4096x64xbf16>, vector<8x64xf32> -> vector<8x64xf32>
    %c0_9 = arith.constant 0 : index
    %c0_10 = arith.constant 0 : index
    %11 = vector.load %arg6[%c0_9, %c0_10] : memref<1x64xf32, #tpu.memory_space<vmem>>, vector<1x64xf32>
    %12 = vector.broadcast %11 : vector<1x64xf32> to vector<8x64xf32>
    %13 = arith.addf %10, %12 : vector<8x64xf32>
    %c0_11 = arith.constant 0 : index
    %14 = memref.load %arg1[%c0_11] : memref<1xf32, #tpu.memory_space<smem>>
    %c0_12 = arith.constant 0 : index
    %c0_13 = arith.constant 0 : index
    %15 = vector.load %arg7[%c0_12, %c0_13] : memref<8x64xf32, #tpu.memory_space<vmem>>, vector<8x64xf32>
    tpu.vector_store %arg7[%c0_12, %c0_13], %13 {strides = array<i32>} : memref<8x64xf32, #tpu.memory_space<vmem>>, vector<8x64xf32>,
    %16 = vector.broadcast %14 : f32 to vector<8x64xf32>
    %17 = arith.mulf %16, %13 : vector<8x64xf32>
    %18 = math.tanh %17 : vector<8x64xf32>
    %c0_14 = arith.constant 0 : index
    %c0_15 = arith.constant 0 : index
    %19 = vector.load %arg8[%c0_14, %c0_15] : memref<8x64xf32, #tpu.memory_space<vmem>>, vector<8x64xf32>
    tpu.vector_store %arg8[%c0_14, %c0_15], %18 {strides = array<i32>} : memref<8x64xf32, #tpu.memory_space<vmem>>, vector<8x64xf32>,
    return
  }
  func.func @transform_0(%arg0: i32, %arg1: memref<1xf32, #tpu.memory_space<smem>>) -> (i32, i32) {
    %c0_i32 = arith.constant 0 : i32
    %c0_i32_0 = arith.constant 0 : i32
    %c0_i32_1 = arith.constant 0 : i32
    return %c0_i32, %c0_i32_0 : i32, i32
  }
  func.func @transform_1(%arg0: i32, %arg1: memref<1xf32, #tpu.memory_space<smem>>) -> (i32, i32) {
    %c0_i32 = arith.constant 0 : i32
    %c0_i32_0 = arith.constant 0 : i32
    %c0_i32_1 = arith.constant 0 : i32
    return %c0_i32, %c0_i32_0 : i32, i32
  }
  func.func @transform_2(%arg0: i32, %arg1: memref<1xf32, #tpu.memory_space<smem>>) -> (i32, i32) {
    %c0_i32 = arith.constant 0 : i32
    %c0_i32_0 = arith.constant 0 : i32
    %c0_i32_1 = arith.constant 0 : i32
    return %c0_i32, %c0_i32_0 : i32, i32
  }
  func.func @transform_3(%arg0: i32, %arg1: memref<1xf32, #tpu.memory_space<smem>>) -> (i32, i32) {
    %c0_i32 = arith.constant 0 : i32
    %c0_i32_0 = arith.constant 0 : i32
    %c0_i32_1 = arith.constant 0 : i32
    return %c0_i32, %c0_i32_0 : i32, i32
  }
  func.func @transform_4(%arg0: i32, %arg1: memref<1xf32, #tpu.memory_space<smem>>) -> (i32, i32) {
    %c0_i32 = arith.constant 0 : i32
    %c0_i32_0 = arith.constant 0 : i32
    %c0_i32_1 = arith.constant 0 : i32
    return %c0_i32, %c0_i32_0 : i32, i32
  }
  func.func @transform_5(%arg0: i32, %arg1: memref<1xf32, #tpu.memory_space<smem>>) -> (i32, i32) {
    %c0_i32 = arith.constant 0 : i32
    %c0_i32_0 = arith.constant 0 : i32
    %c0_i32_1 = arith.constant 0 : i32
    return %c0_i32, %c0_i32_0 : i32, i32
  }
  func.func @transform_6(%arg0: i32, %arg1: memref<1xf32, #tpu.memory_space<smem>>) -> (i32, i32) {
    %c0_i32 = arith.constant 0 : i32
    %c0_i32_0 = arith.constant 0 : i32
    %c0_i32_1 = arith.constant 0 : i32
    return %c0_i32, %c0_i32_0 : i32, i32
  }
}

</mosaic_0001>

<bundles_post_ra>
// kernel: txtnet_forward.1
= control target key start
LH: loop header
LB: loop body
LE: loop exit
PB: predicated region body
PF: predicated region fallthrough
CT: control target
= control target key end

     0   :  { %14 = vsyncpa [#allocation5], 0  ;;  %s16710_s0 = inlined_call_operand.<no memory space> [shape: f32[1], index: 0, kind: input, shape index: {}]   ;;  %s16711_s1 = inlined_call_operand.vmem [shape: bf16[8,512], index: 1, kind: input, shape index: {}]   ;;  %s16712_s2 = inlined_call_operand.vmem [shape: bf16[512,4096], index: 2, kind: input, shape index: {}]   ;;  %s16713_s3 = inlined_call_operand.vmem [shape: f32[1,4096], index: 3, kind: input, shape index: {}]   ;;  %s16714_s4 = inlined_call_operand.vmem [shape: bf16[4096,64], index: 4, kind: input, shape index: {}]   ;;  %s16715_s5 = inlined_call_operand.vmem [shape: f32[1,64], index: 5, kind: input, shape index: {}]   ;;  %s16716_s6 = inlined_call_operand.hbm [shape: f32[8,64], index: 6, kind: output, shape index: {0}]   ;;  %s16717_s7 = inlined_call_operand.hbm [shape: f32[8,64], index: 7, kind: output, shape index: {1}]  }
   0x1   :  { %v29_v0 = vld [vmem:[%s16712_s2] sm:$0xff]  ;;  %v30_v2 = vld [vmem:[%s16712_s2 + $0x8] sm:$0xff] }
   0x2   :  { %v45_v1 = vld [vmem:[%s16712_s2 + $0x80] sm:$0xff]  ;;  %v46_v4 = vld [vmem:[%s16712_s2 + $0x88] sm:$0xff] }
   0x3   :  { %v10466_v3 = vcombine.high %v29_v0, %v45_v1  ;;  %v10465_v5 = vcombine.low %v29_v0, %v45_v1  ;;  %v61_v6 = vld [vmem:[%s16712_s2 + $0x100] sm:$0xff]  ;;  %v10468_v8 = vcombine.high %v30_v2, %v46_v4  ;;  %v10467_v9 = vcombine.low %v30_v2, %v46_v4  ;;  %v62_v11 = vld [vmem:[%s16712_s2 + $0x108] sm:$0xff] }
   0x4   :  { %v77_v7 = vld [vmem:[%s16712_s2 + $0x180] sm:$0xff]  ;;  %v78_v12 = vld [vmem:[%s16712_s2 + $0x188] sm:$0xff] }
   0x5   :  { %v10498_v10 = vcombine.high %v61_v6, %v77_v7  ;;  %v93_v13 = vld [vmem:[%s16712_s2 + $0x200] sm:$0xff]  ;;  %6355 = vmatprep.subr.bf16.mxu0 %v10466_v3  ;;  %v10500_v14 = vcombine.high %v62_v11, %v78_v12  ;;  %v94_v16 = vld [vmem:[%s16712_s2 + $0x208] sm:$0xff]  ;;  %6437 = vmatprep.subr.bf16.mxu1 %v10468_v8  ;;  %v10497_v18 = vcombine.low %v61_v6, %v77_v7 }
   0x6   :  { %v109_v15 = vld [vmem:[%s16712_s2 + $0x280] sm:$0xff]  ;;  %v110_v17 = vld [vmem:[%s16712_s2 + $0x288] sm:$0xff]  ;;  %6356 = vmatpush1.bf16.msra.mxu0 %v10465_v5  ;;  %6438 = vmatpush1.bf16.msra.mxu1 %v10467_v9  ;;  %v10499_v19 = vcombine.low %v62_v11, %v78_v12 }
   0x7   :  { %6357 = vmatprep.subr.bf16.mxu0 %v10498_v10  ;;  %v10530_v20 = vcombine.high %v93_v13, %v109_v15  ;;  %6439 = vmatprep.subr.bf16.mxu1 %v10500_v14  ;;  %v10532_v21 = vcombine.high %v94_v16, %v110_v17  ;;  %v125_v22 = vld [vmem:[%s16712_s2 + $0x300] sm:$0xff]  ;;  %v126_v24 = vld [vmem:[%s16712_s2 + $0x308] sm:$0xff]  ;;  %v10529_v26 = vcombine.low %v93_v13, %v109_v15 }
   0x8   :  { %v141_v23 = vld [vmem:[%s16712_s2 + $0x380] sm:$0xff]  ;;  %v142_v25 = vld [vmem:[%s16712_s2 + $0x388] sm:$0xff]  ;;  %v10531_v27 = vcombine.low %v94_v16, %v110_v17 }
   0x9   :  { %v10562_v28 = vcombine.high %v125_v22, %v141_v23  ;;  %v10564_v29 = vcombine.high %v126_v24, %v142_v25  ;;  %v157_v30 = vld [vmem:[%s16712_s2 + $0x400] sm:$0xff]  ;;  %v158_v32 = vld [vmem:[%s16712_s2 + $0x408] sm:$0xff]  ;;  %v10561_v34 = vcombine.low %v125_v22, %v141_v23  ;;  %v10563_v35 = vcombine.low %v126_v24, %v142_v25 }
   0xa   :  { %6358 = vmatpush1.bf16.msra.mxu0 %v10497_v18  ;;  %6440 = vmatpush1.bf16.msra.mxu1 %v10499_v19  ;;  %v173_v31 = vld [vmem:[%s16712_s2 + $0x480] sm:$0xff]  ;;  %v174_v33 = vld [vmem:[%s16712_s2 + $0x488] sm:$0xff] }
   0xb   :  { %6359 = vmatprep.subr.bf16.mxu0 %v10530_v20  ;;  %6441 = vmatprep.subr.bf16.mxu1 %v10532_v21  ;;  %v10594_v36 = vcombine.high %v157_v30, %v173_v31  ;;  %v10596_v37 = vcombine.high %v158_v32, %v174_v33  ;;  %v189_v38 = vld [vmem:[%s16712_s2 + $0x500] sm:$0xff]  ;;  %v190_v40 = vld [vmem:[%s16712_s2 + $0x508] sm:$0xff]  ;;  %v10593_v42 = vcombine.low %v157_v30, %v173_v31 }
   0xc   :  { %v205_v39 = vld [vmem:[%s16712_s2 + $0x580] sm:$0xff]  ;;  %v206_v41 = vld [vmem:[%s16712_s2 + $0x588] sm:$0xff]  ;;  %v10595_v43 = vcombine.low %v158_v32, %v174_v33 }
   0xd   :  { %v10626_v44 = vcombine.high %v189_v38, %v205_v39  ;;  %v10628_v45 = vcombine.high %v190_v40, %v206_v41  ;;  %v221_v46 = vld [vmem:[%s16712_s2 + $0x600] sm:$0xff]  ;;  %v222_v48 = vld [vmem:[%s16712_s2 + $0x608] sm:$0xff]  ;;  %v10625_v50 = vcombine.low %v189_v38, %v205_v39  ;;  %v10627_v51 = vcombine.low %v190_v40, %v206_v41 }
   0xe   :  { %6360 = vmatpush1.bf16.msra.mxu0 %v10529_v26  ;;  %6442 = vmatpush1.bf16.msra.mxu1 %v10531_v27  ;;  %v237_v47 = vld [vmem:[%s16712_s2 + $0x680] sm:$0xff]  ;;  %v238_v49 = vld [vmem:[%s16712_s2 + $0x688] sm:$0xff] }
   0xf   :  { %6361 = vmatprep.subr.bf16.mxu0 %v10562_v28  ;;  %6443 = vmatprep.subr.bf16.mxu1 %v10564_v29  ;;  %v10658_v52 = vcombine.high %v221_v46, %v237_v47  ;;  %v12635_v53 = vld [vmem:[%s16711_s1] sm:$0xff]  ;;  %v10660_v54 = vcombine.high %v222_v48, %v238_v49  ;;  %v254_v58 = vld [vmem:[%s16712_s2 + $0x708] sm:$0xff]  ;;  %v10657_v60 = vcombine.low %v221_v46, %v237_v47 }
  0x10   :  { %v253_v55 = vld [vmem:[%s16712_s2 + $0x700] sm:$0xff]  ;;  %v12645_v57 = vcombine.high %v12635_v53, %v12635_v53  ;;  %v270_v59 = vld [vmem:[%s16712_s2 + $0x788] sm:$0xff]  ;;  %v10659_v61 = vcombine.low %v222_v48, %v238_v49 }
  0x11   :  { %v269_v56 = vld [vmem:[%s16712_s2 + $0x780] sm:$0xff]  ;;  %v10692_v63 = vcombine.high %v254_v58, %v270_v59  ;;  %v286_v2 = vld [vmem:[%s16712_s2 + $0x808] sm:$0xff]  ;;  %v10691_v5 = vcombine.low %v254_v58, %v270_v59 }
  0x12   :  { %6362 = vmatpush1.bf16.msra.mxu0 %v10561_v34  ;;  %6444 = vmatpush1.bf16.msra.mxu1 %v10563_v35  ;;  %v10690_v62 = vcombine.high %v253_v55, %v269_v56  ;;  %v285_v0 = vld [vmem:[%s16712_s2 + $0x800] sm:$0xff]  ;;  %v302_v3 = vld [vmem:[%s16712_s2 + $0x888] sm:$0xff]  ;;  %v10689_v4 = vcombine.low %v253_v55, %v269_v56 }
  0x13   :  { %6363 = vmatprep.subr.bf16.mxu0 %v10594_v36  ;;  %6445 = vmatprep.subr.bf16.mxu1 %v10596_v37  ;;  %v301_v1 = vld [vmem:[%s16712_s2 + $0x880] sm:$0xff]  ;;  %v10724_v7 = vcombine.high %v286_v2, %v302_v3  ;;  %v318_v10 = vld [vmem:[%s16712_s2 + $0x908] sm:$0xff]  ;;  %v10723_v13 = vcombine.low %v286_v2, %v302_v3 }
  0x14   :  { %6387 = vmatprep.mubr.bf16.mxu0 %v12645_v57  ;;  %6469 = vmatprep.mubr.bf16.mxu1 %v12645_v57  ;;  %v10722_v6 = vcombine.high %v285_v0, %v301_v1  ;;  %v317_v8 = vld [vmem:[%s16712_s2 + $0x900] sm:$0xff]  ;;  %v334_v11 = vld [vmem:[%s16712_s2 + $0x988] sm:$0xff]  ;;  %v10721_v12 = vcombine.low %v285_v0, %v301_v1 }
  0x15   :  { %v333_v9 = vld [vmem:[%s16712_s2 + $0x980] sm:$0xff]  ;;  %v10756_v15 = vcombine.high %v318_v10, %v334_v11  ;;  %v350_v18 = vld [vmem:[%s16712_s2 + $0xa08] sm:$0xff]  ;;  %v10755_v21 = vcombine.low %v318_v10, %v334_v11 }
  0x16   :  { %6364 = vmatpush1.bf16.msra.mxu0 %v10593_v42  ;;  %6446 = vmatpush1.bf16.msra.mxu1 %v10595_v43  ;;  %v10754_v14 = vcombine.high %v317_v8, %v333_v9  ;;  %v349_v16 = vld [vmem:[%s16712_s2 + $0xa00] sm:$0xff]  ;;  %v366_v19 = vld [vmem:[%s16712_s2 + $0xa88] sm:$0xff]  ;;  %v10753_v20 = vcombine.low %v317_v8, %v333_v9 }
  0x17   :  { %6365 = vmatprep.subr.bf16.mxu0 %v10626_v44  ;;  %6447 = vmatprep.subr.bf16.mxu1 %v10628_v45  ;;  %v365_v17 = vld [vmem:[%s16712_s2 + $0xa80] sm:$0xff]  ;;  %v10788_v23 = vcombine.high %v350_v18, %v366_v19  ;;  %v382_v26 = vld [vmem:[%s16712_s2 + $0xb08] sm:$0xff]  ;;  %v10787_v29 = vcombine.low %v350_v18, %v366_v19 }
  0x18   :  { %v10786_v22 = vcombine.high %v349_v16, %v365_v17  ;;  %v381_v24 = vld [vmem:[%s16712_s2 + $0xb00] sm:$0xff]  ;;  %v398_v27 = vld [vmem:[%s16712_s2 + $0xb88] sm:$0xff]  ;;  %v10785_v28 = vcombine.low %v349_v16, %v365_v17 }
  0x19   :  { %v397_v25 = vld [vmem:[%s16712_s2 + $0xb80] sm:$0xff]  ;;  %v10820_v31 = vcombine.high %v382_v26, %v398_v27  ;;  %v414_v34 = vld [vmem:[%s16712_s2 + $0xc08] sm:$0xff]  ;;  %v10819_v37 = vcombine.low %v382_v26, %v398_v27 }
  0x1a   :  { %6366 = vmatpush1.bf16.msra.mxu0 %v10625_v50  ;;  %6448 = vmatpush1.bf16.msra.mxu1 %v10627_v51  ;;  %v10818_v30 = vcombine.high %v381_v24, %v397_v25  ;;  %v413_v32 = vld [vmem:[%s16712_s2 + $0xc00] sm:$0xff]  ;;  %v430_v35 = vld [vmem:[%s16712_s2 + $0xc88] sm:$0xff]  ;;  %v10817_v36 = vcombine.low %v381_v24, %v397_v25 }
  0x1b   :  { %6367 = vmatprep.subr.bf16.mxu0 %v10658_v52  ;;  %6449 = vmatprep.subr.bf16.mxu1 %v10660_v54  ;;  %v429_v33 = vld [vmem:[%s16712_s2 + $0xc80] sm:$0xff]  ;;  %v10852_v39 = vcombine.high %v414_v34, %v430_v35  ;;  %v446_v42 = vld [vmem:[%s16712_s2 + $0xd08] sm:$0xff]  ;;  %v10851_v45 = vcombine.low %v414_v34, %v430_v35 }
  0x1c   :  { %v10850_v38 = vcombine.high %v413_v32, %v429_v33  ;;  %v445_v40 = vld [vmem:[%s16712_s2 + $0xd00] sm:$0xff]  ;;  %v462_v43 = vld [vmem:[%s16712_s2 + $0xd88] sm:$0xff]  ;;  %v10849_v44 = vcombine.low %v413_v32, %v429_v33 }
  0x1d   :  { %v461_v41 = vld [vmem:[%s16712_s2 + $0xd80] sm:$0xff]  ;;  %v10884_v47 = vcombine.high %v446_v42, %v462_v43  ;;  %v478_v50 = vld [vmem:[%s16712_s2 + $0xe08] sm:$0xff]  ;;  %v10883_v54 = vcombine.low %v446_v42, %v462_v43 }
  0x1e   :  { %6368 = vmatpush1.bf16.msra.mxu0 %v10657_v60  ;;  %6450 = vmatpush1.bf16.msra.mxu1 %v10659_v61  ;;  %v10882_v46 = vcombine.high %v445_v40, %v461_v41  ;;  %v477_v48 = vld [vmem:[%s16712_s2 + $0xe00] sm:$0xff]  ;;  %v494_v51 = vld [vmem:[%s16712_s2 + $0xe88] sm:$0xff]  ;;  %v10881_v52 = vcombine.low %v445_v40, %v461_v41 }
  0x1f   :  { %6369 = vmatprep.subr.bf16.mxu0 %v10690_v62  ;;  %6451 = vmatprep.subr.bf16.mxu1 %v10692_v63  ;;  %v493_v49 = vld [vmem:[%s16712_s2 + $0xe80] sm:$0xff]  ;;  %v10916_v56 = vcombine.high %v478_v50, %v494_v51  ;;  %v510_v60 = vld [vmem:[%s16712_s2 + $0xf08] sm:$0xff]  ;;  %v10915_v63 = vcombine.low %v478_v50, %v494_v51 }
  0x20   :  { %v10914_v55 = vcombine.high %v477_v48, %v493_v49  ;;  %v509_v58 = vld [vmem:[%s16712_s2 + $0xf00] sm:$0xff]  ;;  %v526_v61 = vld [vmem:[%s16712_s2 + $0xf88] sm:$0xff]  ;;  %v10913_v62 = vcombine.low %v477_v48, %v493_v49 }
  0x21   :  { %v525_v59 = vld [vmem:[%s16712_s2 + $0xf80] sm:$0xff]  ;;  %v10948_v1 = vcombine.high %v510_v60, %v526_v61 }
  0x22   :  { %6370 = vmatpush1.bf16.msra.mxu0 %v10689_v4  ;;  %6452 = vmatpush1.bf16.msra.mxu1 %v10691_v5  ;;  %v10946_v0 = vcombine.high %v509_v58, %v525_v59  ;;  %v541_v2 = vld [vmem:[%s16712_s2 + $0x1000] sm:$0xff]  ;;  %v542_v4 = vld [vmem:[%s16712_s2 + $0x1008] sm:$0xff] }
  0x23   :  { %6371 = vmatprep.subr.bf16.mxu0 %v10722_v6  ;;  %6453 = vmatprep.subr.bf16.mxu1 %v10724_v7  ;;  %v557_v3 = vld [vmem:[%s16712_s2 + $0x1080] sm:$0xff]  ;;  %v558_v5 = vld [vmem:[%s16712_s2 + $0x1088] sm:$0xff]  ;;  %v10945_v6 = vcombine.low %v509_v58, %v525_v59  ;;  %v10947_v7 = vcombine.low %v510_v60, %v526_v61 }
  0x24   :  { %v10978_v8 = vcombine.high %v541_v2, %v557_v3  ;;  %v10980_v9 = vcombine.high %v542_v4, %v558_v5  ;;  %v573_v10 = vld [vmem:[%s16712_s2 + $0x1100] sm:$0xff]  ;;  %v10977_v16 = vcombine.low %v541_v2, %v557_v3  ;;  %v10979_v17 = vcombine.low %v542_v4, %v558_v5 }
  0x25   :  { %v589_v11 = vld [vmem:[%s16712_s2 + $0x1180] sm:$0xff] }
  0x26   :  { %6372 = vmatpush1.bf16.msra.mxu0 %v10721_v12  ;;  %6454 = vmatpush1.bf16.msra.mxu1 %v10723_v13  ;;  %v12771_v12 = vcombine.low %v12635_v53, %v12635_v53  ;;  %v574_v13 = vld [vmem:[%s16712_s2 + $0x1108] sm:$0xff]  ;;  %v11010_v53 = vcombine.high %v573_v10, %v589_v11  ;;  %v605_v18 = vld [vmem:[%s16712_s2 + $0x1200] sm:$0xff]  ;;  %v11009_v24 = vcombine.low %v573_v10, %v589_v11 }
  0x27   :  { %6373 = vmatprep.subr.bf16.mxu0 %v10754_v14  ;;  %6455 = vmatprep.subr.bf16.mxu1 %v10756_v15  ;;  %v590_v14 = vld [vmem:[%s16712_s2 + $0x1188] sm:$0xff]  ;;  %v621_v19 = vld [vmem:[%s16712_s2 + $0x1280] sm:$0xff] }
  0x28   :  { %v12782_v15 = vld [vmem:[%s16711_s1 + $0x8] sm:$0xff]  ;;  %v11011_v25 = vcombine.low %v574_v13, %v590_v14  ;;  %v11042_v26 = vcombine.high %v605_v18, %v621_v19  ;;  %v637_v27 = vld [vmem:[%s16712_s2 + $0x1300] sm:$0xff]  ;;  %v11041_v32 = vcombine.low %v605_v18, %v621_v19 }
  0x29   :  { %v669_v35 = vld [vmem:[%s16712_s2 + $0x1400] sm:$0xff]  ;;  %v846_v18 = vld [vmem:[%s16712_s2 + $0x1988] sm:$0xff] }
  0x2a   :  { %6374 = vmatpush1.bf16.msra.mxu0 %v10753_v20  ;;  %6456 = vmatpush1.bf16.msra.mxu1 %v10755_v21  ;;  %v606_v20 = vld [vmem:[%s16712_s2 + $0x1208] sm:$0xff]  ;;  %v11012_v21 = vcombine.high %v574_v13, %v590_v14  ;;  %v701_v43 = vld [vmem:[%s16712_s2 + $0x1500] sm:$0xff] }
  0x2b   :  { %6375 = vmatprep.subr.bf16.mxu0 %v10786_v22  ;;  %6457 = vmatprep.subr.bf16.mxu1 %v10788_v23  ;;  %v622_v22 = vld [vmem:[%s16712_s2 + $0x1288] sm:$0xff]  ;;  %v12798_v23 = vcombine.high %v12782_v15, %v12782_v15  ;;  %v733_v51 = vld [vmem:[%s16712_s2 + $0x1600] sm:$0xff] }
  0x2c   :  { %v11043_v33 = vcombine.low %v606_v20, %v622_v22  ;;  %v765_v61 = vld [vmem:[%s16712_s2 + $0x1700] sm:$0xff] }
  0x2d   :  { %v797_v5 = vld [vmem:[%s16712_s2 + $0x1800] sm:$0xff] }
  0x2e   :  { %6376 = vmatpush1.bf16.msra.mxu0 %v10785_v28  ;;  %6458 = vmatpush1.bf16.msra.mxu1 %v10787_v29  ;;  %v653_v28 = vld [vmem:[%s16712_s2 + $0x1380] sm:$0xff]  ;;  %v638_v29 = vld [vmem:[%s16712_s2 + $0x1308] sm:$0xff] }
  0x2f   :  { %6377 = vmatprep.subr.bf16.mxu0 %v10818_v30  ;;  %6459 = vmatprep.subr.bf16.mxu1 %v10820_v31  ;;  %v11044_v30 = vcombine.high %v606_v20, %v622_v22  ;;  %v654_v31 = vld [vmem:[%s16712_s2 + $0x1388] sm:$0xff]  ;;  %v11074_v34 = vcombine.high %v637_v27, %v653_v28  ;;  %v11073_v40 = vcombine.low %v637_v27, %v653_v28  ;;  %v829_v14 = vld [vmem:[%s16712_s2 + $0x1900] sm:$0xff] }
  0x30   :  { %v11075_v41 = vcombine.low %v638_v29, %v654_v31  ;;  %v861_v22 = vld [vmem:[%s16712_s2 + $0x1a00] sm:$0xff]  ;;  %v878_v27 = vld [vmem:[%s16712_s2 + $0x1a88] sm:$0xff] }
  0x32   :  { %6378 = vmatpush1.bf16.msra.mxu0 %v10817_v36  ;;  %6460 = vmatpush1.bf16.msra.mxu1 %v10819_v37  ;;  %v685_v36 = vld [vmem:[%s16712_s2 + $0x1480] sm:$0xff]  ;;  %v670_v37 = vld [vmem:[%s16712_s2 + $0x1408] sm:$0xff] }
  0x33   :  { %6379 = vmatprep.subr.bf16.mxu0 %v10850_v38  ;;  %6461 = vmatprep.subr.bf16.mxu1 %v10852_v39  ;;  %v11076_v38 = vcombine.high %v638_v29, %v654_v31  ;;  %v686_v39 = vld [vmem:[%s16712_s2 + $0x1488] sm:$0xff]  ;;  %v11106_v42 = vcombine.high %v669_v35, %v685_v36  ;;  %v11105_v48 = vcombine.low %v669_v35, %v685_v36  ;;  %v893_v31 = vld [vmem:[%s16712_s2 + $0x1b00] sm:$0xff] }
  0x34   :  { %v11107_v49 = vcombine.low %v670_v37, %v686_v39  ;;  %v910_v35 = vld [vmem:[%s16712_s2 + $0x1b88] sm:$0xff] }
  0x36   :  { %6380 = vmatpush1.bf16.msra.mxu0 %v10849_v44  ;;  %6462 = vmatpush1.bf16.msra.mxu1 %v10851_v45  ;;  %v717_v44 = vld [vmem:[%s16712_s2 + $0x1580] sm:$0xff]  ;;  %v702_v45 = vld [vmem:[%s16712_s2 + $0x1508] sm:$0xff] }
  0x37   :  { %6381 = vmatprep.subr.bf16.mxu0 %v10882_v46  ;;  %6463 = vmatprep.subr.bf16.mxu1 %v10884_v47  ;;  %v11108_v46 = vcombine.high %v670_v37, %v686_v39  ;;  %v718_v47 = vld [vmem:[%s16712_s2 + $0x1588] sm:$0xff]  ;;  %v11138_v50 = vcombine.high %v701_v43, %v717_v44  ;;  %v11137_v58 = vcombine.low %v701_v43, %v717_v44  ;;  %v925_v39 = vld [vmem:[%s16712_s2 + $0x1c00] sm:$0xff] }
  0x38   :  { %v11139_v59 = vcombine.low %v702_v45, %v718_v47  ;;  %v942_v43 = vld [vmem:[%s16712_s2 + $0x1c88] sm:$0xff] }
  0x3a   :  { %6382 = vmatpush1.bf16.msra.mxu0 %v10881_v52  ;;  %6464 = vmatpush1.bf16.msra.mxu1 %v10883_v54  ;;  %v749_v52 = vld [vmem:[%s16712_s2 + $0x1680] sm:$0xff]  ;;  %v734_v54 = vld [vmem:[%s16712_s2 + $0x1608] sm:$0xff] }
  0x3b   :  { %6383 = vmatprep.subr.bf16.mxu0 %v10914_v55  ;;  %6465 = vmatprep.subr.bf16.mxu1 %v10916_v56  ;;  %v11140_v55 = vcombine.high %v702_v45, %v718_v47  ;;  %v750_v56 = vld [vmem:[%s16712_s2 + $0x1688] sm:$0xff]  ;;  %v11170_v60 = vcombine.high %v733_v51, %v749_v52  ;;  %v11169_v2 = vcombine.low %v733_v51, %v749_v52  ;;  %v957_v47 = vld [vmem:[%s16712_s2 + $0x1d00] sm:$0xff] }
  0x3c   :  { %v11171_v3 = vcombine.low %v734_v54, %v750_v56  ;;  %v974_v51 = vld [vmem:[%s16712_s2 + $0x1d88] sm:$0xff] }
  0x3e   :  { %6384 = vmatpush1.bf16.msra.mxu0 %v10913_v62  ;;  %6466 = vmatpush1.bf16.msra.mxu1 %v10915_v63  ;;  %v781_v62 = vld [vmem:[%s16712_s2 + $0x1780] sm:$0xff]  ;;  %v766_v63 = vld [vmem:[%s16712_s2 + $0x1708] sm:$0xff] }
  0x3f   :  { %6385 = vmatprep.subr.bf16.mxu0 %v10946_v0  ;;  %6467 = vmatprep.subr.bf16.mxu1 %v10948_v1  ;;  %v11172_v0 = vcombine.high %v734_v54, %v750_v56  ;;  %v782_v1 = vld [vmem:[%s16712_s2 + $0x1788] sm:$0xff]  ;;  %v11202_v4 = vcombine.high %v765_v61, %v781_v62  ;;  %v11201_v10 = vcombine.low %v765_v61, %v781_v62  ;;  %v989_v56 = vld [vmem:[%s16712_s2 + $0x1e00] sm:$0xff] }
  0x40   :  { %v11203_v11 = vcombine.low %v766_v63, %v782_v1  ;;  %v1006_v61 = vld [vmem:[%s16712_s2 + $0x1e88] sm:$0xff] }
  0x42   :  { %6386 = vmatpush1.bf16.msra.mxu0 %v10945_v6  ;;  %6468 = vmatpush1.bf16.msra.mxu1 %v10947_v7  ;;  %v813_v6 = vld [vmem:[%s16712_s2 + $0x1880] sm:$0xff]  ;;  %v798_v7 = vld [vmem:[%s16712_s2 + $0x1808] sm:$0xff] }
  0x43   :  { %6396 = vmatprep.subr.bf16.mxu0 %v10978_v8  ;;  %6478 = vmatprep.subr.bf16.mxu1 %v10980_v9  ;;  %v11204_v8 = vcombine.high %v766_v63, %v782_v1  ;;  %v814_v9 = vld [vmem:[%s16712_s2 + $0x1888] sm:$0xff]  ;;  %v11234_v13 = vcombine.high %v797_v5, %v813_v6  ;;  %v11233_v19 = vcombine.low %v797_v5, %v813_v6  ;;  %v1021_v1 = vld [vmem:[%s16712_s2 + $0x1f00] sm:$0xff] }
  0x44   :  { %v11235_v20 = vcombine.low %v798_v7, %v814_v9  ;;  %v1038_v5 = vld [vmem:[%s16712_s2 + $0x1f88] sm:$0xff] }
  0x45   :  { %6388 = vmatmul.mubr.bf16.vlgmr.msra.gmra.mrb[0].mxu0 %v12771_v12  ;;  %6470 = vmatmul.mubr.bf16.vlgmr.msra.gmra.mrb[0].mxu1 %v12771_v12 }
  0x46   :  { %6397 = vmatpush1.bf16.msra.mxu0 %v10977_v16  ;;  %6479 = vmatpush1.bf16.msra.mxu1 %v10979_v17  ;;  %v845_v16 = vld [vmem:[%s16712_s2 + $0x1980] sm:$0xff]  ;;  %v830_v17 = vld [vmem:[%s16712_s2 + $0x1908] sm:$0xff] }
  0x47   :  { %6398 = vmatprep.subr.bf16.mxu0 %v11010_v53  ;;  %6480 = vmatprep.subr.bf16.mxu1 %v11012_v21  ;;  %v11236_v53 = vcombine.high %v798_v7, %v814_v9  ;;  %v11266_v21 = vcombine.high %v829_v14, %v845_v16  ;;  %v11265_v28 = vcombine.low %v829_v14, %v845_v16  ;;  %v31_v9 = vld [vmem:[%s16712_s2 + $0x10] sm:$0xff]  ;;  %v48_v14 = vld [vmem:[%s16712_s2 + $0x98] sm:$0xff] }
  0x48   :  { %6428 = vmatprep.mubr.bf16.mxu0 %v12798_v23  ;;  %6510 = vmatprep.mubr.bf16.mxu1 %v12798_v23  ;;  %v11267_v29 = vcombine.low %v830_v17, %v846_v18 }
  0x4a   :  { %6399 = vmatpush1.bf16.msra.mxu0 %v11009_v24  ;;  %6481 = vmatpush1.bf16.msra.mxu1 %v11011_v25  ;;  %v877_v24 = vld [vmem:[%s16712_s2 + $0x1a80] sm:$0xff]  ;;  %v862_v25 = vld [vmem:[%s16712_s2 + $0x1a08] sm:$0xff] }
  0x4b   :  { %6400 = vmatprep.subr.bf16.mxu0 %v11042_v26  ;;  %6482 = vmatprep.subr.bf16.mxu1 %v11044_v30  ;;  %v11268_v26 = vcombine.high %v830_v17, %v846_v18  ;;  %v11298_v30 = vcombine.high %v861_v22, %v877_v24  ;;  %v11297_v36 = vcombine.low %v861_v22, %v877_v24  ;;  %v63_v18 = vld [vmem:[%s16712_s2 + $0x110] sm:$0xff]  ;;  %v80_v22 = vld [vmem:[%s16712_s2 + $0x198] sm:$0xff] }
  0x4c   :  { %v11299_v37 = vcombine.low %v862_v25, %v878_v27  ;;  %v12986_v24 = vcombine.low %v12782_v15, %v12782_v15 }
  0x4e   :  { %6401 = vmatpush1.bf16.msra.mxu0 %v11041_v32  ;;  %6483 = vmatpush1.bf16.msra.mxu1 %v11043_v33  ;;  %v909_v32 = vld [vmem:[%s16712_s2 + $0x1b80] sm:$0xff]  ;;  %v894_v33 = vld [vmem:[%s16712_s2 + $0x1b08] sm:$0xff] }
  0x4f   :  { %6402 = vmatprep.subr.bf16.mxu0 %v11074_v34  ;;  %6484 = vmatprep.subr.bf16.mxu1 %v11076_v38  ;;  %v11300_v34 = vcombine.high %v862_v25, %v878_v27  ;;  %v11330_v38 = vcombine.high %v893_v31, %v909_v32  ;;  %v11329_v44 = vcombine.low %v893_v31, %v909_v32  ;;  %v112_v31 = vld [vmem:[%s16712_s2 + $0x298] sm:$0xff] }
  0x50   :  { %v11331_v45 = vcombine.low %v894_v33, %v910_v35 }
  0x52   :  { %6403 = vmatpush1.bf16.msra.mxu0 %v11073_v40  ;;  %6485 = vmatpush1.bf16.msra.mxu1 %v11075_v41  ;;  %v941_v40 = vld [vmem:[%s16712_s2 + $0x1c80] sm:$0xff]  ;;  %v926_v41 = vld [vmem:[%s16712_s2 + $0x1c08] sm:$0xff] }
  0x53   :  { %6404 = vmatprep.subr.bf16.mxu0 %v11106_v42  ;;  %6486 = vmatprep.subr.bf16.mxu1 %v11108_v46  ;;  %v11332_v42 = vcombine.high %v894_v33, %v910_v35  ;;  %v11362_v46 = vcombine.high %v925_v39, %v941_v40  ;;  %v11361_v52 = vcombine.low %v925_v39, %v941_v40  ;;  %v127_v35 = vld [vmem:[%s16712_s2 + $0x310] sm:$0xff]  ;;  %v144_v39 = vld [vmem:[%s16712_s2 + $0x398] sm:$0xff] }
  0x54   :  { %v11363_v54 = vcombine.low %v926_v41, %v942_v43 }
  0x56   :  { %6405 = vmatpush1.bf16.msra.mxu0 %v11105_v48  ;;  %6487 = vmatpush1.bf16.msra.mxu1 %v11107_v49  ;;  %v973_v48 = vld [vmem:[%s16712_s2 + $0x1d80] sm:$0xff]  ;;  %v958_v49 = vld [vmem:[%s16712_s2 + $0x1d08] sm:$0xff] }
  0x57   :  { %6406 = vmatprep.subr.bf16.mxu0 %v11138_v50  ;;  %6488 = vmatprep.subr.bf16.mxu1 %v11140_v55  ;;  %v11364_v50 = vcombine.high %v926_v41, %v942_v43  ;;  %v11394_v55 = vcombine.high %v957_v47, %v973_v48  ;;  %v11393_v62 = vcombine.low %v957_v47, %v973_v48  ;;  %v159_v43 = vld [vmem:[%s16712_s2 + $0x410] sm:$0xff]  ;;  %v176_v47 = vld [vmem:[%s16712_s2 + $0x498] sm:$0xff] }
  0x58   :  { %v11395_v63 = vcombine.low %v958_v49, %v974_v51 }
  0x5a   :  { %6407 = vmatpush1.bf16.msra.mxu0 %v11137_v58  ;;  %6489 = vmatpush1.bf16.msra.mxu1 %v11139_v59  ;;  %v1005_v58 = vld [vmem:[%s16712_s2 + $0x1e80] sm:$0xff]  ;;  %v990_v59 = vld [vmem:[%s16712_s2 + $0x1e08] sm:$0xff] }
  0x5b   :  { %6408 = vmatprep.subr.bf16.mxu0 %v11170_v60  ;;  %6490 = vmatprep.subr.bf16.mxu1 %v11172_v0  ;;  %v11396_v60 = vcombine.high %v958_v49, %v974_v51  ;;  %v11426_v0 = vcombine.high %v989_v56, %v1005_v58  ;;  %v11425_v6 = vcombine.low %v989_v56, %v1005_v58  ;;  %v191_v51 = vld [vmem:[%s16712_s2 + $0x510] sm:$0xff]  ;;  %v208_v56 = vld [vmem:[%s16712_s2 + $0x598] sm:$0xff] }
  0x5c   :  { %v11427_v7 = vcombine.low %v990_v59, %v1006_v61 }
  0x5e   :  { %6409 = vmatpush1.bf16.msra.mxu0 %v11169_v2  ;;  %6491 = vmatpush1.bf16.msra.mxu1 %v11171_v3  ;;  %v1037_v2 = vld [vmem:[%s16712_s2 + $0x1f80] sm:$0xff]  ;;  %v1022_v3 = vld [vmem:[%s16712_s2 + $0x1f08] sm:$0xff] }
  0x5f   :  { %6410 = vmatprep.subr.bf16.mxu0 %v11202_v4  ;;  %6492 = vmatprep.subr.bf16.mxu1 %v11204_v8  ;;  %v11428_v4 = vcombine.high %v990_v59, %v1006_v61  ;;  %v11458_v8 = vcombine.high %v1021_v1, %v1037_v2  ;;  %v11457_v16 = vcombine.low %v1021_v1, %v1037_v2  ;;  %v223_v61 = vld [vmem:[%s16712_s2 + $0x610] sm:$0xff]  ;;  %v240_v1 = vld [vmem:[%s16712_s2 + $0x698] sm:$0xff] }
  0x60   :  { %v11459_v17 = vcombine.low %v1022_v3, %v1038_v5 }
  0x62   :  { %6411 = vmatpush1.bf16.msra.mxu0 %v11201_v10  ;;  %6493 = vmatpush1.bf16.msra.mxu1 %v11203_v11  ;;  %v47_v10 = vld [vmem:[%s16712_s2 + $0x90] sm:$0xff]  ;;  %v32_v11 = vld [vmem:[%s16712_s2 + $0x18] sm:$0xff] }
  0x63   :  { %6412 = vmatprep.subr.bf16.mxu0 %v11234_v13  ;;  %6494 = vmatprep.subr.bf16.mxu1 %v11236_v53  ;;  %v11460_v13 = vcombine.high %v1022_v3, %v1038_v5  ;;  %v10470_v53 = vcombine.high %v31_v9, %v47_v10  ;;  %v10469_v25 = vcombine.low %v31_v9, %v47_v10  ;;  %v255_v5 = vld [vmem:[%s16712_s2 + $0x710] sm:$0xff]  ;;  %v272_v9 = vld [vmem:[%s16712_s2 + $0x798] sm:$0xff] }
  0x66   :  { %6413 = vmatpush1.bf16.msra.mxu0 %v11233_v19  ;;  %6495 = vmatpush1.bf16.msra.mxu1 %v11235_v20  ;;  %v79_v19 = vld [vmem:[%s16712_s2 + $0x190] sm:$0xff]  ;;  %v64_v20 = vld [vmem:[%s16712_s2 + $0x118] sm:$0xff] }
  0x67   :  { %6414 = vmatprep.subr.bf16.mxu0 %v11266_v21  ;;  %6496 = vmatprep.subr.bf16.mxu1 %v11268_v26  ;;  %v10472_v21 = vcombine.high %v32_v11, %v48_v14  ;;  %v10471_v26 = vcombine.low %v32_v11, %v48_v14  ;;  %v10502_v27 = vcombine.high %v63_v18, %v79_v19  ;;  %v287_v14 = vld [vmem:[%s16712_s2 + $0x810] sm:$0xff] }
  0x68   :  { %v10504_v15 = vcombine.high %v64_v20, %v80_v22  ;;  %v10501_v32 = vcombine.low %v63_v18, %v79_v19  ;;  %v10503_v33 = vcombine.low %v64_v20, %v80_v22  ;;  %v304_v18 = vld [vmem:[%s16712_s2 + $0x898] sm:$0xff]  ;;  %v319_v22 = vld [vmem:[%s16712_s2 + $0x910] sm:$0xff] }
  0x6a   :  { %6415 = vmatpush1.bf16.msra.mxu0 %v11265_v28  ;;  %6497 = vmatpush1.bf16.msra.mxu1 %v11267_v29  ;;  %v95_v28 = vld [vmem:[%s16712_s2 + $0x210] sm:$0xff] }
  0x6b   :  { %6416 = vmatprep.subr.bf16.mxu0 %v11298_v30  ;;  %6498 = vmatprep.subr.bf16.mxu1 %v11300_v34  ;;  %v111_v29 = vld [vmem:[%s16712_s2 + $0x290] sm:$0xff]  ;;  %v96_v30 = vld [vmem:[%s16712_s2 + $0x218] sm:$0xff] }
  0x6c   :  { %v10534_v34 = vcombine.high %v95_v28, %v111_v29  ;;  %v10533_v40 = vcombine.low %v95_v28, %v111_v29  ;;  %v10535_v41 = vcombine.low %v96_v30, %v112_v31  ;;  %v336_v28 = vld [vmem:[%s16712_s2 + $0x998] sm:$0xff] }
  0x6e   :  { %6417 = vmatpush1.bf16.msra.mxu0 %v11297_v36  ;;  %6499 = vmatpush1.bf16.msra.mxu1 %v11299_v37  ;;  %v143_v36 = vld [vmem:[%s16712_s2 + $0x390] sm:$0xff]  ;;  %v128_v37 = vld [vmem:[%s16712_s2 + $0x318] sm:$0xff] }
  0x6f   :  { %6418 = vmatprep.subr.bf16.mxu0 %v11330_v38  ;;  %6500 = vmatprep.subr.bf16.mxu1 %v11332_v42  ;;  %v10536_v38 = vcombine.high %v96_v30, %v112_v31  ;;  %v10566_v42 = vcombine.high %v127_v35, %v143_v36  ;;  %v10565_v48 = vcombine.low %v127_v35, %v143_v36  ;;  %v351_v31 = vld [vmem:[%s16712_s2 + $0xa10] sm:$0xff]  ;;  %v368_v35 = vld [vmem:[%s16712_s2 + $0xa98] sm:$0xff] }
  0x70   :  { %v10567_v49 = vcombine.low %v128_v37, %v144_v39 }
  0x72   :  { %6419 = vmatpush1.bf16.msra.mxu0 %v11329_v44  ;;  %6501 = vmatpush1.bf16.msra.mxu1 %v11331_v45  ;;  %v175_v44 = vld [vmem:[%s16712_s2 + $0x490] sm:$0xff]  ;;  %v160_v45 = vld [vmem:[%s16712_s2 + $0x418] sm:$0xff] }
  0x73   :  { %6420 = vmatprep.subr.bf16.mxu0 %v11362_v46  ;;  %6502 = vmatprep.subr.bf16.mxu1 %v11364_v50  ;;  %v10568_v46 = vcombine.high %v128_v37, %v144_v39  ;;  %v10598_v50 = vcombine.high %v159_v43, %v175_v44  ;;  %v10597_v58 = vcombine.low %v159_v43, %v175_v44  ;;  %v383_v39 = vld [vmem:[%s16712_s2 + $0xb10] sm:$0xff]  ;;  %v400_v43 = vld [vmem:[%s16712_s2 + $0xb98] sm:$0xff] }
  0x74   :  { %v10599_v59 = vcombine.low %v160_v45, %v176_v47 }
  0x76   :  { %6421 = vmatpush1.bf16.msra.mxu0 %v11361_v52  ;;  %6503 = vmatpush1.bf16.msra.mxu1 %v11363_v54  ;;  %v207_v52 = vld [vmem:[%s16712_s2 + $0x590] sm:$0xff]  ;;  %v192_v54 = vld [vmem:[%s16712_s2 + $0x518] sm:$0xff] }
  0x77   :  { %6422 = vmatprep.subr.bf16.mxu0 %v11394_v55  ;;  %6504 = vmatprep.subr.bf16.mxu1 %v11396_v60  ;;  %v10600_v55 = vcombine.high %v160_v45, %v176_v47  ;;  %v10630_v60 = vcombine.high %v191_v51, %v207_v52  ;;  %v10629_v2 = vcombine.low %v191_v51, %v207_v52  ;;  %v415_v47 = vld [vmem:[%s16712_s2 + $0xc10] sm:$0xff]  ;;  %v432_v51 = vld [vmem:[%s16712_s2 + $0xc98] sm:$0xff] }
  0x78   :  { %v10631_v3 = vcombine.low %v192_v54, %v208_v56 }
  0x7a   :  { %6423 = vmatpush1.bf16.msra.mxu0 %v11393_v62  ;;  %6505 = vmatpush1.bf16.msra.mxu1 %v11395_v63  ;;  %v239_v62 = vld [vmem:[%s16712_s2 + $0x690] sm:$0xff]  ;;  %v224_v63 = vld [vmem:[%s16712_s2 + $0x618] sm:$0xff] }
  0x7b   :  { %6424 = vmatprep.subr.bf16.mxu0 %v11426_v0  ;;  %6506 = vmatprep.subr.bf16.mxu1 %v11428_v4  ;;  %v10632_v0 = vcombine.high %v192_v54, %v208_v56  ;;  %v10662_v4 = vcombine.high %v223_v61, %v239_v62  ;;  %v10661_v10 = vcombine.low %v223_v61, %v239_v62  ;;  %v447_v56 = vld [vmem:[%s16712_s2 + $0xd10] sm:$0xff]  ;;  %v464_v61 = vld [vmem:[%s16712_s2 + $0xd98] sm:$0xff] }
  0x7c   :  { %v10663_v11 = vcombine.low %v224_v63, %v240_v1 }
  0x7e   :  { %6425 = vmatpush1.bf16.msra.mxu0 %v11425_v6  ;;  %6507 = vmatpush1.bf16.msra.mxu1 %v11427_v7  ;;  %v271_v6 = vld [vmem:[%s16712_s2 + $0x790] sm:$0xff]  ;;  %v256_v7 = vld [vmem:[%s16712_s2 + $0x718] sm:$0xff] }
  0x7f   :  { %6426 = vmatprep.subr.bf16.mxu0 %v11458_v8  ;;  %6508 = vmatprep.subr.bf16.mxu1 %v11460_v13  ;;  %v10664_v8 = vcombine.high %v224_v63, %v240_v1  ;;  %v10694_v13 = vcombine.high %v255_v5, %v271_v6  ;;  %v10693_v19 = vcombine.low %v255_v5, %v271_v6  ;;  %v479_v1 = vld [vmem:[%s16712_s2 + $0xe10] sm:$0xff]  ;;  %v496_v5 = vld [vmem:[%s16712_s2 + $0xe98] sm:$0xff] }
  0x80   :  { %v10695_v20 = vcombine.low %v256_v7, %v272_v9 }
  0x82   :  { %6427 = vmatpush1.bf16.msra.mxu0 %v11457_v16  ;;  %6509 = vmatpush1.bf16.msra.mxu1 %v11459_v17  ;;  %v303_v16 = vld [vmem:[%s16712_s2 + $0x890] sm:$0xff]  ;;  %v288_v17 = vld [vmem:[%s16712_s2 + $0x818] sm:$0xff] }
  0x83   :  { %6519 = vmatprep.subr.bf16.mxu0 %v10470_v53  ;;  %6601 = vmatprep.subr.bf16.mxu1 %v10472_v21  ;;  %v10696_v53 = vcombine.high %v256_v7, %v272_v9  ;;  %v10726_v21 = vcombine.high %v287_v14, %v303_v16  ;;  %v10725_v29 = vcombine.low %v287_v14, %v303_v16  ;;  %v511_v9 = vld [vmem:[%s16712_s2 + $0xf10] sm:$0xff]  ;;  %v528_v14 = vld [vmem:[%s16712_s2 + $0xf98] sm:$0xff] }
  0x84   :  { %v10727_v30 = vcombine.low %v288_v17, %v304_v18 }
  0x85   :  { %6429 = vmatmul.mubr.bf16.vlgmr.msra.gmra.mrb[0].mxu0 %v12986_v24  ;;  %6511 = vmatmul.mubr.bf16.vlgmr.msra.gmra.mrb[0].mxu1 %v12986_v24 }
  0x86   :  { %6520 = vmatpush1.bf16.msra.mxu0 %v10469_v25  ;;  %6602 = vmatpush1.bf16.msra.mxu1 %v10471_v26  ;;  %v335_v25 = vld [vmem:[%s16712_s2 + $0x990] sm:$0xff]  ;;  %v320_v26 = vld [vmem:[%s16712_s2 + $0x918] sm:$0xff] }
  0x87   :  { %6521 = vmatprep.subr.bf16.mxu0 %v10502_v27  ;;  %6603 = vmatprep.subr.bf16.mxu1 %v10504_v15  ;;  %v10728_v27 = vcombine.high %v288_v17, %v304_v18  ;;  %v10758_v15 = vcombine.high %v319_v22, %v335_v25  ;;  %v10757_v36 = vcombine.low %v319_v22, %v335_v25  ;;  %v543_v18 = vld [vmem:[%s16712_s2 + $0x1010] sm:$0xff]  ;;  %v560_v22 = vld [vmem:[%s16712_s2 + $0x1098] sm:$0xff] }
  0x88   :  { %6551 = vmatprep.mubr.bf16.mxu0 %v12645_v57  ;;  %6633 = vmatprep.mubr.bf16.mxu1 %v12645_v57  ;;  %v10759_v37 = vcombine.low %v320_v26, %v336_v28 }
  0x8a   :  { %6522 = vmatpush1.bf16.msra.mxu0 %v10501_v32  ;;  %6604 = vmatpush1.bf16.msra.mxu1 %v10503_v33  ;;  %v367_v32 = vld [vmem:[%s16712_s2 + $0xa90] sm:$0xff]  ;;  %v352_v33 = vld [vmem:[%s16712_s2 + $0xa18] sm:$0xff] }
  0x8b   :  { %6523 = vmatprep.subr.bf16.mxu0 %v10534_v34  ;;  %6605 = vmatprep.subr.bf16.mxu1 %v10536_v38  ;;  %v10760_v34 = vcombine.high %v320_v26, %v336_v28  ;;  %v10790_v38 = vcombine.high %v351_v31, %v367_v32  ;;  %v10789_v44 = vcombine.low %v351_v31, %v367_v32  ;;  %v575_v28 = vld [vmem:[%s16712_s2 + $0x1110] sm:$0xff]  ;;  %v592_v31 = vld [vmem:[%s16712_s2 + $0x1198] sm:$0xff] }
  0x8c   :  { %v10791_v45 = vcombine.low %v352_v33, %v368_v35 }
  0x8e   :  { %6524 = vmatpush1.bf16.msra.mxu0 %v10533_v40  ;;  %6606 = vmatpush1.bf16.msra.mxu1 %v10535_v41  ;;  %v399_v40 = vld [vmem:[%s16712_s2 + $0xb90] sm:$0xff]  ;;  %v384_v41 = vld [vmem:[%s16712_s2 + $0xb18] sm:$0xff] }
  0x8f   :  { %6525 = vmatprep.subr.bf16.mxu0 %v10566_v42  ;;  %6607 = vmatprep.subr.bf16.mxu1 %v10568_v46  ;;  %v10792_v42 = vcombine.high %v352_v33, %v368_v35  ;;  %v10822_v46 = vcombine.high %v383_v39, %v399_v40  ;;  %v10821_v52 = vcombine.low %v383_v39, %v399_v40  ;;  %v607_v35 = vld [vmem:[%s16712_s2 + $0x1210] sm:$0xff]  ;;  %v624_v39 = vld [vmem:[%s16712_s2 + $0x1298] sm:$0xff] }
  0x90   :  { %v10823_v54 = vcombine.low %v384_v41, %v400_v43 }
  0x92   :  { %6526 = vmatpush1.bf16.msra.mxu0 %v10565_v48  ;;  %6608 = vmatpush1.bf16.msra.mxu1 %v10567_v49  ;;  %v431_v48 = vld [vmem:[%s16712_s2 + $0xc90] sm:$0xff]  ;;  %v416_v49 = vld [vmem:[%s16712_s2 + $0xc18] sm:$0xff] }
  0x93   :  { %6527 = vmatprep.subr.bf16.mxu0 %v10598_v50  ;;  %6609 = vmatprep.subr.bf16.mxu1 %v10600_v55  ;;  %v10824_v50 = vcombine.high %v384_v41, %v400_v43  ;;  %v10854_v55 = vcombine.high %v415_v47, %v431_v48  ;;  %v10853_v62 = vcombine.low %v415_v47, %v431_v48  ;;  %v639_v43 = vld [vmem:[%s16712_s2 + $0x1310] sm:$0xff]  ;;  %v656_v47 = vld [vmem:[%s16712_s2 + $0x1398] sm:$0xff] }
  0x94   :  { %v10855_v63 = vcombine.low %v416_v49, %v432_v51 }
  0x96   :  { %6528 = vmatpush1.bf16.msra.mxu0 %v10597_v58  ;;  %6610 = vmatpush1.bf16.msra.mxu1 %v10599_v59  ;;  %v463_v58 = vld [vmem:[%s16712_s2 + $0xd90] sm:$0xff]  ;;  %v448_v59 = vld [vmem:[%s16712_s2 + $0xd18] sm:$0xff] }
  0x97   :  { %6529 = vmatprep.subr.bf16.mxu0 %v10630_v60  ;;  %6611 = vmatprep.subr.bf16.mxu1 %v10632_v0  ;;  %v10856_v60 = vcombine.high %v416_v49, %v432_v51  ;;  %v10886_v0 = vcombine.high %v447_v56, %v463_v58  ;;  %v10885_v6 = vcombine.low %v447_v56, %v463_v58  ;;  %v671_v51 = vld [vmem:[%s16712_s2 + $0x1410] sm:$0xff]  ;;  %v688_v56 = vld [vmem:[%s16712_s2 + $0x1498] sm:$0xff] }
  0x98   :  { %v10887_v7 = vcombine.low %v448_v59, %v464_v61 }
  0x9a   :  { %6530 = vmatpush1.bf16.msra.mxu0 %v10629_v2  ;;  %6612 = vmatpush1.bf16.msra.mxu1 %v10631_v3  ;;  %v495_v2 = vld [vmem:[%s16712_s2 + $0xe90] sm:$0xff]  ;;  %v480_v3 = vld [vmem:[%s16712_s2 + $0xe18] sm:$0xff] }
  0x9b   :  { %6531 = vmatprep.subr.bf16.mxu0 %v10662_v4  ;;  %6613 = vmatprep.subr.bf16.mxu1 %v10664_v8  ;;  %v10888_v4 = vcombine.high %v448_v59, %v464_v61  ;;  %v10918_v8 = vcombine.high %v479_v1, %v495_v2  ;;  %v10917_v16 = vcombine.low %v479_v1, %v495_v2  ;;  %v703_v61 = vld [vmem:[%s16712_s2 + $0x1510] sm:$0xff]  ;;  %v720_v1 = vld [vmem:[%s16712_s2 + $0x1598] sm:$0xff] }
  0x9c   :  { %v10919_v17 = vcombine.low %v480_v3, %v496_v5 }
  0x9e   :  { %6532 = vmatpush1.bf16.msra.mxu0 %v10661_v10  ;;  %6614 = vmatpush1.bf16.msra.mxu1 %v10663_v11  ;;  %v527_v10 = vld [vmem:[%s16712_s2 + $0xf90] sm:$0xff]  ;;  %v512_v11 = vld [vmem:[%s16712_s2 + $0xf18] sm:$0xff] }
  0x9f   :  { %6533 = vmatprep.subr.bf16.mxu0 %v10694_v13  ;;  %6615 = vmatprep.subr.bf16.mxu1 %v10696_v53  ;;  %v10920_v13 = vcombine.high %v480_v3, %v496_v5  ;;  %v10950_v53 = vcombine.high %v511_v9, %v527_v10  ;;  %v10949_v25 = vcombine.low %v511_v9, %v527_v10  ;;  %v735_v5 = vld [vmem:[%s16712_s2 + $0x1610] sm:$0xff]  ;;  %v752_v9 = vld [vmem:[%s16712_s2 + $0x1698] sm:$0xff] }
  0xa0   :  { %v10951_v26 = vcombine.low %v512_v11, %v528_v14 }
  0xa2   :  { %6534 = vmatpush1.bf16.msra.mxu0 %v10693_v19  ;;  %6616 = vmatpush1.bf16.msra.mxu1 %v10695_v20  ;;  %v559_v19 = vld [vmem:[%s16712_s2 + $0x1090] sm:$0xff]  ;;  %v544_v20 = vld [vmem:[%s16712_s2 + $0x1018] sm:$0xff] }
  0xa3   :  { %6535 = vmatprep.subr.bf16.mxu0 %v10726_v21  ;;  %6617 = vmatprep.subr.bf16.mxu1 %v10728_v27  ;;  %v10952_v21 = vcombine.high %v512_v11, %v528_v14  ;;  %v10982_v27 = vcombine.high %v543_v18, %v559_v19  ;;  %v10981_v32 = vcombine.low %v543_v18, %v559_v19  ;;  %v767_v14 = vld [vmem:[%s16712_s2 + $0x1710] sm:$0xff]  ;;  %v784_v18 = vld [vmem:[%s16712_s2 + $0x1798] sm:$0xff] }
  0xa4   :  { %v10983_v33 = vcombine.low %v544_v20, %v560_v22 }
  0xa6   :  { %6536 = vmatpush1.bf16.msra.mxu0 %v10725_v29  ;;  %6618 = vmatpush1.bf16.msra.mxu1 %v10727_v30  ;;  %v591_v29 = vld [vmem:[%s16712_s2 + $0x1190] sm:$0xff]  ;;  %v576_v30 = vld [vmem:[%s16712_s2 + $0x1118] sm:$0xff] }
  0xa7   :  { %6537 = vmatprep.subr.bf16.mxu0 %v10758_v15  ;;  %6619 = vmatprep.subr.bf16.mxu1 %v10760_v34  ;;  %v10984_v15 = vcombine.high %v544_v20, %v560_v22  ;;  %v11014_v34 = vcombine.high %v575_v28, %v591_v29  ;;  %v11013_v40 = vcombine.low %v575_v28, %v591_v29  ;;  %v799_v22 = vld [vmem:[%s16712_s2 + $0x1810] sm:$0xff]  ;;  %v816_v28 = vld [vmem:[%s16712_s2 + $0x1898] sm:$0xff] }
  0xa8   :  { %v11015_v41 = vcombine.low %v576_v30, %v592_v31 }
  0xaa   :  { %6538 = vmatpush1.bf16.msra.mxu0 %v10757_v36  ;;  %6620 = vmatpush1.bf16.msra.mxu1 %v10759_v37  ;;  %v623_v36 = vld [vmem:[%s16712_s2 + $0x1290] sm:$0xff]  ;;  %v608_v37 = vld [vmem:[%s16712_s2 + $0x1218] sm:$0xff] }
  0xab   :  { %6539 = vmatprep.subr.bf16.mxu0 %v10790_v38  ;;  %6621 = vmatprep.subr.bf16.mxu1 %v10792_v42  ;;  %v11016_v38 = vcombine.high %v576_v30, %v592_v31  ;;  %v11046_v42 = vcombine.high %v607_v35, %v623_v36  ;;  %v11045_v48 = vcombine.low %v607_v35, %v623_v36  ;;  %v831_v31 = vld [vmem:[%s16712_s2 + $0x1910] sm:$0xff]  ;;  %v848_v35 = vld [vmem:[%s16712_s2 + $0x1998] sm:$0xff] }
  0xac   :  { %v11047_v49 = vcombine.low %v608_v37, %v624_v39 }
  0xae   :  { %6540 = vmatpush1.bf16.msra.mxu0 %v10789_v44  ;;  %6622 = vmatpush1.bf16.msra.mxu1 %v10791_v45  ;;  %v655_v44 = vld [vmem:[%s16712_s2 + $0x1390] sm:$0xff]  ;;  %v640_v45 = vld [vmem:[%s16712_s2 + $0x1318] sm:$0xff] }
  0xaf   :  { %6541 = vmatprep.subr.bf16.mxu0 %v10822_v46  ;;  %6623 = vmatprep.subr.bf16.mxu1 %v10824_v50  ;;  %v11048_v46 = vcombine.high %v608_v37, %v624_v39  ;;  %v11078_v50 = vcombine.high %v639_v43, %v655_v44  ;;  %v11077_v58 = vcombine.low %v639_v43, %v655_v44  ;;  %v863_v39 = vld [vmem:[%s16712_s2 + $0x1a10] sm:$0xff]  ;;  %v880_v43 = vld [vmem:[%s16712_s2 + $0x1a98] sm:$0xff] }
  0xb0   :  { %v11079_v59 = vcombine.low %v640_v45, %v656_v47 }
  0xb2   :  { %6542 = vmatpush1.bf16.msra.mxu0 %v10821_v52  ;;  %6624 = vmatpush1.bf16.msra.mxu1 %v10823_v54  ;;  %v687_v52 = vld [vmem:[%s16712_s2 + $0x1490] sm:$0xff]  ;;  %v672_v54 = vld [vmem:[%s16712_s2 + $0x1418] sm:$0xff] }
  0xb3   :  { %6543 = vmatprep.subr.bf16.mxu0 %v10854_v55  ;;  %6625 = vmatprep.subr.bf16.mxu1 %v10856_v60  ;;  %v11080_v55 = vcombine.high %v640_v45, %v656_v47  ;;  %v11110_v60 = vcombine.high %v671_v51, %v687_v52  ;;  %v11109_v2 = vcombine.low %v671_v51, %v687_v52  ;;  %v895_v47 = vld [vmem:[%s16712_s2 + $0x1b10] sm:$0xff]  ;;  %v912_v51 = vld [vmem:[%s16712_s2 + $0x1b98] sm:$0xff] }
  0xb4   :  { %v11111_v3 = vcombine.low %v672_v54, %v688_v56 }
  0xb6   :  { %6544 = vmatpush1.bf16.msra.mxu0 %v10853_v62  ;;  %6626 = vmatpush1.bf16.msra.mxu1 %v10855_v63  ;;  %v719_v62 = vld [vmem:[%s16712_s2 + $0x1590] sm:$0xff]  ;;  %v704_v63 = vld [vmem:[%s16712_s2 + $0x1518] sm:$0xff] }
  0xb7   :  { %6545 = vmatprep.subr.bf16.mxu0 %v10886_v0  ;;  %6627 = vmatprep.subr.bf16.mxu1 %v10888_v4  ;;  %v11112_v0 = vcombine.high %v672_v54, %v688_v56  ;;  %v11142_v4 = vcombine.high %v703_v61, %v719_v62  ;;  %v11141_v10 = vcombine.low %v703_v61, %v719_v62  ;;  %v927_v56 = vld [vmem:[%s16712_s2 + $0x1c10] sm:$0xff]  ;;  %v944_v61 = vld [vmem:[%s16712_s2 + $0x1c98] sm:$0xff] }
  0xb8   :  { %v11143_v11 = vcombine.low %v704_v63, %v720_v1 }
  0xba   :  { %6546 = vmatpush1.bf16.msra.mxu0 %v10885_v6  ;;  %6628 = vmatpush1.bf16.msra.mxu1 %v10887_v7  ;;  %v751_v6 = vld [vmem:[%s16712_s2 + $0x1690] sm:$0xff]  ;;  %v736_v7 = vld [vmem:[%s16712_s2 + $0x1618] sm:$0xff] }
  0xbb   :  { %6547 = vmatprep.subr.bf16.mxu0 %v10918_v8  ;;  %6629 = vmatprep.subr.bf16.mxu1 %v10920_v13  ;;  %v11144_v8 = vcombine.high %v704_v63, %v720_v1  ;;  %v11174_v13 = vcombine.high %v735_v5, %v751_v6  ;;  %v11173_v19 = vcombine.low %v735_v5, %v751_v6  ;;  %v959_v1 = vld [vmem:[%s16712_s2 + $0x1d10] sm:$0xff]  ;;  %v976_v5 = vld [vmem:[%s16712_s2 + $0x1d98] sm:$0xff] }
  0xbc   :  { %v11175_v20 = vcombine.low %v736_v7, %v752_v9 }
  0xbe   :  { %6548 = vmatpush1.bf16.msra.mxu0 %v10917_v16  ;;  %6630 = vmatpush1.bf16.msra.mxu1 %v10919_v17  ;;  %v783_v16 = vld [vmem:[%s16712_s2 + $0x1790] sm:$0xff]  ;;  %v11176_v17 = vcombine.high %v736_v7, %v752_v9 }
  0xbf   :  { %6549 = vmatprep.subr.bf16.mxu0 %v10950_v53  ;;  %6631 = vmatprep.subr.bf16.mxu1 %v10952_v21  ;;  %v768_v53 = vld [vmem:[%s16712_s2 + $0x1718] sm:$0xff]  ;;  %v11206_v21 = vcombine.high %v767_v14, %v783_v16  ;;  %v11205_v29 = vcombine.low %v767_v14, %v783_v16  ;;  %v991_v9 = vld [vmem:[%s16712_s2 + $0x1e10] sm:$0xff] }
  0xc0   :  { %v11207_v30 = vcombine.low %v768_v53, %v784_v18  ;;  %v1008_v14 = vld [vmem:[%s16712_s2 + $0x1e98] sm:$0xff] }
  0xc2   :  { %6550 = vmatpush1.bf16.msra.mxu0 %v10949_v25  ;;  %6632 = vmatpush1.bf16.msra.mxu1 %v10951_v26  ;;  %v815_v25 = vld [vmem:[%s16712_s2 + $0x1890] sm:$0xff]  ;;  %v800_v26 = vld [vmem:[%s16712_s2 + $0x1818] sm:$0xff] }
  0xc3   :  { %6560 = vmatprep.subr.bf16.mxu0 %v10982_v27  ;;  %6642 = vmatprep.subr.bf16.mxu1 %v10984_v15  ;;  %v11208_v27 = vcombine.high %v768_v53, %v784_v18  ;;  %v11238_v15 = vcombine.high %v799_v22, %v815_v25  ;;  %v11237_v36 = vcombine.low %v799_v22, %v815_v25  ;;  %v1023_v18 = vld [vmem:[%s16712_s2 + $0x1f10] sm:$0xff]  ;;  %v1040_v22 = vld [vmem:[%s16712_s2 + $0x1f98] sm:$0xff] }
  0xc4   :  { %v11239_v37 = vcombine.low %v800_v26, %v816_v28 }
  0xc5   :  { %6552 = vmatmul.mubr.bf16.vlgmr.msra.gmra.mrb[4].mxu0 %v12771_v12  ;;  %6634 = vmatmul.mubr.bf16.vlgmr.msra.gmra.mrb[4].mxu1 %v12771_v12 }
  0xc6   :  { %6561 = vmatpush1.bf16.msra.mxu0 %v10981_v32  ;;  %6643 = vmatpush1.bf16.msra.mxu1 %v10983_v33  ;;  %v847_v32 = vld [vmem:[%s16712_s2 + $0x1990] sm:$0xff]  ;;  %v832_v33 = vld [vmem:[%s16712_s2 + $0x1918] sm:$0xff] }
  0xc7   :  { %6562 = vmatprep.subr.bf16.mxu0 %v11014_v34  ;;  %6644 = vmatprep.subr.bf16.mxu1 %v11016_v38  ;;  %v11240_v34 = vcombine.high %v800_v26, %v816_v28  ;;  %v11270_v38 = vcombine.high %v831_v31, %v847_v32  ;;  %v11269_v44 = vcombine.low %v831_v31, %v847_v32  ;;  %v33_v28 = vld [vmem:[%s16712_s2 + $0x20] sm:$0xff]  ;;  %v50_v31 = vld [vmem:[%s16712_s2 + $0xa8] sm:$0xff] }
  0xc8   :  { %6592 = vmatprep.mubr.bf16.mxu0 %v12798_v23  ;;  %6674 = vmatprep.mubr.bf16.mxu1 %v12798_v23  ;;  %v11271_v45 = vcombine.low %v832_v33, %v848_v35 }
  0xca   :  { %6563 = vmatpush1.bf16.msra.mxu0 %v11013_v40  ;;  %6645 = vmatpush1.bf16.msra.mxu1 %v11015_v41  ;;  %v879_v40 = vld [vmem:[%s16712_s2 + $0x1a90] sm:$0xff]  ;;  %v864_v41 = vld [vmem:[%s16712_s2 + $0x1a18] sm:$0xff] }
  0xcb   :  { %6564 = vmatprep.subr.bf16.mxu0 %v11046_v42  ;;  %6646 = vmatprep.subr.bf16.mxu1 %v11048_v46  ;;  %v11272_v42 = vcombine.high %v832_v33, %v848_v35  ;;  %v11302_v46 = vcombine.high %v863_v39, %v879_v40  ;;  %v11301_v52 = vcombine.low %v863_v39, %v879_v40  ;;  %v65_v35 = vld [vmem:[%s16712_s2 + $0x120] sm:$0xff]  ;;  %v82_v39 = vld [vmem:[%s16712_s2 + $0x1a8] sm:$0xff] }
  0xcc   :  { %v11303_v54 = vcombine.low %v864_v41, %v880_v43 }
  0xce   :  { %6565 = vmatpush1.bf16.msra.mxu0 %v11045_v48  ;;  %6647 = vmatpush1.bf16.msra.mxu1 %v11047_v49  ;;  %v911_v48 = vld [vmem:[%s16712_s2 + $0x1b90] sm:$0xff]  ;;  %v896_v49 = vld [vmem:[%s16712_s2 + $0x1b18] sm:$0xff] }
  0xcf   :  { %6566 = vmatprep.subr.bf16.mxu0 %v11078_v50  ;;  %6648 = vmatprep.subr.bf16.mxu1 %v11080_v55  ;;  %v11304_v50 = vcombine.high %v864_v41, %v880_v43  ;;  %v11334_v55 = vcombine.high %v895_v47, %v911_v48  ;;  %v11333_v62 = vcombine.low %v895_v47, %v911_v48  ;;  %v97_v43 = vld [vmem:[%s16712_s2 + $0x220] sm:$0xff]  ;;  %v114_v47 = vld [vmem:[%s16712_s2 + $0x2a8] sm:$0xff] }
  0xd0   :  { %v11335_v63 = vcombine.low %v896_v49, %v912_v51 }
  0xd2   :  { %6567 = vmatpush1.bf16.msra.mxu0 %v11077_v58  ;;  %6649 = vmatpush1.bf16.msra.mxu1 %v11079_v59  ;;  %v943_v58 = vld [vmem:[%s16712_s2 + $0x1c90] sm:$0xff]  ;;  %v928_v59 = vld [vmem:[%s16712_s2 + $0x1c18] sm:$0xff] }
  0xd3   :  { %6568 = vmatprep.subr.bf16.mxu0 %v11110_v60  ;;  %6650 = vmatprep.subr.bf16.mxu1 %v11112_v0  ;;  %v11336_v60 = vcombine.high %v896_v49, %v912_v51  ;;  %v11366_v0 = vcombine.high %v927_v56, %v943_v58  ;;  %v11365_v6 = vcombine.low %v927_v56, %v943_v58  ;;  %v129_v51 = vld [vmem:[%s16712_s2 + $0x320] sm:$0xff]  ;;  %v146_v56 = vld [vmem:[%s16712_s2 + $0x3a8] sm:$0xff] }
  0xd4   :  { %v11367_v7 = vcombine.low %v928_v59, %v944_v61 }
  0xd6   :  { %6569 = vmatpush1.bf16.msra.mxu0 %v11109_v2  ;;  %6651 = vmatpush1.bf16.msra.mxu1 %v11111_v3  ;;  %v975_v2 = vld [vmem:[%s16712_s2 + $0x1d90] sm:$0xff]  ;;  %v960_v3 = vld [vmem:[%s16712_s2 + $0x1d18] sm:$0xff] }
  0xd7   :  { %6570 = vmatprep.subr.bf16.mxu0 %v11142_v4  ;;  %6652 = vmatprep.subr.bf16.mxu1 %v11144_v8  ;;  %v11368_v4 = vcombine.high %v928_v59, %v944_v61  ;;  %v11398_v8 = vcombine.high %v959_v1, %v975_v2  ;;  %v11397_v16 = vcombine.low %v959_v1, %v975_v2  ;;  %v161_v61 = vld [vmem:[%s16712_s2 + $0x420] sm:$0xff]  ;;  %v178_v1 = vld [vmem:[%s16712_s2 + $0x4a8] sm:$0xff] }
  0xda   :  { %6571 = vmatpush1.bf16.msra.mxu0 %v11141_v10  ;;  %6653 = vmatpush1.bf16.msra.mxu1 %v11143_v11  ;;  %v1007_v10 = vld [vmem:[%s16712_s2 + $0x1e90] sm:$0xff]  ;;  %v992_v11 = vld [vmem:[%s16712_s2 + $0x1e18] sm:$0xff] }
  0xdb   :  { %6572 = vmatprep.subr.bf16.mxu0 %v11174_v13  ;;  %6654 = vmatprep.subr.bf16.mxu1 %v11176_v17  ;;  %v11400_v13 = vcombine.high %v960_v3, %v976_v5  ;;  %v11399_v17 = vcombine.low %v960_v3, %v976_v5  ;;  %v11430_v53 = vcombine.high %v991_v9, %v1007_v10  ;;  %v193_v5 = vld [vmem:[%s16712_s2 + $0x520] sm:$0xff] }
  0xdc   :  { %v11429_v25 = vcombine.low %v991_v9, %v1007_v10  ;;  %v11431_v26 = vcombine.low %v992_v11, %v1008_v14  ;;  %v210_v9 = vld [vmem:[%s16712_s2 + $0x5a8] sm:$0xff] }
  0xde   :  { %6573 = vmatpush1.bf16.msra.mxu0 %v11173_v19  ;;  %6655 = vmatpush1.bf16.msra.mxu1 %v11175_v20  ;;  %v1039_v19 = vld [vmem:[%s16712_s2 + $0x1f90] sm:$0xff]  ;;  %v1024_v20 = vld [vmem:[%s16712_s2 + $0x1f18] sm:$0xff] }
  0xdf   :  { %6574 = vmatprep.subr.bf16.mxu0 %v11206_v21  ;;  %6656 = vmatprep.subr.bf16.mxu1 %v11208_v27  ;;  %v11432_v21 = vcombine.high %v992_v11, %v1008_v14  ;;  %v11462_v27 = vcombine.high %v1023_v18, %v1039_v19  ;;  %v11461_v32 = vcombine.low %v1023_v18, %v1039_v19  ;;  %v225_v14 = vld [vmem:[%s16712_s2 + $0x620] sm:$0xff]  ;;  %v242_v18 = vld [vmem:[%s16712_s2 + $0x6a8] sm:$0xff] }
  0xe0   :  { %v11463_v33 = vcombine.low %v1024_v20, %v1040_v22 }
  0xe2   :  { %6575 = vmatpush1.bf16.msra.mxu0 %v11205_v29  ;;  %6657 = vmatpush1.bf16.msra.mxu1 %v11207_v30  ;;  %v49_v29 = vld [vmem:[%s16712_s2 + $0xa0] sm:$0xff]  ;;  %v34_v30 = vld [vmem:[%s16712_s2 + $0x28] sm:$0xff] }
  0xe3   :  { %6576 = vmatprep.subr.bf16.mxu0 %v11238_v15  ;;  %6658 = vmatprep.subr.bf16.mxu1 %v11240_v34  ;;  %v11464_v15 = vcombine.high %v1024_v20, %v1040_v22  ;;  %v10474_v34 = vcombine.high %v33_v28, %v49_v29  ;;  %v10473_v40 = vcombine.low %v33_v28, %v49_v29  ;;  %v257_v22 = vld [vmem:[%s16712_s2 + $0x720] sm:$0xff]  ;;  %v274_v28 = vld [vmem:[%s16712_s2 + $0x7a8] sm:$0xff] }
  0xe4   :  { %v10475_v41 = vcombine.low %v34_v30, %v50_v31 }
  0xe6   :  { %6577 = vmatpush1.bf16.msra.mxu0 %v11237_v36  ;;  %6659 = vmatpush1.bf16.msra.mxu1 %v11239_v37  ;;  %v81_v36 = vld [vmem:[%s16712_s2 + $0x1a0] sm:$0xff]  ;;  %v66_v37 = vld [vmem:[%s16712_s2 + $0x128] sm:$0xff] }
  0xe7   :  { %6578 = vmatprep.subr.bf16.mxu0 %v11270_v38  ;;  %6660 = vmatprep.subr.bf16.mxu1 %v11272_v42  ;;  %v10476_v38 = vcombine.high %v34_v30, %v50_v31  ;;  %v10506_v42 = vcombine.high %v65_v35, %v81_v36  ;;  %v10505_v48 = vcombine.low %v65_v35, %v81_v36  ;;  %v289_v31 = vld [vmem:[%s16712_s2 + $0x820] sm:$0xff]  ;;  %v306_v35 = vld [vmem:[%s16712_s2 + $0x8a8] sm:$0xff] }
  0xe8   :  { %v10507_v49 = vcombine.low %v66_v37, %v82_v39 }
  0xea   :  { %6579 = vmatpush1.bf16.msra.mxu0 %v11269_v44  ;;  %6661 = vmatpush1.bf16.msra.mxu1 %v11271_v45  ;;  %v113_v44 = vld [vmem:[%s16712_s2 + $0x2a0] sm:$0xff]  ;;  %v98_v45 = vld [vmem:[%s16712_s2 + $0x228] sm:$0xff] }
  0xeb   :  { %6580 = vmatprep.subr.bf16.mxu0 %v11302_v46  ;;  %6662 = vmatprep.subr.bf16.mxu1 %v11304_v50  ;;  %v10508_v46 = vcombine.high %v66_v37, %v82_v39  ;;  %v10538_v50 = vcombine.high %v97_v43, %v113_v44  ;;  %v10537_v58 = vcombine.low %v97_v43, %v113_v44  ;;  %v321_v39 = vld [vmem:[%s16712_s2 + $0x920] sm:$0xff]  ;;  %v338_v43 = vld [vmem:[%s16712_s2 + $0x9a8] sm:$0xff] }
  0xec   :  { %v10539_v59 = vcombine.low %v98_v45, %v114_v47 }
  0xee   :  { %6581 = vmatpush1.bf16.msra.mxu0 %v11301_v52  ;;  %6663 = vmatpush1.bf16.msra.mxu1 %v11303_v54  ;;  %v145_v52 = vld [vmem:[%s16712_s2 + $0x3a0] sm:$0xff]  ;;  %v130_v54 = vld [vmem:[%s16712_s2 + $0x328] sm:$0xff] }
  0xef   :  { %6582 = vmatprep.subr.bf16.mxu0 %v11334_v55  ;;  %6664 = vmatprep.subr.bf16.mxu1 %v11336_v60  ;;  %v10540_v55 = vcombine.high %v98_v45, %v114_v47  ;;  %v10570_v60 = vcombine.high %v129_v51, %v145_v52  ;;  %v10569_v2 = vcombine.low %v129_v51, %v145_v52  ;;  %v353_v47 = vld [vmem:[%s16712_s2 + $0xa20] sm:$0xff]  ;;  %v370_v51 = vld [vmem:[%s16712_s2 + $0xaa8] sm:$0xff] }
  0xf0   :  { %v10571_v3 = vcombine.low %v130_v54, %v146_v56 }
  0xf2   :  { %6583 = vmatpush1.bf16.msra.mxu0 %v11333_v62  ;;  %6665 = vmatpush1.bf16.msra.mxu1 %v11335_v63  ;;  %v177_v62 = vld [vmem:[%s16712_s2 + $0x4a0] sm:$0xff]  ;;  %v162_v63 = vld [vmem:[%s16712_s2 + $0x428] sm:$0xff] }
  0xf3   :  { %6584 = vmatprep.subr.bf16.mxu0 %v11366_v0  ;;  %6666 = vmatprep.subr.bf16.mxu1 %v11368_v4  ;;  %v10572_v0 = vcombine.high %v130_v54, %v146_v56  ;;  %v10602_v4 = vcombine.high %v161_v61, %v177_v62  ;;  %v10601_v10 = vcombine.low %v161_v61, %v177_v62  ;;  %v385_v56 = vld [vmem:[%s16712_s2 + $0xb20] sm:$0xff]  ;;  %v402_v61 = vld [vmem:[%s16712_s2 + $0xba8] sm:$0xff] }
  0xf4   :  { %v10603_v11 = vcombine.low %v162_v63, %v178_v1 }
  0xf6   :  { %6585 = vmatpush1.bf16.msra.mxu0 %v11365_v6  ;;  %6667 = vmatpush1.bf16.msra.mxu1 %v11367_v7  ;;  %v209_v6 = vld [vmem:[%s16712_s2 + $0x5a0] sm:$0xff]  ;;  %v194_v7 = vld [vmem:[%s16712_s2 + $0x528] sm:$0xff] }
  0xf7   :  { %6586 = vmatprep.subr.bf16.mxu0 %v11398_v8  ;;  %6668 = vmatprep.subr.bf16.mxu1 %v11400_v13  ;;  %v10604_v8 = vcombine.high %v162_v63, %v178_v1  ;;  %v10634_v13 = vcombine.high %v193_v5, %v209_v6  ;;  %v10633_v19 = vcombine.low %v193_v5, %v209_v6  ;;  %v417_v1 = vld [vmem:[%s16712_s2 + $0xc20] sm:$0xff]  ;;  %v434_v5 = vld [vmem:[%s16712_s2 + $0xca8] sm:$0xff] }
  0xf8   :  { %v10635_v20 = vcombine.low %v194_v7, %v210_v9 }
  0xfa   :  { %6587 = vmatpush1.bf16.msra.mxu0 %v11397_v16  ;;  %6669 = vmatpush1.bf16.msra.mxu1 %v11399_v17  ;;  %v241_v16 = vld [vmem:[%s16712_s2 + $0x6a0] sm:$0xff]  ;;  %v226_v17 = vld [vmem:[%s16712_s2 + $0x628] sm:$0xff] }
  0xfb   :  { %6588 = vmatprep.subr.bf16.mxu0 %v11430_v53  ;;  %6670 = vmatprep.subr.bf16.mxu1 %v11432_v21  ;;  %v10636_v53 = vcombine.high %v194_v7, %v210_v9  ;;  %v10666_v21 = vcombine.high %v225_v14, %v241_v16  ;;  %v10665_v29 = vcombine.low %v225_v14, %v241_v16  ;;  %v449_v9 = vld [vmem:[%s16712_s2 + $0xd20] sm:$0xff]  ;;  %v466_v14 = vld [vmem:[%s16712_s2 + $0xda8] sm:$0xff] }
  0xfc   :  { %v10667_v30 = vcombine.low %v226_v17, %v242_v18 }
  0xfe   :  { %6589 = vmatpush1.bf16.msra.mxu0 %v11429_v25  ;;  %6671 = vmatpush1.bf16.msra.mxu1 %v11431_v26  ;;  %v273_v25 = vld [vmem:[%s16712_s2 + $0x7a0] sm:$0xff]  ;;  %v258_v26 = vld [vmem:[%s16712_s2 + $0x728] sm:$0xff] }
  0xff   :  { %6590 = vmatprep.subr.bf16.mxu0 %v11462_v27  ;;  %6672 = vmatprep.subr.bf16.mxu1 %v11464_v15  ;;  %v10668_v27 = vcombine.high %v226_v17, %v242_v18  ;;  %v10698_v15 = vcombine.high %v257_v22, %v273_v25  ;;  %v10697_v36 = vcombine.low %v257_v22, %v273_v25  ;;  %v481_v18 = vld [vmem:[%s16712_s2 + $0xe20] sm:$0xff]  ;;  %v498_v22 = vld [vmem:[%s16712_s2 + $0xea8] sm:$0xff] }
 0x100   :  { %v10699_v37 = vcombine.low %v258_v26, %v274_v28 }
 0x102   :  { %6591 = vmatpush1.bf16.msra.mxu0 %v11461_v32  ;;  %6673 = vmatpush1.bf16.msra.mxu1 %v11463_v33  ;;  %v305_v32 = vld [vmem:[%s16712_s2 + $0x8a0] sm:$0xff]  ;;  %v290_v33 = vld [vmem:[%s16712_s2 + $0x828] sm:$0xff] }
 0x103   :  { %6683 = vmatprep.subr.bf16.mxu0 %v10474_v34  ;;  %6765 = vmatprep.subr.bf16.mxu1 %v10476_v38  ;;  %v10700_v34 = vcombine.high %v258_v26, %v274_v28  ;;  %v10730_v38 = vcombine.high %v289_v31, %v305_v32  ;;  %v10729_v44 = vcombine.low %v289_v31, %v305_v32  ;;  %v513_v28 = vld [vmem:[%s16712_s2 + $0xf20] sm:$0xff]  ;;  %v530_v31 = vld [vmem:[%s16712_s2 + $0xfa8] sm:$0xff] }
 0x104   :  { %v10731_v45 = vcombine.low %v290_v33, %v306_v35 }
 0x105   :  { %6593 = vmatmul.mubr.bf16.vlgmr.msra.gmra.mrb[4].mxu0 %v12986_v24  ;;  %6675 = vmatmul.mubr.bf16.vlgmr.msra.gmra.mrb[4].mxu1 %v12986_v24 }
 0x106   :  { %6684 = vmatpush1.bf16.msra.mxu0 %v10473_v40  ;;  %6766 = vmatpush1.bf16.msra.mxu1 %v10475_v41  ;;  %v337_v40 = vld [vmem:[%s16712_s2 + $0x9a0] sm:$0xff]  ;;  %v322_v41 = vld [vmem:[%s16712_s2 + $0x928] sm:$0xff] }
 0x107   :  { %6685 = vmatprep.subr.bf16.mxu0 %v10506_v42  ;;  %6767 = vmatprep.subr.bf16.mxu1 %v10508_v46  ;;  %v10732_v42 = vcombine.high %v290_v33, %v306_v35  ;;  %v10762_v46 = vcombine.high %v321_v39, %v337_v40  ;;  %v10761_v52 = vcombine.low %v321_v39, %v337_v40  ;;  %v545_v35 = vld [vmem:[%s16712_s2 + $0x1020] sm:$0xff]  ;;  %v562_v39 = vld [vmem:[%s16712_s2 + $0x10a8] sm:$0xff] }
 0x108   :  { %6715 = vmatprep.mubr.bf16.mxu0 %v12645_v57  ;;  %6797 = vmatprep.mubr.bf16.mxu1 %v12645_v57  ;;  %v10763_v54 = vcombine.low %v322_v41, %v338_v43 }
 0x10a   :  { %6686 = vmatpush1.bf16.msra.mxu0 %v10505_v48  ;;  %6768 = vmatpush1.bf16.msra.mxu1 %v10507_v49  ;;  %v369_v48 = vld [vmem:[%s16712_s2 + $0xaa0] sm:$0xff]  ;;  %v354_v49 = vld [vmem:[%s16712_s2 + $0xa28] sm:$0xff] }
 0x10b   :  { %6687 = vmatprep.subr.bf16.mxu0 %v10538_v50  ;;  %6769 = vmatprep.subr.bf16.mxu1 %v10540_v55  ;;  %v10764_v50 = vcombine.high %v322_v41, %v338_v43  ;;  %v10794_v55 = vcombine.high %v353_v47, %v369_v48  ;;  %v10793_v62 = vcombine.low %v353_v47, %v369_v48  ;;  %v577_v43 = vld [vmem:[%s16712_s2 + $0x1120] sm:$0xff]  ;;  %v594_v47 = vld [vmem:[%s16712_s2 + $0x11a8] sm:$0xff] }
 0x10c   :  { %v10795_v63 = vcombine.low %v354_v49, %v370_v51 }
 0x10e   :  { %6688 = vmatpush1.bf16.msra.mxu0 %v10537_v58  ;;  %6770 = vmatpush1.bf16.msra.mxu1 %v10539_v59  ;;  %v401_v58 = vld [vmem:[%s16712_s2 + $0xba0] sm:$0xff]  ;;  %v386_v59 = vld [vmem:[%s16712_s2 + $0xb28] sm:$0xff] }
 0x10f   :  { %6689 = vmatprep.subr.bf16.mxu0 %v10570_v60  ;;  %6771 = vmatprep.subr.bf16.mxu1 %v10572_v0  ;;  %v10796_v60 = vcombine.high %v354_v49, %v370_v51  ;;  %v10826_v0 = vcombine.high %v385_v56, %v401_v58  ;;  %v10825_v6 = vcombine.low %v385_v56, %v401_v58  ;;  %v609_v51 = vld [vmem:[%s16712_s2 + $0x1220] sm:$0xff] }
 0x110   :  { %v10827_v7 = vcombine.low %v386_v59, %v402_v61 }
 0x112   :  { %6690 = vmatpush1.bf16.msra.mxu0 %v10569_v2  ;;  %6772 = vmatpush1.bf16.msra.mxu1 %v10571_v3  ;;  %v433_v2 = vld [vmem:[%s16712_s2 + $0xca0] sm:$0xff]  ;;  %v418_v3 = vld [vmem:[%s16712_s2 + $0xc28] sm:$0xff] }
 0x113   :  { %6691 = vmatprep.subr.bf16.mxu0 %v10602_v4  ;;  %6773 = vmatprep.subr.bf16.mxu1 %v10604_v8  ;;  %v10828_v4 = vcombine.high %v386_v59, %v402_v61  ;;  %v10858_v8 = vcombine.high %v417_v1, %v433_v2  ;;  %v10857_v16 = vcombine.low %v417_v1, %v433_v2 }
 0x114   :  { %v10859_v17 = vcombine.low %v418_v3, %v434_v5 }
 0x116   :  { %6692 = vmatpush1.bf16.msra.mxu0 %v10601_v10  ;;  %6774 = vmatpush1.bf16.msra.mxu1 %v10603_v11  ;;  %v465_v10 = vld [vmem:[%s16712_s2 + $0xda0] sm:$0xff]  ;;  %v450_v11 = vld [vmem:[%s16712_s2 + $0xd28] sm:$0xff] }
 0x117   :  { %6693 = vmatprep.subr.bf16.mxu0 %v10634_v13  ;;  %6775 = vmatprep.subr.bf16.mxu1 %v10636_v53  ;;  %v10860_v13 = vcombine.high %v418_v3, %v434_v5  ;;  %v10890_v53 = vcombine.high %v449_v9, %v465_v10  ;;  %v10889_v25 = vcombine.low %v449_v9, %v465_v10 }
 0x118   :  { %v10891_v26 = vcombine.low %v450_v11, %v466_v14 }
 0x11a   :  { %6694 = vmatpush1.bf16.msra.mxu0 %v10633_v19  ;;  %6776 = vmatpush1.bf16.msra.mxu1 %v10635_v20  ;;  %v497_v19 = vld [vmem:[%s16712_s2 + $0xea0] sm:$0xff]  ;;  %v482_v20 = vld [vmem:[%s16712_s2 + $0xe28] sm:$0xff] }
 0x11b   :  { %6695 = vmatprep.subr.bf16.mxu0 %v10666_v21  ;;  %6777 = vmatprep.subr.bf16.mxu1 %v10668_v27  ;;  %v10892_v21 = vcombine.high %v450_v11, %v466_v14  ;;  %v10922_v27 = vcombine.high %v481_v18, %v497_v19  ;;  %v10921_v32 = vcombine.low %v481_v18, %v497_v19 }
 0x11c   :  { %v10923_v33 = vcombine.low %v482_v20, %v498_v22 }
 0x11e   :  { %6696 = vmatpush1.bf16.msra.mxu0 %v10665_v29  ;;  %6778 = vmatpush1.bf16.msra.mxu1 %v10667_v30  ;;  %v529_v29 = vld [vmem:[%s16712_s2 + $0xfa0] sm:$0xff]  ;;  %v514_v30 = vld [vmem:[%s16712_s2 + $0xf28] sm:$0xff] }
 0x11f   :  { %6697 = vmatprep.subr.bf16.mxu0 %v10698_v15  ;;  %6779 = vmatprep.subr.bf16.mxu1 %v10700_v34  ;;  %v10924_v15 = vcombine.high %v482_v20, %v498_v22  ;;  %v10954_v34 = vcombine.high %v513_v28, %v529_v29  ;;  %v10953_v40 = vcombine.low %v513_v28, %v529_v29 }
 0x120   :  { %v10955_v41 = vcombine.low %v514_v30, %v530_v31 }
 0x122   :  { %6698 = vmatpush1.bf16.msra.mxu0 %v10697_v36  ;;  %6780 = vmatpush1.bf16.msra.mxu1 %v10699_v37  ;;  %v561_v36 = vld [vmem:[%s16712_s2 + $0x10a0] sm:$0xff]  ;;  %v546_v37 = vld [vmem:[%s16712_s2 + $0x1028] sm:$0xff] }
 0x123   :  { %6699 = vmatprep.subr.bf16.mxu0 %v10730_v38  ;;  %6781 = vmatprep.subr.bf16.mxu1 %v10732_v42  ;;  %v10956_v38 = vcombine.high %v514_v30, %v530_v31  ;;  %v10986_v42 = vcombine.high %v545_v35, %v561_v36  ;;  %v10985_v48 = vcombine.low %v545_v35, %v561_v36 }
 0x124   :  { %v10987_v49 = vcombine.low %v546_v37, %v562_v39 }
 0x126   :  { %6700 = vmatpush1.bf16.msra.mxu0 %v10729_v44  ;;  %6782 = vmatpush1.bf16.msra.mxu1 %v10731_v45  ;;  %v593_v44 = vld [vmem:[%s16712_s2 + $0x11a0] sm:$0xff]  ;;  %v578_v45 = vld [vmem:[%s16712_s2 + $0x1128] sm:$0xff] }
 0x127   :  { %6701 = vmatprep.subr.bf16.mxu0 %v10762_v46  ;;  %6783 = vmatprep.subr.bf16.mxu1 %v10764_v50  ;;  %v10988_v46 = vcombine.high %v546_v37, %v562_v39  ;;  %v11018_v50 = vcombine.high %v577_v43, %v593_v44 }
 0x12a   :  { %6702 = vmatpush1.bf16.msra.mxu0 %v10761_v52  ;;  %6784 = vmatpush1.bf16.msra.mxu1 %v10763_v54  ;;  %v11020_v52 = vcombine.high %v578_v45, %v594_v47  ;;  %v625_v54 = vld [vmem:[%s16712_s2 + $0x12a0] sm:$0xff] }
 0x12b   :  { %6703 = vmatprep.subr.bf16.mxu0 %v10794_v55  ;;  %6785 = vmatprep.subr.bf16.mxu1 %v10796_v60 }
 0x12e   :  { %6704 = vmatpush1.bf16.msra.mxu0 %v10793_v62  ;;  %6786 = vmatpush1.bf16.msra.mxu1 %v10795_v63 }
 0x12f   :  { %6705 = vmatprep.subr.bf16.mxu0 %v10826_v0  ;;  %6787 = vmatprep.subr.bf16.mxu1 %v10828_v4 }
 0x132   :  { %6706 = vmatpush1.bf16.msra.mxu0 %v10825_v6  ;;  %6788 = vmatpush1.bf16.msra.mxu1 %v10827_v7 }
 0x133   :  { %6707 = vmatprep.subr.bf16.mxu0 %v10858_v8  ;;  %6789 = vmatprep.subr.bf16.mxu1 %v10860_v13 }
 0x136   :  { %6708 = vmatpush1.bf16.msra.mxu0 %v10857_v16  ;;  %6790 = vmatpush1.bf16.msra.mxu1 %v10859_v17 }
 0x137   :  { %6709 = vmatprep.subr.bf16.mxu0 %v10890_v53  ;;  %6791 = vmatprep.subr.bf16.mxu1 %v10892_v21 }
 0x13a   :  { %6710 = vmatpush1.bf16.msra.mxu0 %v10889_v25  ;;  %6792 = vmatpush1.bf16.msra.mxu1 %v10891_v26 }
 0x13b   :  { %6711 = vmatprep.subr.bf16.mxu0 %v10922_v27  ;;  %6793 = vmatprep.subr.bf16.mxu1 %v10924_v15 }
 0x13e   :  { %6712 = vmatpush1.bf16.msra.mxu0 %v10921_v32  ;;  %6794 = vmatpush1.bf16.msra.mxu1 %v10923_v33 }
 0x13f   :  { %6713 = vmatprep.subr.bf16.mxu0 %v10954_v34  ;;  %6795 = vmatprep.subr.bf16.mxu1 %v10956_v38 }
 0x142   :  { %6714 = vmatpush1.bf16.msra.mxu0 %v10953_v40  ;;  %6796 = vmatpush1.bf16.msra.mxu1 %v10955_v41 }
 0x143   :  { %6724 = vmatprep.subr.bf16.mxu0 %v10986_v42  ;;  %6806 = vmatprep.subr.bf16.mxu1 %v10988_v46 }
 0x144   :  { %15 = vsyncpa [#allocation7], 0  ;;  %v610_v55 = vld [vmem:[%s16712_s2 + $0x1228] sm:$0xff]  ;;  %v11017_v58 = vcombine.low %v577_v43, %v593_v44  ;;  %v11019_v59 = vcombine.low %v578_v45, %v594_v47  ;;  %v11050_v60 = vcombine.high %v609_v51, %v625_v54  ;;  %v641_v62 = vld [vmem:[%s16712_s2 + $0x1320] sm:$0xff]  ;;  %v11049_v2 = vcombine.low %v609_v51, %v625_v54 }
 0x145   :  { %6716 = vmatmul.mubr.bf16.vlgmr.msra.gmra.mrb[8].mxu0 %v12771_v12  ;;  %v626_v56 = vld [vmem:[%s16712_s2 + $0x12a8] sm:$0xff]  ;;  %6798 = vmatmul.mubr.bf16.vlgmr.msra.gmra.mrb[8].mxu1 %v12771_v12  ;;  %v657_v63 = vld [vmem:[%s16712_s2 + $0x13a0] sm:$0xff]  ;;  %vm10427_vm0 = vcmask 523264  }
 0x146   :  { %6725 = vmatpush1.bf16.msra.mxu0 %v10985_v48  ;;  %6807 = vmatpush1.bf16.msra.mxu1 %v10987_v49  ;;  %v11052_v61 = vcombine.high %v610_v55, %v626_v56  ;;  %v642_v0 = vld [vmem:[%s16712_s2 + $0x1328] sm:$0xff]  ;;  %v11051_v3 = vcombine.low %v610_v55, %v626_v56  ;;  %v11082_v4 = vcombine.high %v641_v62, %v657_v63  ;;  %v673_v6 = vld [vmem:[%s16712_s2 + $0x1420] sm:$0xff] }
 0x147   :  { %6726 = vmatprep.subr.bf16.mxu0 %v11018_v50  ;;  %6808 = vmatprep.subr.bf16.mxu1 %v11020_v52  ;;  %v658_v1 = vld [vmem:[%s16712_s2 + $0x13a8] sm:$0xff]  ;;  %v689_v7 = vld [vmem:[%s16712_s2 + $0x14a0] sm:$0xff]  ;;  %v11081_v10 = vcombine.low %v641_v62, %v657_v63 }
 0x148   :  { %6756 = vmatprep.mubr.bf16.mxu0 %v12798_v23  ;;  %6838 = vmatprep.mubr.bf16.mxu1 %v12798_v23  ;;  %v11084_v5 = vcombine.high %v642_v0, %v658_v1  ;;  %v674_v8 = vld [vmem:[%s16712_s2 + $0x1428] sm:$0xff]  ;;  %v11083_v11 = vcombine.low %v642_v0, %v658_v1  ;;  %v11114_v13 = vcombine.high %v673_v6, %v689_v7  ;;  %v705_v16 = vld [vmem:[%s16712_s2 + $0x1520] sm:$0xff] }
 0x149   :  { %v690_v9 = vld [vmem:[%s16712_s2 + $0x14a8] sm:$0xff]  ;;  %v721_v17 = vld [vmem:[%s16712_s2 + $0x15a0] sm:$0xff]  ;;  %v11113_v19 = vcombine.low %v673_v6, %v689_v7 }
 0x14a   :  { %6727 = vmatpush1.bf16.msra.mxu0 %v11017_v58  ;;  %6809 = vmatpush1.bf16.msra.mxu1 %v11019_v59  ;;  %v11116_v14 = vcombine.high %v674_v8, %v690_v9  ;;  %v706_v53 = vld [vmem:[%s16712_s2 + $0x1528] sm:$0xff]  ;;  %v11115_v20 = vcombine.low %v674_v8, %v690_v9  ;;  %v11146_v21 = vcombine.high %v705_v16, %v721_v17  ;;  %v737_v25 = vld [vmem:[%s16712_s2 + $0x1620] sm:$0xff] }
 0x14b   :  { %6728 = vmatprep.subr.bf16.mxu0 %v11050_v60  ;;  %6810 = vmatprep.subr.bf16.mxu1 %v11052_v61  ;;  %v722_v18 = vld [vmem:[%s16712_s2 + $0x15a8] sm:$0xff]  ;;  %v753_v26 = vld [vmem:[%s16712_s2 + $0x16a0] sm:$0xff]  ;;  %v11145_v29 = vcombine.low %v705_v16, %v721_v17 }
 0x14c   :  { %v11148_v22 = vcombine.high %v706_v53, %v722_v18  ;;  %v738_v27 = vld [vmem:[%s16712_s2 + $0x1628] sm:$0xff]  ;;  %v11147_v30 = vcombine.low %v706_v53, %v722_v18  ;;  %v11178_v15 = vcombine.high %v737_v25, %v753_v26  ;;  %v769_v33 = vld [vmem:[%s16712_s2 + $0x1720] sm:$0xff]  ;;  %v11177_v41 = vcombine.low %v737_v25, %v753_v26 }
 0x14d   :  { %v754_v28 = vld [vmem:[%s16712_s2 + $0x16a8] sm:$0xff]  ;;  %v785_v34 = vld [vmem:[%s16712_s2 + $0x17a0] sm:$0xff] }
 0x14e   :  { %6729 = vmatpush1.bf16.msra.mxu0 %v11049_v2  ;;  %6811 = vmatpush1.bf16.msra.mxu1 %v11051_v3  ;;  %v11180_v32 = vcombine.high %v738_v27, %v754_v28  ;;  %v770_v37 = vld [vmem:[%s16712_s2 + $0x1728] sm:$0xff]  ;;  %v11179_v44 = vcombine.low %v738_v27, %v754_v28  ;;  %v11210_v45 = vcombine.high %v769_v33, %v785_v34  ;;  %v801_v48 = vld [vmem:[%s16712_s2 + $0x1820] sm:$0xff] }
 0x14f   :  { %6730 = vmatprep.subr.bf16.mxu0 %v11082_v4  ;;  %6812 = vmatprep.subr.bf16.mxu1 %v11084_v5  ;;  %v786_v38 = vld [vmem:[%s16712_s2 + $0x17a8] sm:$0xff]  ;;  %v817_v49 = vld [vmem:[%s16712_s2 + $0x18a0] sm:$0xff]  ;;  %v11209_v52 = vcombine.low %v769_v33, %v785_v34 }
 0x150   :  { %v11212_v47 = vcombine.high %v770_v37, %v786_v38  ;;  %v802_v50 = vld [vmem:[%s16712_s2 + $0x1828] sm:$0xff]  ;;  %v11211_v54 = vcombine.low %v770_v37, %v786_v38  ;;  %v11242_v55 = vcombine.high %v801_v48, %v817_v49  ;;  %v833_v58 = vld [vmem:[%s16712_s2 + $0x1920] sm:$0xff]  ;;  %v11241_v62 = vcombine.low %v801_v48, %v817_v49 }
 0x151   :  { %v818_v51 = vld [vmem:[%s16712_s2 + $0x18a8] sm:$0xff]  ;;  %v849_v59 = vld [vmem:[%s16712_s2 + $0x19a0] sm:$0xff] }
 0x152   :  { %6731 = vmatpush1.bf16.msra.mxu0 %v11081_v10  ;;  %6813 = vmatpush1.bf16.msra.mxu1 %v11083_v11  ;;  %v11244_v56 = vcombine.high %v802_v50, %v818_v51  ;;  %v834_v60 = vld [vmem:[%s16712_s2 + $0x1928] sm:$0xff]  ;;  %v11243_v63 = vcombine.low %v802_v50, %v818_v51  ;;  %v11274_v0 = vcombine.high %v833_v58, %v849_v59  ;;  %v865_v2 = vld [vmem:[%s16712_s2 + $0x1a20] sm:$0xff] }
 0x153   :  { %6732 = vmatprep.subr.bf16.mxu0 %v11114_v13  ;;  %6814 = vmatprep.subr.bf16.mxu1 %v11116_v14  ;;  %v850_v61 = vld [vmem:[%s16712_s2 + $0x19a8] sm:$0xff]  ;;  %v881_v3 = vld [vmem:[%s16712_s2 + $0x1aa0] sm:$0xff]  ;;  %v11273_v6 = vcombine.low %v833_v58, %v849_v59  ;;  %v35_v58 = vld [vmem:[%s16712_s2 + $0x30] sm:$0xff] }
 0x154   :  { %v11276_v1 = vcombine.high %v834_v60, %v850_v61  ;;  %v866_v4 = vld [vmem:[%s16712_s2 + $0x1a28] sm:$0xff]  ;;  %v11275_v7 = vcombine.low %v834_v60, %v850_v61  ;;  %v11306_v8 = vcombine.high %v865_v2, %v881_v3  ;;  %v897_v10 = vld [vmem:[%s16712_s2 + $0x1b20] sm:$0xff]  ;;  %v11305_v16 = vcombine.low %v865_v2, %v881_v3  ;;  %v51_v59 = vld [vmem:[%s16712_s2 + $0xb0] sm:$0xff] }
 0x155   :  { %v882_v5 = vld [vmem:[%s16712_s2 + $0x1aa8] sm:$0xff]  ;;  %v913_v11 = vld [vmem:[%s16712_s2 + $0x1ba0] sm:$0xff]  ;;  %v36_v60 = vld [vmem:[%s16712_s2 + $0x38] sm:$0xff] }
 0x156   :  { %6733 = vmatpush1.bf16.msra.mxu0 %v11113_v19  ;;  %6815 = vmatpush1.bf16.msra.mxu1 %v11115_v20  ;;  %v11308_v9 = vcombine.high %v866_v4, %v882_v5  ;;  %v898_v13 = vld [vmem:[%s16712_s2 + $0x1b28] sm:$0xff]  ;;  %v11307_v17 = vcombine.low %v866_v4, %v882_v5  ;;  %v11338_v53 = vcombine.high %v897_v10, %v913_v11  ;;  %v929_v19 = vld [vmem:[%s16712_s2 + $0x1c20] sm:$0xff]  ;;  %v52_v61 = vld [vmem:[%s16712_s2 + $0xb8] sm:$0xff] }
 0x157   :  { %6734 = vmatprep.subr.bf16.mxu0 %v11146_v21  ;;  %6816 = vmatprep.subr.bf16.mxu1 %v11148_v22  ;;  %v914_v14 = vld [vmem:[%s16712_s2 + $0x1ba8] sm:$0xff]  ;;  %v945_v20 = vld [vmem:[%s16712_s2 + $0x1ca0] sm:$0xff]  ;;  %v11337_v25 = vcombine.low %v897_v10, %v913_v11  ;;  %v67_v2 = vld [vmem:[%s16712_s2 + $0x130] sm:$0xff] }
 0x158   :  { %v13640_v31 = vpop.f32.mrb[0].mxu0  ;;  %v13648_v35 = vpop.f32.mrb[0].mxu1  ;;  %v11340_v18 = vcombine.high %v898_v13, %v914_v14  ;;  %v930_v21 = vld [vmem:[%s16712_s2 + $0x1c28] sm:$0xff]  ;;  %v11339_v26 = vcombine.low %v898_v13, %v914_v14  ;;  %v11370_v27 = vcombine.high %v929_v19, %v945_v20  ;;  %v11369_v33 = vcombine.low %v929_v19, %v945_v20  ;;  %v1025_v48 = vld [vmem:[%s16712_s2 + $0x1f20] sm:$0xff]  ;;  %v83_v3 = vld [vmem:[%s16712_s2 + $0x1b0] sm:$0xff] }
 0x159   :  { %v13650_v36 = vpop.f32.mrb[1].mxu0  ;;  %v13658_v39 = vpop.f32.mrb[1].mxu1  ;;  %v946_v22 = vld [vmem:[%s16712_s2 + $0x1ca8] sm:$0xff]  ;;  %v1041_v49 = vld [vmem:[%s16712_s2 + $0x1fa0] sm:$0xff]  ;;  %v68_v4 = vld [vmem:[%s16712_s2 + $0x138] sm:$0xff] }
 0x15a   :  { %v6434_v40 = vpop.f32.mrb[2].mxu0  ;;  %6735 = vmatpush1.bf16.msra.mxu0 %v11145_v29  ;;  %v6516_v42 = vpop.f32.mrb[2].mxu1  ;;  %6817 = vmatpush1.bf16.msra.mxu1 %v11147_v30  ;;  %v11372_v28 = vcombine.high %v930_v21, %v946_v22  ;;  %v961_v29 = vld [vmem:[%s16712_s2 + $0x1d20] sm:$0xff]  ;;  %v11371_v34 = vcombine.low %v930_v21, %v946_v22  ;;  %v1026_v50 = vld [vmem:[%s16712_s2 + $0x1f28] sm:$0xff]  ;;  %v84_v5 = vld [vmem:[%s16712_s2 + $0x1b8] sm:$0xff] }
 0x15b   :  { %v6435_v43 = vpop.f32.mrb[3].mxu0  ;;  %6736 = vmatprep.subr.bf16.mxu0 %v11178_v15  ;;  %v6517_v46 = vpop.f32.mrb[3].mxu1  ;;  %6818 = vmatprep.subr.bf16.mxu1 %v11180_v32  ;;  %v977_v30 = vld [vmem:[%s16712_s2 + $0x1da0] sm:$0xff]  ;;  %v962_v15 = vld [vmem:[%s16712_s2 + $0x1d28] sm:$0xff]  ;;  %v99_v10 = vld [vmem:[%s16712_s2 + $0x230] sm:$0xff] }
 0x15c   :  { %v978_v32 = vld [vmem:[%s16712_s2 + $0x1da8] sm:$0xff]  ;;  %v11402_v37 = vcombine.high %v961_v29, %v977_v30  ;;  %v993_v40 = vld [vmem:[%s16712_s2 + $0x1e20] sm:$0xff]  ;;  %v115_v11 = vld [vmem:[%s16712_s2 + $0x2b0] sm:$0xff] }
 0x15d   :  { %v11404_v38 = vcombine.high %v962_v15, %v978_v32  ;;  %v994_v42 = vld [vmem:[%s16712_s2 + $0x1e28] sm:$0xff]  ;;  %v100_v13 = vld [vmem:[%s16712_s2 + $0x238] sm:$0xff]  ;;  %v131_v19 = vld [vmem:[%s16712_s2 + $0x330] sm:$0xff] }
 0x15e   :  { %6737 = vmatpush1.bf16.msra.mxu0 %v11177_v41  ;;  %6819 = vmatpush1.bf16.msra.mxu1 %v11179_v44  ;;  %v1009_v41 = vld [vmem:[%s16712_s2 + $0x1ea0] sm:$0xff]  ;;  %v1010_v43 = vld [vmem:[%s16712_s2 + $0x1ea8] sm:$0xff]  ;;  %v11401_v44 = vcombine.low %v961_v29, %v977_v30  ;;  %v116_v14 = vld [vmem:[%s16712_s2 + $0x2b8] sm:$0xff] }
 0x15f   :  { %6738 = vmatprep.subr.bf16.mxu0 %v11210_v45  ;;  %6820 = vmatprep.subr.bf16.mxu1 %v11212_v47  ;;  %v11403_v45 = vcombine.low %v962_v15, %v978_v32  ;;  %v11434_v46 = vcombine.high %v993_v40, %v1009_v41  ;;  %v11436_v47 = vcombine.high %v994_v42, %v1010_v43  ;;  %v1042_v51 = vld [vmem:[%s16712_s2 + $0x1fa8] sm:$0xff]  ;;  %v147_v20 = vld [vmem:[%s16712_s2 + $0x3b0] sm:$0xff]  ;;  %v132_v21 = vld [vmem:[%s16712_s2 + $0x338] sm:$0xff] }
 0x160   :  { %v148_v22 = vld [vmem:[%s16712_s2 + $0x3b8] sm:$0xff]  ;;  %v163_v29 = vld [vmem:[%s16712_s2 + $0x430] sm:$0xff] }
 0x161   :  { %v179_v30 = vld [vmem:[%s16712_s2 + $0x4b0] sm:$0xff]  ;;  %v164_v15 = vld [vmem:[%s16712_s2 + $0x438] sm:$0xff] }
 0x162   :  { %6739 = vmatpush1.bf16.msra.mxu0 %v11209_v52  ;;  %6821 = vmatpush1.bf16.msra.mxu1 %v11211_v54  ;;  %v11433_v52 = vcombine.low %v993_v40, %v1009_v41  ;;  %v11435_v54 = vcombine.low %v994_v42, %v1010_v43  ;;  %v180_v32 = vld [vmem:[%s16712_s2 + $0x4b8] sm:$0xff]  ;;  %v195_v40 = vld [vmem:[%s16712_s2 + $0x530] sm:$0xff] }
 0x163   :  { %6740 = vmatprep.subr.bf16.mxu0 %v11242_v55  ;;  %6822 = vmatprep.subr.bf16.mxu1 %v11244_v56  ;;  %v11466_v55 = vcombine.high %v1025_v48, %v1041_v49  ;;  %v11468_v56 = vcombine.high %v1026_v50, %v1042_v51  ;;  %v211_v41 = vld [vmem:[%s16712_s2 + $0x5b0] sm:$0xff]  ;;  %v196_v42 = vld [vmem:[%s16712_s2 + $0x538] sm:$0xff] }
 0x164   :  { %v212_v43 = vld [vmem:[%s16712_s2 + $0x5b8] sm:$0xff] }
 0x166   :  { %6741 = vmatpush1.bf16.msra.mxu0 %v11241_v62  ;;  %6823 = vmatpush1.bf16.msra.mxu1 %v11243_v63  ;;  %v11465_v62 = vcombine.low %v1025_v48, %v1041_v49  ;;  %v11467_v63 = vcombine.low %v1026_v50, %v1042_v51  ;;  %v227_v48 = vld [vmem:[%s16712_s2 + $0x630] sm:$0xff]  ;;  %v228_v50 = vld [vmem:[%s16712_s2 + $0x638] sm:$0xff] }
 0x167   :  { %6742 = vmatprep.subr.bf16.mxu0 %v11274_v0  ;;  %6824 = vmatprep.subr.bf16.mxu1 %v11276_v1  ;;  %v10478_v0 = vcombine.high %v35_v58, %v51_v59  ;;  %v10480_v1 = vcombine.high %v36_v60, %v52_v61  ;;  %v243_v49 = vld [vmem:[%s16712_s2 + $0x6b0] sm:$0xff]  ;;  %v244_v51 = vld [vmem:[%s16712_s2 + $0x6b8] sm:$0xff] }
 0x16a   :  { %6743 = vmatpush1.bf16.msra.mxu0 %v11273_v6  ;;  %6825 = vmatpush1.bf16.msra.mxu1 %v11275_v7  ;;  %v10477_v6 = vcombine.low %v35_v58, %v51_v59  ;;  %v10479_v7 = vcombine.low %v36_v60, %v52_v61  ;;  %v259_v58 = vld [vmem:[%s16712_s2 + $0x730] sm:$0xff]  ;;  %v260_v60 = vld [vmem:[%s16712_s2 + $0x738] sm:$0xff] }
 0x16b   :  { %6744 = vmatprep.subr.bf16.mxu0 %v11306_v8  ;;  %6826 = vmatprep.subr.bf16.mxu1 %v11308_v9  ;;  %v10510_v8 = vcombine.high %v67_v2, %v83_v3  ;;  %v10512_v9 = vcombine.high %v68_v4, %v84_v5  ;;  %v275_v59 = vld [vmem:[%s16712_s2 + $0x7b0] sm:$0xff]  ;;  %v276_v61 = vld [vmem:[%s16712_s2 + $0x7b8] sm:$0xff] }
 0x16e   :  { %6745 = vmatpush1.bf16.msra.mxu0 %v11305_v16  ;;  %6827 = vmatpush1.bf16.msra.mxu1 %v11307_v17  ;;  %v10509_v16 = vcombine.low %v67_v2, %v83_v3  ;;  %v10511_v17 = vcombine.low %v68_v4, %v84_v5  ;;  %v291_v2 = vld [vmem:[%s16712_s2 + $0x830] sm:$0xff]  ;;  %v292_v4 = vld [vmem:[%s16712_s2 + $0x838] sm:$0xff] }
 0x16f   :  { %6746 = vmatprep.subr.bf16.mxu0 %v11338_v53  ;;  %6828 = vmatprep.subr.bf16.mxu1 %v11340_v18  ;;  %v10542_v53 = vcombine.high %v99_v10, %v115_v11  ;;  %v10544_v18 = vcombine.high %v100_v13, %v116_v14  ;;  %v307_v3 = vld [vmem:[%s16712_s2 + $0x8b0] sm:$0xff]  ;;  %v308_v5 = vld [vmem:[%s16712_s2 + $0x8b8] sm:$0xff] }
 0x172   :  { %6747 = vmatpush1.bf16.msra.mxu0 %v11337_v25  ;;  %6829 = vmatpush1.bf16.msra.mxu1 %v11339_v26  ;;  %v10541_v25 = vcombine.low %v99_v10, %v115_v11  ;;  %v10543_v26 = vcombine.low %v100_v13, %v116_v14  ;;  %v323_v10 = vld [vmem:[%s16712_s2 + $0x930] sm:$0xff]  ;;  %v324_v13 = vld [vmem:[%s16712_s2 + $0x938] sm:$0xff] }
 0x173   :  { %6748 = vmatprep.subr.bf16.mxu0 %v11370_v27  ;;  %6830 = vmatprep.subr.bf16.mxu1 %v11372_v28  ;;  %v10574_v27 = vcombine.high %v131_v19, %v147_v20  ;;  %v10576_v28 = vcombine.high %v132_v21, %v148_v22  ;;  %v339_v11 = vld [vmem:[%s16712_s2 + $0x9b0] sm:$0xff]  ;;  %v340_v14 = vld [vmem:[%s16712_s2 + $0x9b8] sm:$0xff] }
 0x176   :  { %6749 = vmatpush1.bf16.msra.mxu0 %v11369_v33  ;;  %6831 = vmatpush1.bf16.msra.mxu1 %v11371_v34  ;;  %v10573_v33 = vcombine.low %v131_v19, %v147_v20  ;;  %v10575_v34 = vcombine.low %v132_v21, %v148_v22  ;;  %v355_v19 = vld [vmem:[%s16712_s2 + $0xa30] sm:$0xff]  ;;  %v356_v21 = vld [vmem:[%s16712_s2 + $0xa38] sm:$0xff] }
 0x177   :  { %6750 = vmatprep.subr.bf16.mxu0 %v11402_v37  ;;  %6832 = vmatprep.subr.bf16.mxu1 %v11404_v38  ;;  %v10606_v37 = vcombine.high %v163_v29, %v179_v30  ;;  %v10608_v38 = vcombine.high %v164_v15, %v180_v32  ;;  %v371_v20 = vld [vmem:[%s16712_s2 + $0xab0] sm:$0xff]  ;;  %v372_v22 = vld [vmem:[%s16712_s2 + $0xab8] sm:$0xff] }
 0x17a   :  { %6751 = vmatpush1.bf16.msra.mxu0 %v11401_v44  ;;  %6833 = vmatpush1.bf16.msra.mxu1 %v11403_v45  ;;  %v10605_v44 = vcombine.low %v163_v29, %v179_v30  ;;  %v10607_v45 = vcombine.low %v164_v15, %v180_v32  ;;  %v387_v29 = vld [vmem:[%s16712_s2 + $0xb30] sm:$0xff]  ;;  %v388_v15 = vld [vmem:[%s16712_s2 + $0xb38] sm:$0xff] }
 0x17b   :  { %6752 = vmatprep.subr.bf16.mxu0 %v11434_v46  ;;  %6834 = vmatprep.subr.bf16.mxu1 %v11436_v47  ;;  %v10638_v46 = vcombine.high %v195_v40, %v211_v41  ;;  %v10640_v47 = vcombine.high %v196_v42, %v212_v43  ;;  %v403_v30 = vld [vmem:[%s16712_s2 + $0xbb0] sm:$0xff]  ;;  %v404_v32 = vld [vmem:[%s16712_s2 + $0xbb8] sm:$0xff] }
 0x17e   :  { %6753 = vmatpush1.bf16.msra.mxu0 %v11433_v52  ;;  %6835 = vmatpush1.bf16.msra.mxu1 %v11435_v54  ;;  %v10637_v52 = vcombine.low %v195_v40, %v211_v41  ;;  %v10639_v54 = vcombine.low %v196_v42, %v212_v43  ;;  %v419_v40 = vld [vmem:[%s16712_s2 + $0xc30] sm:$0xff]  ;;  %v420_v42 = vld [vmem:[%s16712_s2 + $0xc38] sm:$0xff] }
 0x17f   :  { %6754 = vmatprep.subr.bf16.mxu0 %v11466_v55  ;;  %6836 = vmatprep.subr.bf16.mxu1 %v11468_v56  ;;  %v10670_v55 = vcombine.high %v227_v48, %v243_v49  ;;  %v10672_v56 = vcombine.high %v228_v50, %v244_v51  ;;  %v435_v41 = vld [vmem:[%s16712_s2 + $0xcb0] sm:$0xff]  ;;  %v436_v43 = vld [vmem:[%s16712_s2 + $0xcb8] sm:$0xff] }
 0x182   :  { %6755 = vmatpush1.bf16.msra.mxu0 %v11465_v62  ;;  %6837 = vmatpush1.bf16.msra.mxu1 %v11467_v63  ;;  %v10669_v62 = vcombine.low %v227_v48, %v243_v49  ;;  %v10671_v63 = vcombine.low %v228_v50, %v244_v51  ;;  %v451_v48 = vld [vmem:[%s16712_s2 + $0xd30] sm:$0xff]  ;;  %v452_v50 = vld [vmem:[%s16712_s2 + $0xd38] sm:$0xff] }
 0x183   :  { %6847 = vmatprep.subr.bf16.mxu0 %v10478_v0  ;;  %6929 = vmatprep.subr.bf16.mxu1 %v10480_v1  ;;  %v10702_v0 = vcombine.high %v259_v58, %v275_v59  ;;  %v10704_v1 = vcombine.high %v260_v60, %v276_v61  ;;  %v467_v49 = vld [vmem:[%s16712_s2 + $0xdb0] sm:$0xff]  ;;  %v468_v51 = vld [vmem:[%s16712_s2 + $0xdb8] sm:$0xff] }
 0x185   :  { %6757 = vmatmul.mubr.bf16.vlgmr.msra.gmra.mrb[8].mxu0 %v12986_v24  ;;  %6839 = vmatmul.mubr.bf16.vlgmr.msra.gmra.mrb[8].mxu1 %v12986_v24 }
 0x186   :  { %6848 = vmatpush1.bf16.msra.mxu0 %v10477_v6  ;;  %6930 = vmatpush1.bf16.msra.mxu1 %v10479_v7  ;;  %v10701_v6 = vcombine.low %v259_v58, %v275_v59  ;;  %v10703_v7 = vcombine.low %v260_v60, %v276_v61  ;;  %v483_v58 = vld [vmem:[%s16712_s2 + $0xe30] sm:$0xff]  ;;  %v484_v60 = vld [vmem:[%s16712_s2 + $0xe38] sm:$0xff] }
 0x187   :  { %6849 = vmatprep.subr.bf16.mxu0 %v10510_v8  ;;  %6931 = vmatprep.subr.bf16.mxu1 %v10512_v9  ;;  %v10734_v8 = vcombine.high %v291_v2, %v307_v3  ;;  %v10736_v9 = vcombine.high %v292_v4, %v308_v5  ;;  %v499_v59 = vld [vmem:[%s16712_s2 + $0xeb0] sm:$0xff]  ;;  %v500_v61 = vld [vmem:[%s16712_s2 + $0xeb8] sm:$0xff] }
 0x188   :  { %6879 = vmatprep.mubr.bf16.mxu0 %v12645_v57  ;;  %6961 = vmatprep.mubr.bf16.mxu1 %v12645_v57 }
 0x18a   :  { %6850 = vmatpush1.bf16.msra.mxu0 %v10509_v16  ;;  %6932 = vmatpush1.bf16.msra.mxu1 %v10511_v17  ;;  %v10733_v16 = vcombine.low %v291_v2, %v307_v3  ;;  %v10735_v17 = vcombine.low %v292_v4, %v308_v5  ;;  %v515_v2 = vld [vmem:[%s16712_s2 + $0xf30] sm:$0xff]  ;;  %v516_v4 = vld [vmem:[%s16712_s2 + $0xf38] sm:$0xff] }
 0x18b   :  { %6851 = vmatprep.subr.bf16.mxu0 %v10542_v53  ;;  %6933 = vmatprep.subr.bf16.mxu1 %v10544_v18  ;;  %v10766_v53 = vcombine.high %v323_v10, %v339_v11  ;;  %v10768_v18 = vcombine.high %v324_v13, %v340_v14  ;;  %v531_v3 = vld [vmem:[%s16712_s2 + $0xfb0] sm:$0xff]  ;;  %v532_v5 = vld [vmem:[%s16712_s2 + $0xfb8] sm:$0xff] }
 0x18e   :  { %6852 = vmatpush1.bf16.msra.mxu0 %v10541_v25  ;;  %6934 = vmatpush1.bf16.msra.mxu1 %v10543_v26  ;;  %v10765_v25 = vcombine.low %v323_v10, %v339_v11  ;;  %v10767_v26 = vcombine.low %v324_v13, %v340_v14  ;;  %v547_v10 = vld [vmem:[%s16712_s2 + $0x1030] sm:$0xff]  ;;  %v548_v13 = vld [vmem:[%s16712_s2 + $0x1038] sm:$0xff] }
 0x18f   :  { %6853 = vmatprep.subr.bf16.mxu0 %v10574_v27  ;;  %6935 = vmatprep.subr.bf16.mxu1 %v10576_v28  ;;  %v10798_v27 = vcombine.high %v355_v19, %v371_v20  ;;  %v10800_v28 = vcombine.high %v356_v21, %v372_v22  ;;  %v563_v11 = vld [vmem:[%s16712_s2 + $0x10b0] sm:$0xff]  ;;  %v564_v14 = vld [vmem:[%s16712_s2 + $0x10b8] sm:$0xff] }
 0x192   :  { %6854 = vmatpush1.bf16.msra.mxu0 %v10573_v33  ;;  %6936 = vmatpush1.bf16.msra.mxu1 %v10575_v34  ;;  %v10797_v33 = vcombine.low %v355_v19, %v371_v20  ;;  %v10799_v34 = vcombine.low %v356_v21, %v372_v22  ;;  %v579_v19 = vld [vmem:[%s16712_s2 + $0x1130] sm:$0xff]  ;;  %v580_v21 = vld [vmem:[%s16712_s2 + $0x1138] sm:$0xff] }
 0x193   :  { %6855 = vmatprep.subr.bf16.mxu0 %v10606_v37  ;;  %6937 = vmatprep.subr.bf16.mxu1 %v10608_v38  ;;  %v10830_v37 = vcombine.high %v387_v29, %v403_v30  ;;  %v10832_v38 = vcombine.high %v388_v15, %v404_v32  ;;  %v595_v20 = vld [vmem:[%s16712_s2 + $0x11b0] sm:$0xff]  ;;  %v596_v22 = vld [vmem:[%s16712_s2 + $0x11b8] sm:$0xff] }
 0x196   :  { %6856 = vmatpush1.bf16.msra.mxu0 %v10605_v44  ;;  %6938 = vmatpush1.bf16.msra.mxu1 %v10607_v45  ;;  %v10829_v44 = vcombine.low %v387_v29, %v403_v30  ;;  %v10831_v45 = vcombine.low %v388_v15, %v404_v32  ;;  %v611_v29 = vld [vmem:[%s16712_s2 + $0x1230] sm:$0xff]  ;;  %v612_v15 = vld [vmem:[%s16712_s2 + $0x1238] sm:$0xff] }
 0x197   :  { %6857 = vmatprep.subr.bf16.mxu0 %v10638_v46  ;;  %6939 = vmatprep.subr.bf16.mxu1 %v10640_v47  ;;  %v10862_v46 = vcombine.high %v419_v40, %v435_v41  ;;  %v10864_v47 = vcombine.high %v420_v42, %v436_v43  ;;  %v627_v30 = vld [vmem:[%s16712_s2 + $0x12b0] sm:$0xff]  ;;  %v628_v32 = vld [vmem:[%s16712_s2 + $0x12b8] sm:$0xff] }
 0x19a   :  { %6858 = vmatpush1.bf16.msra.mxu0 %v10637_v52  ;;  %6940 = vmatpush1.bf16.msra.mxu1 %v10639_v54  ;;  %v10861_v52 = vcombine.low %v419_v40, %v435_v41  ;;  %v10863_v54 = vcombine.low %v420_v42, %v436_v43  ;;  %v643_v40 = vld [vmem:[%s16712_s2 + $0x1330] sm:$0xff]  ;;  %v644_v42 = vld [vmem:[%s16712_s2 + $0x1338] sm:$0xff] }
 0x19b   :  { %6859 = vmatprep.subr.bf16.mxu0 %v10670_v55  ;;  %6941 = vmatprep.subr.bf16.mxu1 %v10672_v56  ;;  %v10894_v55 = vcombine.high %v451_v48, %v467_v49  ;;  %v10896_v56 = vcombine.high %v452_v50, %v468_v51  ;;  %v659_v41 = vld [vmem:[%s16712_s2 + $0x13b0] sm:$0xff]  ;;  %v660_v43 = vld [vmem:[%s16712_s2 + $0x13b8] sm:$0xff] }
 0x19e   :  { %6860 = vmatpush1.bf16.msra.mxu0 %v10669_v62  ;;  %6942 = vmatpush1.bf16.msra.mxu1 %v10671_v63  ;;  %v10893_v62 = vcombine.low %v451_v48, %v467_v49  ;;  %v10895_v63 = vcombine.low %v452_v50, %v468_v51  ;;  %v675_v48 = vld [vmem:[%s16712_s2 + $0x1430] sm:$0xff]  ;;  %v676_v50 = vld [vmem:[%s16712_s2 + $0x1438] sm:$0xff] }
 0x19f   :  { %6861 = vmatprep.subr.bf16.mxu0 %v10702_v0  ;;  %6943 = vmatprep.subr.bf16.mxu1 %v10704_v1  ;;  %v10926_v0 = vcombine.high %v483_v58, %v499_v59  ;;  %v10928_v1 = vcombine.high %v484_v60, %v500_v61  ;;  %v691_v49 = vld [vmem:[%s16712_s2 + $0x14b0] sm:$0xff]  ;;  %v692_v51 = vld [vmem:[%s16712_s2 + $0x14b8] sm:$0xff] }
 0x1a2   :  { %6862 = vmatpush1.bf16.msra.mxu0 %v10701_v6  ;;  %6944 = vmatpush1.bf16.msra.mxu1 %v10703_v7  ;;  %v10925_v6 = vcombine.low %v483_v58, %v499_v59  ;;  %v10927_v7 = vcombine.low %v484_v60, %v500_v61  ;;  %v707_v58 = vld [vmem:[%s16712_s2 + $0x1530] sm:$0xff]  ;;  %v708_v60 = vld [vmem:[%s16712_s2 + $0x1538] sm:$0xff] }
 0x1a3   :  { %6863 = vmatprep.subr.bf16.mxu0 %v10734_v8  ;;  %6945 = vmatprep.subr.bf16.mxu1 %v10736_v9  ;;  %v10958_v8 = vcombine.high %v515_v2, %v531_v3  ;;  %v10960_v9 = vcombine.high %v516_v4, %v532_v5  ;;  %v723_v59 = vld [vmem:[%s16712_s2 + $0x15b0] sm:$0xff]  ;;  %v724_v61 = vld [vmem:[%s16712_s2 + $0x15b8] sm:$0xff] }
 0x1a6   :  { %6864 = vmatpush1.bf16.msra.mxu0 %v10733_v16  ;;  %6946 = vmatpush1.bf16.msra.mxu1 %v10735_v17  ;;  %v10957_v16 = vcombine.low %v515_v2, %v531_v3  ;;  %v10959_v17 = vcombine.low %v516_v4, %v532_v5  ;;  %v739_v2 = vld [vmem:[%s16712_s2 + $0x1630] sm:$0xff]  ;;  %v740_v4 = vld [vmem:[%s16712_s2 + $0x1638] sm:$0xff] }
 0x1a7   :  { %6865 = vmatprep.subr.bf16.mxu0 %v10766_v53  ;;  %6947 = vmatprep.subr.bf16.mxu1 %v10768_v18  ;;  %v10990_v53 = vcombine.high %v547_v10, %v563_v11  ;;  %v10992_v18 = vcombine.high %v548_v13, %v564_v14  ;;  %v755_v3 = vld [vmem:[%s16712_s2 + $0x16b0] sm:$0xff]  ;;  %v756_v5 = vld [vmem:[%s16712_s2 + $0x16b8] sm:$0xff] }
 0x1aa   :  { %6866 = vmatpush1.bf16.msra.mxu0 %v10765_v25  ;;  %6948 = vmatpush1.bf16.msra.mxu1 %v10767_v26  ;;  %v10989_v25 = vcombine.low %v547_v10, %v563_v11  ;;  %v10991_v26 = vcombine.low %v548_v13, %v564_v14  ;;  %v11184_v10 = vcombine.high %v740_v4, %v756_v5  ;;  %v771_v11 = vld [vmem:[%s16712_s2 + $0x1730] sm:$0xff] }
 0x1ab   :  { %6867 = vmatprep.subr.bf16.mxu0 %v10798_v27  ;;  %6949 = vmatprep.subr.bf16.mxu1 %v10800_v28  ;;  %v11022_v27 = vcombine.high %v579_v19, %v595_v20  ;;  %v11024_v28 = vcombine.high %v580_v21, %v596_v22  ;;  %v787_v13 = vld [vmem:[%s16712_s2 + $0x17b0] sm:$0xff] }
 0x1ae   :  { %6868 = vmatpush1.bf16.msra.mxu0 %v10797_v33  ;;  %6950 = vmatpush1.bf16.msra.mxu1 %v10799_v34  ;;  %v11021_v33 = vcombine.low %v579_v19, %v595_v20  ;;  %v11023_v34 = vcombine.low %v580_v21, %v596_v22  ;;  %v11181_v20 = vcombine.low %v739_v2, %v755_v3 }
 0x1af   :  { %6869 = vmatprep.subr.bf16.mxu0 %v10830_v37  ;;  %6951 = vmatprep.subr.bf16.mxu1 %v10832_v38  ;;  %v11054_v37 = vcombine.high %v611_v29, %v627_v30  ;;  %v11056_v38 = vcombine.high %v612_v15, %v628_v32 }
 0x1b2   :  { %6870 = vmatpush1.bf16.msra.mxu0 %v10829_v44  ;;  %6952 = vmatpush1.bf16.msra.mxu1 %v10831_v45  ;;  %v11053_v44 = vcombine.low %v611_v29, %v627_v30  ;;  %v11055_v45 = vcombine.low %v612_v15, %v628_v32  ;;  %v803_v29 = vld [vmem:[%s16712_s2 + $0x1830] sm:$0xff]  ;;  %v804_v15 = vld [vmem:[%s16712_s2 + $0x1838] sm:$0xff] }
 0x1b3   :  { %6871 = vmatprep.subr.bf16.mxu0 %v10862_v46  ;;  %6953 = vmatprep.subr.bf16.mxu1 %v10864_v47  ;;  %v11086_v46 = vcombine.high %v643_v40, %v659_v41  ;;  %v11088_v47 = vcombine.high %v644_v42, %v660_v43  ;;  %v819_v30 = vld [vmem:[%s16712_s2 + $0x18b0] sm:$0xff]  ;;  %v820_v32 = vld [vmem:[%s16712_s2 + $0x18b8] sm:$0xff] }
 0x1b6   :  { %6872 = vmatpush1.bf16.msra.mxu0 %v10861_v52  ;;  %6954 = vmatpush1.bf16.msra.mxu1 %v10863_v54  ;;  %v11085_v52 = vcombine.low %v643_v40, %v659_v41  ;;  %v11087_v54 = vcombine.low %v644_v42, %v660_v43  ;;  %v835_v40 = vld [vmem:[%s16712_s2 + $0x1930] sm:$0xff]  ;;  %v836_v42 = vld [vmem:[%s16712_s2 + $0x1938] sm:$0xff] }
 0x1b7   :  { %6873 = vmatprep.subr.bf16.mxu0 %v10894_v55  ;;  %6955 = vmatprep.subr.bf16.mxu1 %v10896_v56  ;;  %v11118_v55 = vcombine.high %v675_v48, %v691_v49  ;;  %v11120_v56 = vcombine.high %v676_v50, %v692_v51  ;;  %v851_v41 = vld [vmem:[%s16712_s2 + $0x19b0] sm:$0xff]  ;;  %v852_v43 = vld [vmem:[%s16712_s2 + $0x19b8] sm:$0xff] }
 0x1ba   :  { %6874 = vmatpush1.bf16.msra.mxu0 %v10893_v62  ;;  %6956 = vmatpush1.bf16.msra.mxu1 %v10895_v63  ;;  %v11117_v62 = vcombine.low %v675_v48, %v691_v49  ;;  %v11119_v63 = vcombine.low %v676_v50, %v692_v51  ;;  %v867_v48 = vld [vmem:[%s16712_s2 + $0x1a30] sm:$0xff]  ;;  %v868_v50 = vld [vmem:[%s16712_s2 + $0x1a38] sm:$0xff] }
 0x1bb   :  { %6875 = vmatprep.subr.bf16.mxu0 %v10926_v0  ;;  %6957 = vmatprep.subr.bf16.mxu1 %v10928_v1  ;;  %v11150_v0 = vcombine.high %v707_v58, %v723_v59  ;;  %v11152_v1 = vcombine.high %v708_v60, %v724_v61  ;;  %v883_v49 = vld [vmem:[%s16712_s2 + $0x1ab0] sm:$0xff]  ;;  %v884_v51 = vld [vmem:[%s16712_s2 + $0x1ab8] sm:$0xff] }
 0x1be   :  { %6876 = vmatpush1.bf16.msra.mxu0 %v10925_v6  ;;  %6958 = vmatpush1.bf16.msra.mxu1 %v10927_v7  ;;  %v11149_v6 = vcombine.low %v707_v58, %v723_v59  ;;  %v11151_v7 = vcombine.low %v708_v60, %v724_v61  ;;  %v899_v58 = vld [vmem:[%s16712_s2 + $0x1b30] sm:$0xff]  ;;  %v900_v60 = vld [vmem:[%s16712_s2 + $0x1b38] sm:$0xff] }
 0x1bf   :  { %6877 = vmatprep.subr.bf16.mxu0 %v10958_v8  ;;  %6959 = vmatprep.subr.bf16.mxu1 %v10960_v9  ;;  %v11182_v8 = vcombine.high %v739_v2, %v755_v3  ;;  %v915_v59 = vld [vmem:[%s16712_s2 + $0x1bb0] sm:$0xff]  ;;  %v916_v61 = vld [vmem:[%s16712_s2 + $0x1bb8] sm:$0xff] }
 0x1c0   :  { %v931_v2 = vld [vmem:[%s16712_s2 + $0x1c30] sm:$0xff] }
 0x1c1   :  { %v947_v3 = vld [vmem:[%s16712_s2 + $0x1cb0] sm:$0xff] }
 0x1c2   :  { %6878 = vmatpush1.bf16.msra.mxu0 %v10957_v16  ;;  %6960 = vmatpush1.bf16.msra.mxu1 %v10959_v17  ;;  %v772_v17 = vld [vmem:[%s16712_s2 + $0x1738] sm:$0xff] }
 0x1c3   :  { %6888 = vmatprep.subr.bf16.mxu0 %v10990_v53  ;;  %6970 = vmatprep.subr.bf16.mxu1 %v10992_v18  ;;  %v788_v53 = vld [vmem:[%s16712_s2 + $0x17b8] sm:$0xff] }
 0x1c5   :  { %6880 = vmatmul.mubr.bf16.vlgmr.msra.gmra.mrb[12].mxu0 %v12771_v12  ;;  %6962 = vmatmul.mubr.bf16.vlgmr.msra.gmra.mrb[12].mxu1 %v12771_v12 }
 0x1c6   :  { %6889 = vmatpush1.bf16.msra.mxu0 %v10989_v25  ;;  %6971 = vmatpush1.bf16.msra.mxu1 %v10991_v26  ;;  %v11183_v25 = vcombine.low %v740_v4, %v756_v5  ;;  %v11214_v26 = vcombine.high %v771_v11, %v787_v13  ;;  %v932_v4 = vld [vmem:[%s16712_s2 + $0x1c38] sm:$0xff] }
 0x1c7   :  { %6890 = vmatprep.subr.bf16.mxu0 %v11022_v27  ;;  %6972 = vmatprep.subr.bf16.mxu1 %v11024_v28  ;;  %v11216_v28 = vcombine.high %v772_v17, %v788_v53  ;;  %v948_v5 = vld [vmem:[%s16712_s2 + $0x1cb8] sm:$0xff] }
 0x1c8   :  { %6920 = vmatprep.mubr.bf16.mxu0 %v12798_v23  ;;  %7002 = vmatprep.mubr.bf16.mxu1 %v12798_v23 }
 0x1ca   :  { %6891 = vmatpush1.bf16.msra.mxu0 %v11021_v33  ;;  %6973 = vmatpush1.bf16.msra.mxu1 %v11023_v34  ;;  %v11213_v33 = vcombine.low %v771_v11, %v787_v13  ;;  %v11215_v34 = vcombine.low %v772_v17, %v788_v53  ;;  %v963_v11 = vld [vmem:[%s16712_s2 + $0x1d30] sm:$0xff]  ;;  %v964_v17 = vld [vmem:[%s16712_s2 + $0x1d38] sm:$0xff] }
 0x1cb   :  { %6892 = vmatprep.subr.bf16.mxu0 %v11054_v37  ;;  %6974 = vmatprep.subr.bf16.mxu1 %v11056_v38  ;;  %v11246_v37 = vcombine.high %v803_v29, %v819_v30  ;;  %v11248_v38 = vcombine.high %v804_v15, %v820_v32  ;;  %v979_v13 = vld [vmem:[%s16712_s2 + $0x1db0] sm:$0xff]  ;;  %v980_v53 = vld [vmem:[%s16712_s2 + $0x1db8] sm:$0xff] }
 0x1ce   :  { %6893 = vmatpush1.bf16.msra.mxu0 %v11053_v44  ;;  %6975 = vmatpush1.bf16.msra.mxu1 %v11055_v45  ;;  %v11245_v44 = vcombine.low %v803_v29, %v819_v30  ;;  %v11247_v45 = vcombine.low %v804_v15, %v820_v32  ;;  %v11405_v29 = vcombine.low %v963_v11, %v979_v13 }
 0x1cf   :  { %6894 = vmatprep.subr.bf16.mxu0 %v11086_v46  ;;  %6976 = vmatprep.subr.bf16.mxu1 %v11088_v47  ;;  %v11278_v46 = vcombine.high %v835_v40, %v851_v41  ;;  %v11280_v47 = vcombine.high %v836_v42, %v852_v43  ;;  %v11407_v30 = vcombine.low %v964_v17, %v980_v53 }
 0x1d2   :  { %6895 = vmatpush1.bf16.msra.mxu0 %v11085_v52  ;;  %6977 = vmatpush1.bf16.msra.mxu1 %v11087_v54  ;;  %v11277_v52 = vcombine.low %v835_v40, %v851_v41  ;;  %v11279_v54 = vcombine.low %v836_v42, %v852_v43 }
 0x1d3   :  { %6896 = vmatprep.subr.bf16.mxu0 %v11118_v55  ;;  %6978 = vmatprep.subr.bf16.mxu1 %v11120_v56  ;;  %v11310_v55 = vcombine.high %v867_v48, %v883_v49  ;;  %v11312_v56 = vcombine.high %v868_v50, %v884_v51 }
 0x1d6   :  { %6897 = vmatpush1.bf16.msra.mxu0 %v11117_v62  ;;  %6979 = vmatpush1.bf16.msra.mxu1 %v11119_v63  ;;  %v11309_v62 = vcombine.low %v867_v48, %v883_v49  ;;  %v11311_v63 = vcombine.low %v868_v50, %v884_v51 }
 0x1d7   :  { %6898 = vmatprep.subr.bf16.mxu0 %v11150_v0  ;;  %6980 = vmatprep.subr.bf16.mxu1 %v11152_v1  ;;  %v11342_v0 = vcombine.high %v899_v58, %v915_v59  ;;  %v11344_v1 = vcombine.high %v900_v60, %v916_v61 }
 0x1d8   :  { %v14040_v9 = vpop.f32.mrb[4].mxu0  ;;  %v14048_v14 = vpop.f32.mrb[4].mxu1 }
 0x1d9   :  { %v14050_v16 = vpop.f32.mrb[5].mxu0  ;;  %v14058_v18 = vpop.f32.mrb[5].mxu1 }
 0x1da   :  { %v6598_v19 = vpop.f32.mrb[6].mxu0  ;;  %6899 = vmatpush1.bf16.msra.mxu0 %v11149_v6  ;;  %v6680_v21 = vpop.f32.mrb[6].mxu1  ;;  %6981 = vmatpush1.bf16.msra.mxu1 %v11151_v7  ;;  %v11341_v6 = vcombine.low %v899_v58, %v915_v59  ;;  %v11343_v7 = vcombine.low %v900_v60, %v916_v61 }
 0x1db   :  { %v6599_v22 = vpop.f32.mrb[7].mxu0  ;;  %6900 = vmatprep.subr.bf16.mxu0 %v11182_v8  ;;  %v6681_v27 = vpop.f32.mrb[7].mxu1  ;;  %6982 = vmatprep.subr.bf16.mxu1 %v11184_v10  ;;  %v11374_v8 = vcombine.high %v931_v2, %v947_v3  ;;  %v11376_v10 = vcombine.high %v932_v4, %v948_v5  ;;  %v11373_v19 = vcombine.low %v931_v2, %v947_v3 }
 0x1dc   :  { %v11406_v21 = vcombine.high %v963_v11, %v979_v13  ;;  %v11408_v22 = vcombine.high %v964_v17, %v980_v53  ;;  %v996_v27 = vld [vmem:[%s16712_s2 + $0x1e38] sm:$0xff] }
 0x1de   :  { %6901 = vmatpush1.bf16.msra.mxu0 %v11181_v20  ;;  %6983 = vmatpush1.bf16.msra.mxu1 %v11183_v25  ;;  %v11375_v20 = vcombine.low %v932_v4, %v948_v5  ;;  %v995_v25 = vld [vmem:[%s16712_s2 + $0x1e30] sm:$0xff] }
 0x1df   :  { %6902 = vmatprep.subr.bf16.mxu0 %v11214_v26  ;;  %6984 = vmatprep.subr.bf16.mxu1 %v11216_v28  ;;  %v1011_v26 = vld [vmem:[%s16712_s2 + $0x1eb0] sm:$0xff]  ;;  %v1012_v28 = vld [vmem:[%s16712_s2 + $0x1eb8] sm:$0xff] }
 0x1e0   :  { %v11438_v15 = vcombine.high %v995_v25, %v1011_v26  ;;  %v11440_v32 = vcombine.high %v996_v27, %v1012_v28  ;;  %v11437_v40 = vcombine.low %v995_v25, %v1011_v26  ;;  %v11439_v41 = vcombine.low %v996_v27, %v1012_v28 }
 0x1e2   :  { %6903 = vmatpush1.bf16.msra.mxu0 %v11213_v33  ;;  %6985 = vmatpush1.bf16.msra.mxu1 %v11215_v34  ;;  %v1027_v33 = vld [vmem:[%s16712_s2 + $0x1f30] sm:$0xff] }
 0x1e3   :  { %6904 = vmatprep.subr.bf16.mxu0 %v11246_v37  ;;  %6986 = vmatprep.subr.bf16.mxu1 %v11248_v38  ;;  %v1043_v34 = vld [vmem:[%s16712_s2 + $0x1fb0] sm:$0xff]  ;;  %v1028_v37 = vld [vmem:[%s16712_s2 + $0x1f38] sm:$0xff] }
 0x1e4   :  { %v1044_v38 = vld [vmem:[%s16712_s2 + $0x1fb8] sm:$0xff]  ;;  %v11470_v42 = vcombine.high %v1027_v33, %v1043_v34  ;;  %v11469_v48 = vcombine.low %v1027_v33, %v1043_v34 }
 0x1e5   :  { %v11472_v43 = vcombine.high %v1028_v37, %v1044_v38  ;;  %v11471_v49 = vcombine.low %v1028_v37, %v1044_v38 }
 0x1e6   :  { %6905 = vmatpush1.bf16.msra.mxu0 %v11245_v44  ;;  %6987 = vmatpush1.bf16.msra.mxu1 %v11247_v45  ;;  %v37_v44 = vld [vmem:[%s16712_s2 + $0x40] sm:$0xff] }
 0x1e7   :  { %6906 = vmatprep.subr.bf16.mxu0 %v11278_v46  ;;  %6988 = vmatprep.subr.bf16.mxu1 %v11280_v47  ;;  %v53_v45 = vld [vmem:[%s16712_s2 + $0xc0] sm:$0xff]  ;;  %v38_v46 = vld [vmem:[%s16712_s2 + $0x48] sm:$0xff] }
 0x1e8   :  { %v54_v47 = vld [vmem:[%s16712_s2 + $0xc8] sm:$0xff]  ;;  %v10482_v50 = vcombine.high %v37_v44, %v53_v45  ;;  %v10481_v58 = vcombine.low %v37_v44, %v53_v45 }
 0x1e9   :  { %v10484_v51 = vcombine.high %v38_v46, %v54_v47  ;;  %v10483_v59 = vcombine.low %v38_v46, %v54_v47 }
 0x1ea   :  { %6907 = vmatpush1.bf16.msra.mxu0 %v11277_v52  ;;  %6989 = vmatpush1.bf16.msra.mxu1 %v11279_v54  ;;  %v69_v52 = vld [vmem:[%s16712_s2 + $0x140] sm:$0xff] }
 0x1eb   :  { %6908 = vmatprep.subr.bf16.mxu0 %v11310_v55  ;;  %6990 = vmatprep.subr.bf16.mxu1 %v11312_v56  ;;  %v85_v54 = vld [vmem:[%s16712_s2 + $0x1c0] sm:$0xff]  ;;  %v70_v55 = vld [vmem:[%s16712_s2 + $0x148] sm:$0xff] }
 0x1ec   :  { %v86_v56 = vld [vmem:[%s16712_s2 + $0x1c8] sm:$0xff]  ;;  %v10514_v60 = vcombine.high %v69_v52, %v85_v54  ;;  %v10513_v2 = vcombine.low %v69_v52, %v85_v54 }
 0x1ed   :  { %v10516_v61 = vcombine.high %v70_v55, %v86_v56  ;;  %v10515_v3 = vcombine.low %v70_v55, %v86_v56 }
 0x1ee   :  { %6909 = vmatpush1.bf16.msra.mxu0 %v11309_v62  ;;  %6991 = vmatpush1.bf16.msra.mxu1 %v11311_v63  ;;  %v101_v62 = vld [vmem:[%s16712_s2 + $0x240] sm:$0xff] }
 0x1ef   :  { %6910 = vmatprep.subr.bf16.mxu0 %v11342_v0  ;;  %6992 = vmatprep.subr.bf16.mxu1 %v11344_v1  ;;  %v117_v63 = vld [vmem:[%s16712_s2 + $0x2c0] sm:$0xff]  ;;  %v102_v0 = vld [vmem:[%s16712_s2 + $0x248] sm:$0xff] }
 0x1f0   :  { %v118_v1 = vld [vmem:[%s16712_s2 + $0x2c8] sm:$0xff]  ;;  %v10546_v4 = vcombine.high %v101_v62, %v117_v63  ;;  %v10545_v11 = vcombine.low %v101_v62, %v117_v63 }
 0x1f1   :  { %v10548_v5 = vcombine.high %v102_v0, %v118_v1  ;;  %v10547_v13 = vcombine.low %v102_v0, %v118_v1 }
 0x1f2   :  { %6911 = vmatpush1.bf16.msra.mxu0 %v11341_v6  ;;  %6993 = vmatpush1.bf16.msra.mxu1 %v11343_v7  ;;  %v133_v6 = vld [vmem:[%s16712_s2 + $0x340] sm:$0xff] }
 0x1f3   :  { %6912 = vmatprep.subr.bf16.mxu0 %v11374_v8  ;;  %6994 = vmatprep.subr.bf16.mxu1 %v11376_v10  ;;  %v149_v7 = vld [vmem:[%s16712_s2 + $0x3c0] sm:$0xff]  ;;  %v134_v8 = vld [vmem:[%s16712_s2 + $0x348] sm:$0xff] }
 0x1f4   :  { %v150_v10 = vld [vmem:[%s16712_s2 + $0x3c8] sm:$0xff]  ;;  %v10578_v17 = vcombine.high %v133_v6, %v149_v7  ;;  %v10577_v25 = vcombine.low %v133_v6, %v149_v7 }
 0x1f5   :  { %v10580_v53 = vcombine.high %v134_v8, %v150_v10  ;;  %v10579_v26 = vcombine.low %v134_v8, %v150_v10 }
 0x1f6   :  { %6913 = vmatpush1.bf16.msra.mxu0 %v11373_v19  ;;  %6995 = vmatpush1.bf16.msra.mxu1 %v11375_v20  ;;  %v165_v19 = vld [vmem:[%s16712_s2 + $0x440] sm:$0xff] }
 0x1f7   :  { %6914 = vmatprep.subr.bf16.mxu0 %v11406_v21  ;;  %6996 = vmatprep.subr.bf16.mxu1 %v11408_v22  ;;  %v181_v20 = vld [vmem:[%s16712_s2 + $0x4c0] sm:$0xff]  ;;  %v166_v21 = vld [vmem:[%s16712_s2 + $0x448] sm:$0xff] }
 0x1f8   :  { %v182_v22 = vld [vmem:[%s16712_s2 + $0x4c8] sm:$0xff]  ;;  %v10610_v27 = vcombine.high %v165_v19, %v181_v20  ;;  %v10609_v33 = vcombine.low %v165_v19, %v181_v20 }
 0x1f9   :  { %v10612_v28 = vcombine.high %v166_v21, %v182_v22  ;;  %v10611_v34 = vcombine.low %v166_v21, %v182_v22 }
 0x1fa   :  { %6915 = vmatpush1.bf16.msra.mxu0 %v11405_v29  ;;  %6997 = vmatpush1.bf16.msra.mxu1 %v11407_v30  ;;  %v197_v29 = vld [vmem:[%s16712_s2 + $0x540] sm:$0xff] }
 0x1fb   :  { %6916 = vmatprep.subr.bf16.mxu0 %v11438_v15  ;;  %6998 = vmatprep.subr.bf16.mxu1 %v11440_v32  ;;  %v213_v30 = vld [vmem:[%s16712_s2 + $0x5c0] sm:$0xff]  ;;  %v198_v15 = vld [vmem:[%s16712_s2 + $0x548] sm:$0xff] }
 0x1fc   :  { %v214_v32 = vld [vmem:[%s16712_s2 + $0x5c8] sm:$0xff]  ;;  %v10642_v37 = vcombine.high %v197_v29, %v213_v30  ;;  %v10641_v44 = vcombine.low %v197_v29, %v213_v30 }
 0x1fd   :  { %v10644_v38 = vcombine.high %v198_v15, %v214_v32  ;;  %v10643_v45 = vcombine.low %v198_v15, %v214_v32 }
 0x1fe   :  { %6917 = vmatpush1.bf16.msra.mxu0 %v11437_v40  ;;  %6999 = vmatpush1.bf16.msra.mxu1 %v11439_v41  ;;  %v229_v40 = vld [vmem:[%s16712_s2 + $0x640] sm:$0xff] }
 0x1ff   :  { %6918 = vmatprep.subr.bf16.mxu0 %v11470_v42  ;;  %7000 = vmatprep.subr.bf16.mxu1 %v11472_v43  ;;  %v245_v41 = vld [vmem:[%s16712_s2 + $0x6c0] sm:$0xff]  ;;  %v230_v42 = vld [vmem:[%s16712_s2 + $0x648] sm:$0xff] }
 0x200   :  { %v246_v43 = vld [vmem:[%s16712_s2 + $0x6c8] sm:$0xff]  ;;  %v10674_v46 = vcombine.high %v229_v40, %v245_v41  ;;  %v10673_v52 = vcombine.low %v229_v40, %v245_v41 }
 0x201   :  { %v10676_v47 = vcombine.high %v230_v42, %v246_v43  ;;  %v10675_v54 = vcombine.low %v230_v42, %v246_v43 }
 0x202   :  { %6919 = vmatpush1.bf16.msra.mxu0 %v11469_v48  ;;  %7001 = vmatpush1.bf16.msra.mxu1 %v11471_v49  ;;  %v261_v48 = vld [vmem:[%s16712_s2 + $0x740] sm:$0xff] }
 0x203   :  { %7011 = vmatprep.subr.bf16.mxu0 %v10482_v50  ;;  %7093 = vmatprep.subr.bf16.mxu1 %v10484_v51  ;;  %v277_v49 = vld [vmem:[%s16712_s2 + $0x7c0] sm:$0xff]  ;;  %v262_v50 = vld [vmem:[%s16712_s2 + $0x748] sm:$0xff] }
 0x204   :  { %v278_v51 = vld [vmem:[%s16712_s2 + $0x7c8] sm:$0xff]  ;;  %v10706_v55 = vcombine.high %v261_v48, %v277_v49  ;;  %v10705_v62 = vcombine.low %v261_v48, %v277_v49 }
 0x205   :  { %6921 = vmatmul.mubr.bf16.vlgmr.msra.gmra.mrb[12].mxu0 %v12986_v24  ;;  %7003 = vmatmul.mubr.bf16.vlgmr.msra.gmra.mrb[12].mxu1 %v12986_v24  ;;  %v10708_v56 = vcombine.high %v262_v50, %v278_v51  ;;  %v10707_v63 = vcombine.low %v262_v50, %v278_v51 }
 0x206   :  { %7012 = vmatpush1.bf16.msra.mxu0 %v10481_v58  ;;  %7094 = vmatpush1.bf16.msra.mxu1 %v10483_v59  ;;  %v293_v58 = vld [vmem:[%s16712_s2 + $0x840] sm:$0xff] }
 0x207   :  { %7013 = vmatprep.subr.bf16.mxu0 %v10514_v60  ;;  %7095 = vmatprep.subr.bf16.mxu1 %v10516_v61  ;;  %v309_v59 = vld [vmem:[%s16712_s2 + $0x8c0] sm:$0xff]  ;;  %v294_v60 = vld [vmem:[%s16712_s2 + $0x848] sm:$0xff] }
 0x208   :  { %7043 = vmatprep.mubr.bf16.mxu0 %v12645_v57  ;;  %7125 = vmatprep.mubr.bf16.mxu1 %v12645_v57  ;;  %v310_v61 = vld [vmem:[%s16712_s2 + $0x8c8] sm:$0xff]  ;;  %v10738_v0 = vcombine.high %v293_v58, %v309_v59  ;;  %v10737_v6 = vcombine.low %v293_v58, %v309_v59 }
 0x209   :  { %v10740_v1 = vcombine.high %v294_v60, %v310_v61  ;;  %v10739_v7 = vcombine.low %v294_v60, %v310_v61 }
 0x20a   :  { %7014 = vmatpush1.bf16.msra.mxu0 %v10513_v2  ;;  %7096 = vmatpush1.bf16.msra.mxu1 %v10515_v3  ;;  %v325_v2 = vld [vmem:[%s16712_s2 + $0x940] sm:$0xff] }
 0x20b   :  { %7015 = vmatprep.subr.bf16.mxu0 %v10546_v4  ;;  %7097 = vmatprep.subr.bf16.mxu1 %v10548_v5  ;;  %v341_v3 = vld [vmem:[%s16712_s2 + $0x9c0] sm:$0xff]  ;;  %v326_v4 = vld [vmem:[%s16712_s2 + $0x948] sm:$0xff] }
 0x20c   :  { %v342_v5 = vld [vmem:[%s16712_s2 + $0x9c8] sm:$0xff]  ;;  %v10770_v8 = vcombine.high %v325_v2, %v341_v3  ;;  %v10769_v19 = vcombine.low %v325_v2, %v341_v3 }
 0x20d   :  { %v10772_v10 = vcombine.high %v326_v4, %v342_v5  ;;  %v10771_v20 = vcombine.low %v326_v4, %v342_v5 }
 0x20e   :  { %7016 = vmatpush1.bf16.msra.mxu0 %v10545_v11  ;;  %7098 = vmatpush1.bf16.msra.mxu1 %v10547_v13  ;;  %v357_v11 = vld [vmem:[%s16712_s2 + $0xa40] sm:$0xff] }
 0x20f   :  { %7017 = vmatprep.subr.bf16.mxu0 %v10578_v17  ;;  %7099 = vmatprep.subr.bf16.mxu1 %v10580_v53  ;;  %v373_v13 = vld [vmem:[%s16712_s2 + $0xac0] sm:$0xff]  ;;  %v358_v17 = vld [vmem:[%s16712_s2 + $0xa48] sm:$0xff] }
 0x210   :  { %v374_v53 = vld [vmem:[%s16712_s2 + $0xac8] sm:$0xff]  ;;  %v10802_v21 = vcombine.high %v357_v11, %v373_v13  ;;  %v10801_v29 = vcombine.low %v357_v11, %v373_v13 }
 0x211   :  { %v10804_v22 = vcombine.high %v358_v17, %v374_v53  ;;  %v10803_v30 = vcombine.low %v358_v17, %v374_v53 }
 0x212   :  { %7018 = vmatpush1.bf16.msra.mxu0 %v10577_v25  ;;  %7100 = vmatpush1.bf16.msra.mxu1 %v10579_v26  ;;  %v389_v25 = vld [vmem:[%s16712_s2 + $0xb40] sm:$0xff] }
 0x213   :  { %7019 = vmatprep.subr.bf16.mxu0 %v10610_v27  ;;  %7101 = vmatprep.subr.bf16.mxu1 %v10612_v28  ;;  %v405_v26 = vld [vmem:[%s16712_s2 + $0xbc0] sm:$0xff]  ;;  %v390_v27 = vld [vmem:[%s16712_s2 + $0xb48] sm:$0xff] }
 0x214   :  { %v406_v28 = vld [vmem:[%s16712_s2 + $0xbc8] sm:$0xff]  ;;  %v10834_v15 = vcombine.high %v389_v25, %v405_v26  ;;  %v10833_v40 = vcombine.low %v389_v25, %v405_v26 }
 0x215   :  { %v10836_v32 = vcombine.high %v390_v27, %v406_v28  ;;  %v10835_v41 = vcombine.low %v390_v27, %v406_v28 }
 0x216   :  { %7020 = vmatpush1.bf16.msra.mxu0 %v10609_v33  ;;  %7102 = vmatpush1.bf16.msra.mxu1 %v10611_v34  ;;  %v421_v33 = vld [vmem:[%s16712_s2 + $0xc40] sm:$0xff] }
 0x217   :  { %7021 = vmatprep.subr.bf16.mxu0 %v10642_v37  ;;  %7103 = vmatprep.subr.bf16.mxu1 %v10644_v38  ;;  %v437_v34 = vld [vmem:[%s16712_s2 + $0xcc0] sm:$0xff]  ;;  %v422_v37 = vld [vmem:[%s16712_s2 + $0xc48] sm:$0xff] }
 0x218   :  { %v438_v38 = vld [vmem:[%s16712_s2 + $0xcc8] sm:$0xff]  ;;  %v10866_v42 = vcombine.high %v421_v33, %v437_v34  ;;  %v10865_v48 = vcombine.low %v421_v33, %v437_v34 }
 0x219   :  { %v10868_v43 = vcombine.high %v422_v37, %v438_v38  ;;  %v10867_v49 = vcombine.low %v422_v37, %v438_v38 }
 0x21a   :  { %7022 = vmatpush1.bf16.msra.mxu0 %v10641_v44  ;;  %7104 = vmatpush1.bf16.msra.mxu1 %v10643_v45  ;;  %v453_v44 = vld [vmem:[%s16712_s2 + $0xd40] sm:$0xff] }
 0x21b   :  { %7023 = vmatprep.subr.bf16.mxu0 %v10674_v46  ;;  %7105 = vmatprep.subr.bf16.mxu1 %v10676_v47  ;;  %v469_v45 = vld [vmem:[%s16712_s2 + $0xdc0] sm:$0xff]  ;;  %v454_v46 = vld [vmem:[%s16712_s2 + $0xd48] sm:$0xff] }
 0x21c   :  { %v470_v47 = vld [vmem:[%s16712_s2 + $0xdc8] sm:$0xff]  ;;  %v10898_v50 = vcombine.high %v453_v44, %v469_v45  ;;  %v10897_v58 = vcombine.low %v453_v44, %v469_v45 }
 0x21d   :  { %v10900_v51 = vcombine.high %v454_v46, %v470_v47  ;;  %v10899_v59 = vcombine.low %v454_v46, %v470_v47 }
 0x21e   :  { %7024 = vmatpush1.bf16.msra.mxu0 %v10673_v52  ;;  %7106 = vmatpush1.bf16.msra.mxu1 %v10675_v54  ;;  %v485_v52 = vld [vmem:[%s16712_s2 + $0xe40] sm:$0xff] }
 0x21f   :  { %7025 = vmatprep.subr.bf16.mxu0 %v10706_v55  ;;  %7107 = vmatprep.subr.bf16.mxu1 %v10708_v56  ;;  %v501_v54 = vld [vmem:[%s16712_s2 + $0xec0] sm:$0xff]  ;;  %v486_v55 = vld [vmem:[%s16712_s2 + $0xe48] sm:$0xff] }
 0x220   :  { %v502_v56 = vld [vmem:[%s16712_s2 + $0xec8] sm:$0xff]  ;;  %v10930_v60 = vcombine.high %v485_v52, %v501_v54  ;;  %v10929_v2 = vcombine.low %v485_v52, %v501_v54 }
 0x221   :  { %v10932_v61 = vcombine.high %v486_v55, %v502_v56  ;;  %v10931_v3 = vcombine.low %v486_v55, %v502_v56 }
 0x222   :  { %7026 = vmatpush1.bf16.msra.mxu0 %v10705_v62  ;;  %7108 = vmatpush1.bf16.msra.mxu1 %v10707_v63  ;;  %v517_v62 = vld [vmem:[%s16712_s2 + $0xf40] sm:$0xff] }
 0x223   :  { %7027 = vmatprep.subr.bf16.mxu0 %v10738_v0  ;;  %7109 = vmatprep.subr.bf16.mxu1 %v10740_v1  ;;  %v533_v63 = vld [vmem:[%s16712_s2 + $0xfc0] sm:$0xff]  ;;  %v518_v0 = vld [vmem:[%s16712_s2 + $0xf48] sm:$0xff] }
 0x224   :  { %v534_v1 = vld [vmem:[%s16712_s2 + $0xfc8] sm:$0xff]  ;;  %v10962_v4 = vcombine.high %v517_v62, %v533_v63  ;;  %v10961_v11 = vcombine.low %v517_v62, %v533_v63 }
 0x225   :  { %v10964_v5 = vcombine.high %v518_v0, %v534_v1  ;;  %v10963_v13 = vcombine.low %v518_v0, %v534_v1 }
 0x226   :  { %7028 = vmatpush1.bf16.msra.mxu0 %v10737_v6  ;;  %7110 = vmatpush1.bf16.msra.mxu1 %v10739_v7  ;;  %v549_v6 = vld [vmem:[%s16712_s2 + $0x1040] sm:$0xff] }
 0x227   :  { %7029 = vmatprep.subr.bf16.mxu0 %v10770_v8  ;;  %7111 = vmatprep.subr.bf16.mxu1 %v10772_v10  ;;  %v565_v7 = vld [vmem:[%s16712_s2 + $0x10c0] sm:$0xff]  ;;  %v550_v8 = vld [vmem:[%s16712_s2 + $0x1048] sm:$0xff] }
 0x228   :  { %v566_v10 = vld [vmem:[%s16712_s2 + $0x10c8] sm:$0xff]  ;;  %v10994_v17 = vcombine.high %v549_v6, %v565_v7  ;;  %v10993_v25 = vcombine.low %v549_v6, %v565_v7 }
 0x229   :  { %v10996_v53 = vcombine.high %v550_v8, %v566_v10  ;;  %v10995_v26 = vcombine.low %v550_v8, %v566_v10 }
 0x22a   :  { %7030 = vmatpush1.bf16.msra.mxu0 %v10769_v19  ;;  %7112 = vmatpush1.bf16.msra.mxu1 %v10771_v20  ;;  %v581_v19 = vld [vmem:[%s16712_s2 + $0x1140] sm:$0xff] }
 0x22b   :  { %7031 = vmatprep.subr.bf16.mxu0 %v10802_v21  ;;  %7113 = vmatprep.subr.bf16.mxu1 %v10804_v22  ;;  %v597_v20 = vld [vmem:[%s16712_s2 + $0x11c0] sm:$0xff]  ;;  %v582_v21 = vld [vmem:[%s16712_s2 + $0x1148] sm:$0xff] }
 0x22c   :  { %v598_v22 = vld [vmem:[%s16712_s2 + $0x11c8] sm:$0xff]  ;;  %v11026_v27 = vcombine.high %v581_v19, %v597_v20  ;;  %v11025_v33 = vcombine.low %v581_v19, %v597_v20 }
 0x22d   :  { %v11028_v28 = vcombine.high %v582_v21, %v598_v22  ;;  %v11027_v34 = vcombine.low %v582_v21, %v598_v22  ;;  %v774_v20 = vld [vmem:[%s16712_s2 + $0x1748] sm:$0xff] }
 0x22e   :  { %7032 = vmatpush1.bf16.msra.mxu0 %v10801_v29  ;;  %7114 = vmatpush1.bf16.msra.mxu1 %v10803_v30  ;;  %v613_v29 = vld [vmem:[%s16712_s2 + $0x1240] sm:$0xff]  ;;  %v790_v21 = vld [vmem:[%s16712_s2 + $0x17c8] sm:$0xff] }
 0x22f   :  { %7033 = vmatprep.subr.bf16.mxu0 %v10834_v15  ;;  %7115 = vmatprep.subr.bf16.mxu1 %v10836_v32  ;;  %v629_v30 = vld [vmem:[%s16712_s2 + $0x12c0] sm:$0xff]  ;;  %v614_v15 = vld [vmem:[%s16712_s2 + $0x1248] sm:$0xff] }
 0x230   :  { %v630_v32 = vld [vmem:[%s16712_s2 + $0x12c8] sm:$0xff]  ;;  %v11058_v37 = vcombine.high %v613_v29, %v629_v30  ;;  %v11057_v44 = vcombine.low %v613_v29, %v629_v30 }
 0x231   :  { %v11060_v38 = vcombine.high %v614_v15, %v630_v32  ;;  %v11059_v45 = vcombine.low %v614_v15, %v630_v32  ;;  %v11220_v32 = vcombine.high %v774_v20, %v790_v21 }
 0x232   :  { %7034 = vmatpush1.bf16.msra.mxu0 %v10833_v40  ;;  %7116 = vmatpush1.bf16.msra.mxu1 %v10835_v41  ;;  %v645_v40 = vld [vmem:[%s16712_s2 + $0x1340] sm:$0xff] }
 0x233   :  { %7035 = vmatprep.subr.bf16.mxu0 %v10866_v42  ;;  %7117 = vmatprep.subr.bf16.mxu1 %v10868_v43  ;;  %v661_v41 = vld [vmem:[%s16712_s2 + $0x13c0] sm:$0xff]  ;;  %v646_v42 = vld [vmem:[%s16712_s2 + $0x1348] sm:$0xff] }
 0x234   :  { %v662_v43 = vld [vmem:[%s16712_s2 + $0x13c8] sm:$0xff]  ;;  %v11090_v46 = vcombine.high %v645_v40, %v661_v41  ;;  %v11089_v52 = vcombine.low %v645_v40, %v661_v41  ;;  %v11219_v41 = vcombine.low %v774_v20, %v790_v21 }
 0x235   :  { %v11092_v47 = vcombine.high %v646_v42, %v662_v43  ;;  %v11091_v54 = vcombine.low %v646_v42, %v662_v43 }
 0x236   :  { %7036 = vmatpush1.bf16.msra.mxu0 %v10865_v48  ;;  %7118 = vmatpush1.bf16.msra.mxu1 %v10867_v49  ;;  %v677_v48 = vld [vmem:[%s16712_s2 + $0x1440] sm:$0xff] }
 0x237   :  { %7037 = vmatprep.subr.bf16.mxu0 %v10898_v50  ;;  %7119 = vmatprep.subr.bf16.mxu1 %v10900_v51  ;;  %v693_v49 = vld [vmem:[%s16712_s2 + $0x14c0] sm:$0xff]  ;;  %v678_v50 = vld [vmem:[%s16712_s2 + $0x1448] sm:$0xff] }
 0x238   :  { %v694_v51 = vld [vmem:[%s16712_s2 + $0x14c8] sm:$0xff]  ;;  %v11122_v55 = vcombine.high %v677_v48, %v693_v49  ;;  %v11121_v62 = vcombine.low %v677_v48, %v693_v49 }
 0x239   :  { %v11124_v56 = vcombine.high %v678_v50, %v694_v51  ;;  %v11123_v63 = vcombine.low %v678_v50, %v694_v51 }
 0x23a   :  { %7038 = vmatpush1.bf16.msra.mxu0 %v10897_v58  ;;  %7120 = vmatpush1.bf16.msra.mxu1 %v10899_v59  ;;  %v709_v58 = vld [vmem:[%s16712_s2 + $0x1540] sm:$0xff] }
 0x23b   :  { %7039 = vmatprep.subr.bf16.mxu0 %v10930_v60  ;;  %7121 = vmatprep.subr.bf16.mxu1 %v10932_v61  ;;  %v725_v59 = vld [vmem:[%s16712_s2 + $0x15c0] sm:$0xff]  ;;  %v710_v60 = vld [vmem:[%s16712_s2 + $0x1548] sm:$0xff] }
 0x23c   :  { %v726_v61 = vld [vmem:[%s16712_s2 + $0x15c8] sm:$0xff]  ;;  %v11154_v0 = vcombine.high %v709_v58, %v725_v59  ;;  %v11153_v6 = vcombine.low %v709_v58, %v725_v59 }
 0x23d   :  { %v11156_v1 = vcombine.high %v710_v60, %v726_v61  ;;  %v11155_v7 = vcombine.low %v710_v60, %v726_v61 }
 0x23e   :  { %7040 = vmatpush1.bf16.msra.mxu0 %v10929_v2  ;;  %7122 = vmatpush1.bf16.msra.mxu1 %v10931_v3  ;;  %v741_v2 = vld [vmem:[%s16712_s2 + $0x1640] sm:$0xff] }
 0x23f   :  { %7041 = vmatprep.subr.bf16.mxu0 %v10962_v4  ;;  %7123 = vmatprep.subr.bf16.mxu1 %v10964_v5  ;;  %v757_v3 = vld [vmem:[%s16712_s2 + $0x16c0] sm:$0xff]  ;;  %v742_v4 = vld [vmem:[%s16712_s2 + $0x1648] sm:$0xff] }
 0x240   :  { %v758_v5 = vld [vmem:[%s16712_s2 + $0x16c8] sm:$0xff]  ;;  %v11186_v8 = vcombine.high %v741_v2, %v757_v3 }
 0x241   :  { %v11187_v29 = vcombine.low %v742_v4, %v758_v5 }
 0x242   :  { %7042 = vmatpush1.bf16.msra.mxu0 %v10961_v11  ;;  %7124 = vmatpush1.bf16.msra.mxu1 %v10963_v13  ;;  %v11188_v11 = vcombine.high %v742_v4, %v758_v5  ;;  %v773_v13 = vld [vmem:[%s16712_s2 + $0x1740] sm:$0xff] }
 0x243   :  { %7052 = vmatprep.subr.bf16.mxu0 %v10994_v17  ;;  %7134 = vmatprep.subr.bf16.mxu1 %v10996_v53  ;;  %v789_v17 = vld [vmem:[%s16712_s2 + $0x17c0] sm:$0xff] }
 0x244   :  { %v11218_v30 = vcombine.high %v773_v13, %v789_v17  ;;  %v11217_v40 = vcombine.low %v773_v13, %v789_v17 }
 0x245   :  { %7044 = vmatmul.mubr.bf16.vlgmr.msra.gmra.mrb[16].mxu0 %v12771_v12  ;;  %7126 = vmatmul.mubr.bf16.vlgmr.msra.gmra.mrb[16].mxu1 %v12771_v12 }
 0x246   :  { %7053 = vmatpush1.bf16.msra.mxu0 %v10993_v25  ;;  %7135 = vmatpush1.bf16.msra.mxu1 %v10995_v26  ;;  %v11185_v26 = vcombine.low %v741_v2, %v757_v3 }
 0x247   :  { %7054 = vmatprep.subr.bf16.mxu0 %v11026_v27  ;;  %7136 = vmatprep.subr.bf16.mxu1 %v11028_v28 }
 0x248   :  { %7084 = vmatprep.mubr.bf16.mxu0 %v12798_v23  ;;  %7166 = vmatprep.mubr.bf16.mxu1 %v12798_v23 }
 0x24a   :  { %7055 = vmatpush1.bf16.msra.mxu0 %v11025_v33  ;;  %7137 = vmatpush1.bf16.msra.mxu1 %v11027_v34  ;;  %v805_v33 = vld [vmem:[%s16712_s2 + $0x1840] sm:$0xff] }
 0x24b   :  { %7056 = vmatprep.subr.bf16.mxu0 %v11058_v37  ;;  %7138 = vmatprep.subr.bf16.mxu1 %v11060_v38  ;;  %v821_v34 = vld [vmem:[%s16712_s2 + $0x18c0] sm:$0xff]  ;;  %v806_v37 = vld [vmem:[%s16712_s2 + $0x1848] sm:$0xff] }
 0x24c   :  { %v822_v38 = vld [vmem:[%s16712_s2 + $0x18c8] sm:$0xff]  ;;  %v11250_v42 = vcombine.high %v805_v33, %v821_v34  ;;  %v11249_v48 = vcombine.low %v805_v33, %v821_v34  ;;  %v997_v33 = vld [vmem:[%s16712_s2 + $0x1e40] sm:$0xff] }
 0x24d   :  { %v11252_v43 = vcombine.high %v806_v37, %v822_v38  ;;  %v11251_v49 = vcombine.low %v806_v37, %v822_v38  ;;  %v1013_v34 = vld [vmem:[%s16712_s2 + $0x1ec0] sm:$0xff]  ;;  %v998_v37 = vld [vmem:[%s16712_s2 + $0x1e48] sm:$0xff] }
 0x24e   :  { %7057 = vmatpush1.bf16.msra.mxu0 %v11057_v44  ;;  %7139 = vmatpush1.bf16.msra.mxu1 %v11059_v45  ;;  %v837_v44 = vld [vmem:[%s16712_s2 + $0x1940] sm:$0xff]  ;;  %v1014_v38 = vld [vmem:[%s16712_s2 + $0x1ec8] sm:$0xff] }
 0x24f   :  { %7058 = vmatprep.subr.bf16.mxu0 %v11090_v46  ;;  %7140 = vmatprep.subr.bf16.mxu1 %v11092_v47  ;;  %v853_v45 = vld [vmem:[%s16712_s2 + $0x19c0] sm:$0xff]  ;;  %v838_v46 = vld [vmem:[%s16712_s2 + $0x1948] sm:$0xff] }
 0x250   :  { %v854_v47 = vld [vmem:[%s16712_s2 + $0x19c8] sm:$0xff]  ;;  %v11282_v50 = vcombine.high %v837_v44, %v853_v45  ;;  %v11281_v58 = vcombine.low %v837_v44, %v853_v45  ;;  %v1029_v44 = vld [vmem:[%s16712_s2 + $0x1f40] sm:$0xff] }
 0x251   :  { %v11284_v51 = vcombine.high %v838_v46, %v854_v47  ;;  %v11283_v59 = vcombine.low %v838_v46, %v854_v47  ;;  %v1045_v45 = vld [vmem:[%s16712_s2 + $0x1fc0] sm:$0xff]  ;;  %v1030_v46 = vld [vmem:[%s16712_s2 + $0x1f48] sm:$0xff] }
 0x252   :  { %7059 = vmatpush1.bf16.msra.mxu0 %v11089_v52  ;;  %7141 = vmatpush1.bf16.msra.mxu1 %v11091_v54  ;;  %v869_v52 = vld [vmem:[%s16712_s2 + $0x1a40] sm:$0xff]  ;;  %v1046_v47 = vld [vmem:[%s16712_s2 + $0x1fc8] sm:$0xff] }
 0x253   :  { %7060 = vmatprep.subr.bf16.mxu0 %v11122_v55  ;;  %7142 = vmatprep.subr.bf16.mxu1 %v11124_v56  ;;  %v885_v54 = vld [vmem:[%s16712_s2 + $0x1ac0] sm:$0xff]  ;;  %v870_v55 = vld [vmem:[%s16712_s2 + $0x1a48] sm:$0xff] }
 0x254   :  { %v886_v56 = vld [vmem:[%s16712_s2 + $0x1ac8] sm:$0xff]  ;;  %v11314_v60 = vcombine.high %v869_v52, %v885_v54  ;;  %v11313_v2 = vcombine.low %v869_v52, %v885_v54  ;;  %v39_v52 = vld [vmem:[%s16712_s2 + $0x50] sm:$0xff] }
 0x255   :  { %v11316_v61 = vcombine.high %v870_v55, %v886_v56  ;;  %v11315_v3 = vcombine.low %v870_v55, %v886_v56  ;;  %v55_v54 = vld [vmem:[%s16712_s2 + $0xd0] sm:$0xff]  ;;  %v40_v55 = vld [vmem:[%s16712_s2 + $0x58] sm:$0xff] }
 0x256   :  { %7061 = vmatpush1.bf16.msra.mxu0 %v11121_v62  ;;  %7143 = vmatpush1.bf16.msra.mxu1 %v11123_v63  ;;  %v901_v62 = vld [vmem:[%s16712_s2 + $0x1b40] sm:$0xff]  ;;  %v56_v56 = vld [vmem:[%s16712_s2 + $0xd8] sm:$0xff] }
 0x257   :  { %7062 = vmatprep.subr.bf16.mxu0 %v11154_v0  ;;  %7144 = vmatprep.subr.bf16.mxu1 %v11156_v1  ;;  %v917_v63 = vld [vmem:[%s16712_s2 + $0x1bc0] sm:$0xff]  ;;  %v902_v0 = vld [vmem:[%s16712_s2 + $0x1b48] sm:$0xff] }
 0x258   :  { %v14440_v10 = vpop.f32.mrb[8].mxu0  ;;  %v14448_v53 = vpop.f32.mrb[8].mxu1  ;;  %v918_v1 = vld [vmem:[%s16712_s2 + $0x1bc8] sm:$0xff]  ;;  %v11346_v4 = vcombine.high %v901_v62, %v917_v63  ;;  %v11345_v13 = vcombine.low %v901_v62, %v917_v63  ;;  %v71_v62 = vld [vmem:[%s16712_s2 + $0x150] sm:$0xff] }
 0x259   :  { %v14450_v19 = vpop.f32.mrb[9].mxu0  ;;  %v14458_v22 = vpop.f32.mrb[9].mxu1  ;;  %v11348_v5 = vcombine.high %v902_v0, %v918_v1  ;;  %v11347_v17 = vcombine.low %v902_v0, %v918_v1  ;;  %v87_v63 = vld [vmem:[%s16712_s2 + $0x1d0] sm:$0xff]  ;;  %v72_v0 = vld [vmem:[%s16712_s2 + $0x158] sm:$0xff] }
 0x25a   :  { %v6762_v25 = vpop.f32.mrb[10].mxu0  ;;  %7063 = vmatpush1.bf16.msra.mxu0 %v11153_v6  ;;  %v6844_v27 = vpop.f32.mrb[10].mxu1  ;;  %7145 = vmatpush1.bf16.msra.mxu1 %v11155_v7  ;;  %v933_v6 = vld [vmem:[%s16712_s2 + $0x1c40] sm:$0xff]  ;;  %v88_v1 = vld [vmem:[%s16712_s2 + $0x1d8] sm:$0xff] }
 0x25b   :  { %v6763_v28 = vpop.f32.mrb[11].mxu0  ;;  %7064 = vmatprep.subr.bf16.mxu0 %v11186_v8  ;;  %v6845_v15 = vpop.f32.mrb[11].mxu1  ;;  %7146 = vmatprep.subr.bf16.mxu1 %v11188_v11  ;;  %v949_v7 = vld [vmem:[%s16712_s2 + $0x1cc0] sm:$0xff]  ;;  %v934_v8 = vld [vmem:[%s16712_s2 + $0x1c48] sm:$0xff] }
 0x25c   :  { %v950_v11 = vld [vmem:[%s16712_s2 + $0x1cc8] sm:$0xff]  ;;  %v11378_v20 = vcombine.high %v933_v6, %v949_v7  ;;  %v965_v25 = vld [vmem:[%s16712_s2 + $0x1d40] sm:$0xff] }
 0x25d   :  { %v11380_v21 = vcombine.high %v934_v8, %v950_v11  ;;  %v966_v27 = vld [vmem:[%s16712_s2 + $0x1d48] sm:$0xff] }
 0x25e   :  { %7065 = vmatpush1.bf16.msra.mxu0 %v11185_v26  ;;  %7147 = vmatpush1.bf16.msra.mxu1 %v11187_v29  ;;  %v981_v26 = vld [vmem:[%s16712_s2 + $0x1dc0] sm:$0xff]  ;;  %v982_v28 = vld [vmem:[%s16712_s2 + $0x1dc8] sm:$0xff]  ;;  %v11377_v29 = vcombine.low %v933_v6, %v949_v7  ;;  %v103_v6 = vld [vmem:[%s16712_s2 + $0x250] sm:$0xff] }
 0x25f   :  { %7066 = vmatprep.subr.bf16.mxu0 %v11218_v30  ;;  %7148 = vmatprep.subr.bf16.mxu1 %v11220_v32  ;;  %v11379_v30 = vcombine.low %v934_v8, %v950_v11  ;;  %v11410_v15 = vcombine.high %v965_v25, %v981_v26  ;;  %v11412_v32 = vcombine.high %v966_v27, %v982_v28  ;;  %v119_v7 = vld [vmem:[%s16712_s2 + $0x2d0] sm:$0xff]  ;;  %v104_v8 = vld [vmem:[%s16712_s2 + $0x258] sm:$0xff] }
 0x260   :  { %v120_v11 = vld [vmem:[%s16712_s2 + $0x2d8] sm:$0xff] }
 0x262   :  { %7067 = vmatpush1.bf16.msra.mxu0 %v11217_v40  ;;  %7149 = vmatpush1.bf16.msra.mxu1 %v11219_v41  ;;  %v11409_v40 = vcombine.low %v965_v25, %v981_v26  ;;  %v11411_v41 = vcombine.low %v966_v27, %v982_v28  ;;  %v135_v25 = vld [vmem:[%s16712_s2 + $0x350] sm:$0xff]  ;;  %v136_v27 = vld [vmem:[%s16712_s2 + $0x358] sm:$0xff] }
 0x263   :  { %7068 = vmatprep.subr.bf16.mxu0 %v11250_v42  ;;  %7150 = vmatprep.subr.bf16.mxu1 %v11252_v43  ;;  %v11442_v42 = vcombine.high %v997_v33, %v1013_v34  ;;  %v11444_v43 = vcombine.high %v998_v37, %v1014_v38  ;;  %v151_v26 = vld [vmem:[%s16712_s2 + $0x3d0] sm:$0xff]  ;;  %v152_v28 = vld [vmem:[%s16712_s2 + $0x3d8] sm:$0xff] }
 0x266   :  { %7069 = vmatpush1.bf16.msra.mxu0 %v11249_v48  ;;  %7151 = vmatpush1.bf16.msra.mxu1 %v11251_v49  ;;  %v11441_v48 = vcombine.low %v997_v33, %v1013_v34  ;;  %v11443_v49 = vcombine.low %v998_v37, %v1014_v38  ;;  %v167_v33 = vld [vmem:[%s16712_s2 + $0x450] sm:$0xff]  ;;  %v168_v37 = vld [vmem:[%s16712_s2 + $0x458] sm:$0xff] }
 0x267   :  { %7070 = vmatprep.subr.bf16.mxu0 %v11282_v50  ;;  %7152 = vmatprep.subr.bf16.mxu1 %v11284_v51  ;;  %v11474_v50 = vcombine.high %v1029_v44, %v1045_v45  ;;  %v11476_v51 = vcombine.high %v1030_v46, %v1046_v47  ;;  %v183_v34 = vld [vmem:[%s16712_s2 + $0x4d0] sm:$0xff]  ;;  %v184_v38 = vld [vmem:[%s16712_s2 + $0x4d8] sm:$0xff] }
 0x26a   :  { %7071 = vmatpush1.bf16.msra.mxu0 %v11281_v58  ;;  %7153 = vmatpush1.bf16.msra.mxu1 %v11283_v59  ;;  %v11473_v58 = vcombine.low %v1029_v44, %v1045_v45  ;;  %v11475_v59 = vcombine.low %v1030_v46, %v1046_v47  ;;  %v199_v44 = vld [vmem:[%s16712_s2 + $0x550] sm:$0xff]  ;;  %v200_v46 = vld [vmem:[%s16712_s2 + $0x558] sm:$0xff] }
 0x26b   :  { %7072 = vmatprep.subr.bf16.mxu0 %v11314_v60  ;;  %7154 = vmatprep.subr.bf16.mxu1 %v11316_v61  ;;  %v10486_v60 = vcombine.high %v39_v52, %v55_v54  ;;  %v10488_v61 = vcombine.high %v40_v55, %v56_v56  ;;  %v215_v45 = vld [vmem:[%s16712_s2 + $0x5d0] sm:$0xff]  ;;  %v216_v47 = vld [vmem:[%s16712_s2 + $0x5d8] sm:$0xff] }
 0x26e   :  { %7073 = vmatpush1.bf16.msra.mxu0 %v11313_v2  ;;  %7155 = vmatpush1.bf16.msra.mxu1 %v11315_v3  ;;  %v10485_v2 = vcombine.low %v39_v52, %v55_v54  ;;  %v10487_v3 = vcombine.low %v40_v55, %v56_v56  ;;  %v231_v52 = vld [vmem:[%s16712_s2 + $0x650] sm:$0xff]  ;;  %v232_v55 = vld [vmem:[%s16712_s2 + $0x658] sm:$0xff] }
 0x26f   :  { %7074 = vmatprep.subr.bf16.mxu0 %v11346_v4  ;;  %7156 = vmatprep.subr.bf16.mxu1 %v11348_v5  ;;  %v10518_v4 = vcombine.high %v71_v62, %v87_v63  ;;  %v10520_v5 = vcombine.high %v72_v0, %v88_v1  ;;  %v247_v54 = vld [vmem:[%s16712_s2 + $0x6d0] sm:$0xff]  ;;  %v248_v56 = vld [vmem:[%s16712_s2 + $0x6d8] sm:$0xff] }
 0x272   :  { %7075 = vmatpush1.bf16.msra.mxu0 %v11345_v13  ;;  %7157 = vmatpush1.bf16.msra.mxu1 %v11347_v17  ;;  %v10517_v13 = vcombine.low %v71_v62, %v87_v63  ;;  %v10519_v17 = vcombine.low %v72_v0, %v88_v1  ;;  %v263_v62 = vld [vmem:[%s16712_s2 + $0x750] sm:$0xff]  ;;  %v264_v0 = vld [vmem:[%s16712_s2 + $0x758] sm:$0xff] }
 0x273   :  { %7076 = vmatprep.subr.bf16.mxu0 %v11378_v20  ;;  %7158 = vmatprep.subr.bf16.mxu1 %v11380_v21  ;;  %v10550_v20 = vcombine.high %v103_v6, %v119_v7  ;;  %v10552_v21 = vcombine.high %v104_v8, %v120_v11  ;;  %v279_v63 = vld [vmem:[%s16712_s2 + $0x7d0] sm:$0xff]  ;;  %v280_v1 = vld [vmem:[%s16712_s2 + $0x7d8] sm:$0xff] }
 0x276   :  { %7077 = vmatpush1.bf16.msra.mxu0 %v11377_v29  ;;  %7159 = vmatpush1.bf16.msra.mxu1 %v11379_v30  ;;  %v10549_v29 = vcombine.low %v103_v6, %v119_v7  ;;  %v10551_v30 = vcombine.low %v104_v8, %v120_v11  ;;  %v295_v6 = vld [vmem:[%s16712_s2 + $0x850] sm:$0xff]  ;;  %v296_v8 = vld [vmem:[%s16712_s2 + $0x858] sm:$0xff] }
 0x277   :  { %7078 = vmatprep.subr.bf16.mxu0 %v11410_v15  ;;  %7160 = vmatprep.subr.bf16.mxu1 %v11412_v32  ;;  %v10582_v15 = vcombine.high %v135_v25, %v151_v26  ;;  %v10584_v32 = vcombine.high %v136_v27, %v152_v28  ;;  %v311_v7 = vld [vmem:[%s16712_s2 + $0x8d0] sm:$0xff]  ;;  %v312_v11 = vld [vmem:[%s16712_s2 + $0x8d8] sm:$0xff] }
 0x27a   :  { %7079 = vmatpush1.bf16.msra.mxu0 %v11409_v40  ;;  %7161 = vmatpush1.bf16.msra.mxu1 %v11411_v41  ;;  %v10581_v40 = vcombine.low %v135_v25, %v151_v26  ;;  %v10583_v41 = vcombine.low %v136_v27, %v152_v28  ;;  %v327_v25 = vld [vmem:[%s16712_s2 + $0x950] sm:$0xff]  ;;  %v328_v27 = vld [vmem:[%s16712_s2 + $0x958] sm:$0xff] }
 0x27b   :  { %7080 = vmatprep.subr.bf16.mxu0 %v11442_v42  ;;  %7162 = vmatprep.subr.bf16.mxu1 %v11444_v43  ;;  %v10614_v42 = vcombine.high %v167_v33, %v183_v34  ;;  %v10616_v43 = vcombine.high %v168_v37, %v184_v38  ;;  %v343_v26 = vld [vmem:[%s16712_s2 + $0x9d0] sm:$0xff]  ;;  %v344_v28 = vld [vmem:[%s16712_s2 + $0x9d8] sm:$0xff] }
 0x27e   :  { %7081 = vmatpush1.bf16.msra.mxu0 %v11441_v48  ;;  %7163 = vmatpush1.bf16.msra.mxu1 %v11443_v49  ;;  %v10613_v48 = vcombine.low %v167_v33, %v183_v34  ;;  %v10615_v49 = vcombine.low %v168_v37, %v184_v38  ;;  %v359_v33 = vld [vmem:[%s16712_s2 + $0xa50] sm:$0xff]  ;;  %v360_v37 = vld [vmem:[%s16712_s2 + $0xa58] sm:$0xff] }
 0x27f   :  { %7082 = vmatprep.subr.bf16.mxu0 %v11474_v50  ;;  %7164 = vmatprep.subr.bf16.mxu1 %v11476_v51  ;;  %v10646_v50 = vcombine.high %v199_v44, %v215_v45  ;;  %v10648_v51 = vcombine.high %v200_v46, %v216_v47  ;;  %v375_v34 = vld [vmem:[%s16712_s2 + $0xad0] sm:$0xff]  ;;  %v376_v38 = vld [vmem:[%s16712_s2 + $0xad8] sm:$0xff] }
 0x282   :  { %7083 = vmatpush1.bf16.msra.mxu0 %v11473_v58  ;;  %7165 = vmatpush1.bf16.msra.mxu1 %v11475_v59  ;;  %v10645_v58 = vcombine.low %v199_v44, %v215_v45  ;;  %v10647_v59 = vcombine.low %v200_v46, %v216_v47  ;;  %v391_v44 = vld [vmem:[%s16712_s2 + $0xb50] sm:$0xff]  ;;  %v392_v46 = vld [vmem:[%s16712_s2 + $0xb58] sm:$0xff] }
 0x283   :  { %7175 = vmatprep.subr.bf16.mxu0 %v10486_v60  ;;  %7257 = vmatprep.subr.bf16.mxu1 %v10488_v61  ;;  %v10678_v60 = vcombine.high %v231_v52, %v247_v54  ;;  %v10680_v61 = vcombine.high %v232_v55, %v248_v56  ;;  %v407_v45 = vld [vmem:[%s16712_s2 + $0xbd0] sm:$0xff]  ;;  %v408_v47 = vld [vmem:[%s16712_s2 + $0xbd8] sm:$0xff] }
 0x285   :  { %7085 = vmatmul.mubr.bf16.vlgmr.msra.gmra.mrb[16].mxu0 %v12986_v24  ;;  %7167 = vmatmul.mubr.bf16.vlgmr.msra.gmra.mrb[16].mxu1 %v12986_v24 }
 0x286   :  { %7176 = vmatpush1.bf16.msra.mxu0 %v10485_v2  ;;  %7258 = vmatpush1.bf16.msra.mxu1 %v10487_v3  ;;  %v10677_v2 = vcombine.low %v231_v52, %v247_v54  ;;  %v10679_v3 = vcombine.low %v232_v55, %v248_v56  ;;  %v423_v52 = vld [vmem:[%s16712_s2 + $0xc50] sm:$0xff]  ;;  %v424_v55 = vld [vmem:[%s16712_s2 + $0xc58] sm:$0xff] }
 0x287   :  { %7177 = vmatprep.subr.bf16.mxu0 %v10518_v4  ;;  %7259 = vmatprep.subr.bf16.mxu1 %v10520_v5  ;;  %v10710_v4 = vcombine.high %v263_v62, %v279_v63  ;;  %v10712_v5 = vcombine.high %v264_v0, %v280_v1  ;;  %v439_v54 = vld [vmem:[%s16712_s2 + $0xcd0] sm:$0xff]  ;;  %v440_v56 = vld [vmem:[%s16712_s2 + $0xcd8] sm:$0xff] }
 0x288   :  { %7207 = vmatprep.mubr.bf16.mxu0 %v12645_v57  ;;  %7289 = vmatprep.mubr.bf16.mxu1 %v12645_v57 }
 0x28a   :  { %7178 = vmatpush1.bf16.msra.mxu0 %v10517_v13  ;;  %7260 = vmatpush1.bf16.msra.mxu1 %v10519_v17  ;;  %v10709_v13 = vcombine.low %v263_v62, %v279_v63  ;;  %v10711_v17 = vcombine.low %v264_v0, %v280_v1  ;;  %v455_v62 = vld [vmem:[%s16712_s2 + $0xd50] sm:$0xff]  ;;  %v456_v0 = vld [vmem:[%s16712_s2 + $0xd58] sm:$0xff] }
 0x28b   :  { %7179 = vmatprep.subr.bf16.mxu0 %v10550_v20  ;;  %7261 = vmatprep.subr.bf16.mxu1 %v10552_v21  ;;  %v10742_v20 = vcombine.high %v295_v6, %v311_v7  ;;  %v10744_v21 = vcombine.high %v296_v8, %v312_v11  ;;  %v471_v63 = vld [vmem:[%s16712_s2 + $0xdd0] sm:$0xff]  ;;  %v472_v1 = vld [vmem:[%s16712_s2 + $0xdd8] sm:$0xff] }
 0x28e   :  { %7180 = vmatpush1.bf16.msra.mxu0 %v10549_v29  ;;  %7262 = vmatpush1.bf16.msra.mxu1 %v10551_v30  ;;  %v10741_v29 = vcombine.low %v295_v6, %v311_v7  ;;  %v10743_v30 = vcombine.low %v296_v8, %v312_v11  ;;  %v487_v6 = vld [vmem:[%s16712_s2 + $0xe50] sm:$0xff]  ;;  %v488_v8 = vld [vmem:[%s16712_s2 + $0xe58] sm:$0xff] }
 0x28f   :  { %7181 = vmatprep.subr.bf16.mxu0 %v10582_v15  ;;  %7263 = vmatprep.subr.bf16.mxu1 %v10584_v32  ;;  %v10774_v15 = vcombine.high %v327_v25, %v343_v26  ;;  %v10776_v32 = vcombine.high %v328_v27, %v344_v28  ;;  %v503_v7 = vld [vmem:[%s16712_s2 + $0xed0] sm:$0xff]  ;;  %v504_v11 = vld [vmem:[%s16712_s2 + $0xed8] sm:$0xff] }
 0x292   :  { %7182 = vmatpush1.bf16.msra.mxu0 %v10581_v40  ;;  %7264 = vmatpush1.bf16.msra.mxu1 %v10583_v41  ;;  %v10773_v40 = vcombine.low %v327_v25, %v343_v26  ;;  %v10775_v41 = vcombine.low %v328_v27, %v344_v28  ;;  %v519_v25 = vld [vmem:[%s16712_s2 + $0xf50] sm:$0xff]  ;;  %v520_v27 = vld [vmem:[%s16712_s2 + $0xf58] sm:$0xff] }
 0x293   :  { %7183 = vmatprep.subr.bf16.mxu0 %v10614_v42  ;;  %7265 = vmatprep.subr.bf16.mxu1 %v10616_v43  ;;  %v10806_v42 = vcombine.high %v359_v33, %v375_v34  ;;  %v10808_v43 = vcombine.high %v360_v37, %v376_v38  ;;  %v535_v26 = vld [vmem:[%s16712_s2 + $0xfd0] sm:$0xff]  ;;  %v536_v28 = vld [vmem:[%s16712_s2 + $0xfd8] sm:$0xff] }
 0x296   :  { %7184 = vmatpush1.bf16.msra.mxu0 %v10613_v48  ;;  %7266 = vmatpush1.bf16.msra.mxu1 %v10615_v49  ;;  %v10805_v48 = vcombine.low %v359_v33, %v375_v34  ;;  %v10807_v49 = vcombine.low %v360_v37, %v376_v38  ;;  %v551_v33 = vld [vmem:[%s16712_s2 + $0x1050] sm:$0xff]  ;;  %v552_v37 = vld [vmem:[%s16712_s2 + $0x1058] sm:$0xff] }
 0x297   :  { %7185 = vmatprep.subr.bf16.mxu0 %v10646_v50  ;;  %7267 = vmatprep.subr.bf16.mxu1 %v10648_v51  ;;  %v10838_v50 = vcombine.high %v391_v44, %v407_v45  ;;  %v10840_v51 = vcombine.high %v392_v46, %v408_v47  ;;  %v567_v34 = vld [vmem:[%s16712_s2 + $0x10d0] sm:$0xff]  ;;  %v568_v38 = vld [vmem:[%s16712_s2 + $0x10d8] sm:$0xff] }
 0x29a   :  { %7186 = vmatpush1.bf16.msra.mxu0 %v10645_v58  ;;  %7268 = vmatpush1.bf16.msra.mxu1 %v10647_v59  ;;  %v10837_v58 = vcombine.low %v391_v44, %v407_v45  ;;  %v10839_v59 = vcombine.low %v392_v46, %v408_v47  ;;  %v583_v44 = vld [vmem:[%s16712_s2 + $0x1150] sm:$0xff]  ;;  %v584_v46 = vld [vmem:[%s16712_s2 + $0x1158] sm:$0xff] }
 0x29b   :  { %7187 = vmatprep.subr.bf16.mxu0 %v10678_v60  ;;  %7269 = vmatprep.subr.bf16.mxu1 %v10680_v61  ;;  %v10870_v60 = vcombine.high %v423_v52, %v439_v54  ;;  %v10872_v61 = vcombine.high %v424_v55, %v440_v56  ;;  %v599_v45 = vld [vmem:[%s16712_s2 + $0x11d0] sm:$0xff]  ;;  %v600_v47 = vld [vmem:[%s16712_s2 + $0x11d8] sm:$0xff] }
 0x29e   :  { %7188 = vmatpush1.bf16.msra.mxu0 %v10677_v2  ;;  %7270 = vmatpush1.bf16.msra.mxu1 %v10679_v3  ;;  %v10869_v2 = vcombine.low %v423_v52, %v439_v54  ;;  %v10871_v3 = vcombine.low %v424_v55, %v440_v56  ;;  %v615_v52 = vld [vmem:[%s16712_s2 + $0x1250] sm:$0xff]  ;;  %v616_v55 = vld [vmem:[%s16712_s2 + $0x1258] sm:$0xff] }
 0x29f   :  { %7189 = vmatprep.subr.bf16.mxu0 %v10710_v4  ;;  %7271 = vmatprep.subr.bf16.mxu1 %v10712_v5  ;;  %v10902_v4 = vcombine.high %v455_v62, %v471_v63  ;;  %v10904_v5 = vcombine.high %v456_v0, %v472_v1  ;;  %v631_v54 = vld [vmem:[%s16712_s2 + $0x12d0] sm:$0xff]  ;;  %v632_v56 = vld [vmem:[%s16712_s2 + $0x12d8] sm:$0xff] }
 0x2a2   :  { %7190 = vmatpush1.bf16.msra.mxu0 %v10709_v13  ;;  %7272 = vmatpush1.bf16.msra.mxu1 %v10711_v17  ;;  %v10901_v13 = vcombine.low %v455_v62, %v471_v63  ;;  %v10903_v17 = vcombine.low %v456_v0, %v472_v1  ;;  %v647_v62 = vld [vmem:[%s16712_s2 + $0x1350] sm:$0xff]  ;;  %v648_v0 = vld [vmem:[%s16712_s2 + $0x1358] sm:$0xff] }
 0x2a3   :  { %7191 = vmatprep.subr.bf16.mxu0 %v10742_v20  ;;  %7273 = vmatprep.subr.bf16.mxu1 %v10744_v21  ;;  %v10934_v20 = vcombine.high %v487_v6, %v503_v7  ;;  %v10936_v21 = vcombine.high %v488_v8, %v504_v11  ;;  %v663_v63 = vld [vmem:[%s16712_s2 + $0x13d0] sm:$0xff]  ;;  %v664_v1 = vld [vmem:[%s16712_s2 + $0x13d8] sm:$0xff] }
 0x2a6   :  { %7192 = vmatpush1.bf16.msra.mxu0 %v10741_v29  ;;  %7274 = vmatpush1.bf16.msra.mxu1 %v10743_v30  ;;  %v10933_v29 = vcombine.low %v487_v6, %v503_v7  ;;  %v10935_v30 = vcombine.low %v488_v8, %v504_v11  ;;  %v679_v6 = vld [vmem:[%s16712_s2 + $0x1450] sm:$0xff]  ;;  %v680_v8 = vld [vmem:[%s16712_s2 + $0x1458] sm:$0xff] }
 0x2a7   :  { %7193 = vmatprep.subr.bf16.mxu0 %v10774_v15  ;;  %7275 = vmatprep.subr.bf16.mxu1 %v10776_v32  ;;  %v10966_v15 = vcombine.high %v519_v25, %v535_v26  ;;  %v10968_v32 = vcombine.high %v520_v27, %v536_v28  ;;  %v695_v7 = vld [vmem:[%s16712_s2 + $0x14d0] sm:$0xff]  ;;  %v696_v11 = vld [vmem:[%s16712_s2 + $0x14d8] sm:$0xff] }
 0x2aa   :  { %7194 = vmatpush1.bf16.msra.mxu0 %v10773_v40  ;;  %7276 = vmatpush1.bf16.msra.mxu1 %v10775_v41  ;;  %v10965_v40 = vcombine.low %v519_v25, %v535_v26  ;;  %v10967_v41 = vcombine.low %v520_v27, %v536_v28  ;;  %v711_v25 = vld [vmem:[%s16712_s2 + $0x1550] sm:$0xff]  ;;  %v712_v27 = vld [vmem:[%s16712_s2 + $0x1558] sm:$0xff] }
 0x2ab   :  { %7195 = vmatprep.subr.bf16.mxu0 %v10806_v42  ;;  %7277 = vmatprep.subr.bf16.mxu1 %v10808_v43  ;;  %v10998_v42 = vcombine.high %v551_v33, %v567_v34  ;;  %v11000_v43 = vcombine.high %v552_v37, %v568_v38  ;;  %v727_v26 = vld [vmem:[%s16712_s2 + $0x15d0] sm:$0xff]  ;;  %v728_v28 = vld [vmem:[%s16712_s2 + $0x15d8] sm:$0xff] }
 0x2ae   :  { %7196 = vmatpush1.bf16.msra.mxu0 %v10805_v48  ;;  %7278 = vmatpush1.bf16.msra.mxu1 %v10807_v49  ;;  %v10997_v48 = vcombine.low %v551_v33, %v567_v34  ;;  %v10999_v49 = vcombine.low %v552_v37, %v568_v38  ;;  %v743_v33 = vld [vmem:[%s16712_s2 + $0x1650] sm:$0xff]  ;;  %v744_v37 = vld [vmem:[%s16712_s2 + $0x1658] sm:$0xff] }
 0x2af   :  { %7197 = vmatprep.subr.bf16.mxu0 %v10838_v50  ;;  %7279 = vmatprep.subr.bf16.mxu1 %v10840_v51  ;;  %v11030_v50 = vcombine.high %v583_v44, %v599_v45  ;;  %v11032_v51 = vcombine.high %v584_v46, %v600_v47  ;;  %v759_v34 = vld [vmem:[%s16712_s2 + $0x16d0] sm:$0xff]  ;;  %v760_v38 = vld [vmem:[%s16712_s2 + $0x16d8] sm:$0xff] }
 0x2b2   :  { %7198 = vmatpush1.bf16.msra.mxu0 %v10837_v58  ;;  %7280 = vmatpush1.bf16.msra.mxu1 %v10839_v59  ;;  %v11029_v58 = vcombine.low %v583_v44, %v599_v45  ;;  %v11031_v59 = vcombine.low %v584_v46, %v600_v47  ;;  %v11192_v44 = vcombine.high %v744_v37, %v760_v38  ;;  %v775_v45 = vld [vmem:[%s16712_s2 + $0x1750] sm:$0xff] }
 0x2b3   :  { %7199 = vmatprep.subr.bf16.mxu0 %v10870_v60  ;;  %7281 = vmatprep.subr.bf16.mxu1 %v10872_v61  ;;  %v11062_v60 = vcombine.high %v615_v52, %v631_v54  ;;  %v11064_v61 = vcombine.high %v616_v55, %v632_v56  ;;  %v791_v46 = vld [vmem:[%s16712_s2 + $0x17d0] sm:$0xff] }
 0x2b6   :  { %7200 = vmatpush1.bf16.msra.mxu0 %v10869_v2  ;;  %7282 = vmatpush1.bf16.msra.mxu1 %v10871_v3  ;;  %v11061_v2 = vcombine.low %v615_v52, %v631_v54  ;;  %v11063_v3 = vcombine.low %v616_v55, %v632_v56  ;;  %v11189_v54 = vcombine.low %v743_v33, %v759_v34 }
 0x2b7   :  { %7201 = vmatprep.subr.bf16.mxu0 %v10902_v4  ;;  %7283 = vmatprep.subr.bf16.mxu1 %v10904_v5  ;;  %v11094_v4 = vcombine.high %v647_v62, %v663_v63  ;;  %v11096_v5 = vcombine.high %v648_v0, %v664_v1 }
 0x2ba   :  { %7202 = vmatpush1.bf16.msra.mxu0 %v10901_v13  ;;  %7284 = vmatpush1.bf16.msra.mxu1 %v10903_v17  ;;  %v11093_v13 = vcombine.low %v647_v62, %v663_v63  ;;  %v11095_v17 = vcombine.low %v648_v0, %v664_v1  ;;  %v807_v62 = vld [vmem:[%s16712_s2 + $0x1850] sm:$0xff]  ;;  %v808_v0 = vld [vmem:[%s16712_s2 + $0x1858] sm:$0xff] }
 0x2bb   :  { %7203 = vmatprep.subr.bf16.mxu0 %v10934_v20  ;;  %7285 = vmatprep.subr.bf16.mxu1 %v10936_v21  ;;  %v11126_v20 = vcombine.high %v679_v6, %v695_v7  ;;  %v11128_v21 = vcombine.high %v680_v8, %v696_v11  ;;  %v823_v63 = vld [vmem:[%s16712_s2 + $0x18d0] sm:$0xff]  ;;  %v824_v1 = vld [vmem:[%s16712_s2 + $0x18d8] sm:$0xff] }
 0x2be   :  { %7204 = vmatpush1.bf16.msra.mxu0 %v10933_v29  ;;  %7286 = vmatpush1.bf16.msra.mxu1 %v10935_v30  ;;  %v11125_v29 = vcombine.low %v679_v6, %v695_v7  ;;  %v11127_v30 = vcombine.low %v680_v8, %v696_v11  ;;  %v839_v6 = vld [vmem:[%s16712_s2 + $0x1950] sm:$0xff]  ;;  %v840_v8 = vld [vmem:[%s16712_s2 + $0x1958] sm:$0xff] }
 0x2bf   :  { %7205 = vmatprep.subr.bf16.mxu0 %v10966_v15  ;;  %7287 = vmatprep.subr.bf16.mxu1 %v10968_v32  ;;  %v11158_v15 = vcombine.high %v711_v25, %v727_v26  ;;  %v11160_v32 = vcombine.high %v712_v27, %v728_v28  ;;  %v855_v7 = vld [vmem:[%s16712_s2 + $0x19d0] sm:$0xff]  ;;  %v856_v11 = vld [vmem:[%s16712_s2 + $0x19d8] sm:$0xff] }
 0x2c2   :  { %7206 = vmatpush1.bf16.msra.mxu0 %v10965_v40  ;;  %7288 = vmatpush1.bf16.msra.mxu1 %v10967_v41  ;;  %v11157_v40 = vcombine.low %v711_v25, %v727_v26  ;;  %v11159_v41 = vcombine.low %v712_v27, %v728_v28  ;;  %v871_v25 = vld [vmem:[%s16712_s2 + $0x1a50] sm:$0xff]  ;;  %v872_v27 = vld [vmem:[%s16712_s2 + $0x1a58] sm:$0xff] }
 0x2c3   :  { %7216 = vmatprep.subr.bf16.mxu0 %v10998_v42  ;;  %7298 = vmatprep.subr.bf16.mxu1 %v11000_v43  ;;  %v11190_v42 = vcombine.high %v743_v33, %v759_v34  ;;  %v887_v26 = vld [vmem:[%s16712_s2 + $0x1ad0] sm:$0xff]  ;;  %v888_v28 = vld [vmem:[%s16712_s2 + $0x1ad8] sm:$0xff] }
 0x2c4   :  { %v903_v33 = vld [vmem:[%s16712_s2 + $0x1b50] sm:$0xff] }
 0x2c5   :  { %7208 = vmatmul.mubr.bf16.vlgmr.msra.gmra.mrb[20].mxu0 %v12771_v12  ;;  %7290 = vmatmul.mubr.bf16.vlgmr.msra.gmra.mrb[20].mxu1 %v12771_v12  ;;  %v919_v34 = vld [vmem:[%s16712_s2 + $0x1bd0] sm:$0xff] }
 0x2c6   :  { %7217 = vmatpush1.bf16.msra.mxu0 %v10997_v48  ;;  %7299 = vmatpush1.bf16.msra.mxu1 %v10999_v49  ;;  %v776_v49 = vld [vmem:[%s16712_s2 + $0x1758] sm:$0xff] }
 0x2c7   :  { %7218 = vmatprep.subr.bf16.mxu0 %v11030_v50  ;;  %7300 = vmatprep.subr.bf16.mxu1 %v11032_v51  ;;  %v792_v50 = vld [vmem:[%s16712_s2 + $0x17d8] sm:$0xff] }
 0x2c8   :  { %7248 = vmatprep.mubr.bf16.mxu0 %v12798_v23  ;;  %7330 = vmatprep.mubr.bf16.mxu1 %v12798_v23 }
 0x2ca   :  { %7219 = vmatpush1.bf16.msra.mxu0 %v11029_v58  ;;  %7301 = vmatpush1.bf16.msra.mxu1 %v11031_v59  ;;  %v11191_v58 = vcombine.low %v744_v37, %v760_v38  ;;  %v11222_v59 = vcombine.high %v775_v45, %v791_v46  ;;  %v904_v37 = vld [vmem:[%s16712_s2 + $0x1b58] sm:$0xff] }
 0x2cb   :  { %7220 = vmatprep.subr.bf16.mxu0 %v11062_v60  ;;  %7302 = vmatprep.subr.bf16.mxu1 %v11064_v61  ;;  %v11224_v61 = vcombine.high %v776_v49, %v792_v50  ;;  %v920_v38 = vld [vmem:[%s16712_s2 + $0x1bd8] sm:$0xff] }
 0x2ce   :  { %7221 = vmatpush1.bf16.msra.mxu0 %v11061_v2  ;;  %7303 = vmatpush1.bf16.msra.mxu1 %v11063_v3  ;;  %v11221_v2 = vcombine.low %v775_v45, %v791_v46  ;;  %v11223_v3 = vcombine.low %v776_v49, %v792_v50  ;;  %v935_v45 = vld [vmem:[%s16712_s2 + $0x1c50] sm:$0xff]  ;;  %v936_v49 = vld [vmem:[%s16712_s2 + $0x1c58] sm:$0xff] }
 0x2cf   :  { %7222 = vmatprep.subr.bf16.mxu0 %v11094_v4  ;;  %7304 = vmatprep.subr.bf16.mxu1 %v11096_v5  ;;  %v11254_v4 = vcombine.high %v807_v62, %v823_v63  ;;  %v11256_v5 = vcombine.high %v808_v0, %v824_v1  ;;  %v951_v46 = vld [vmem:[%s16712_s2 + $0x1cd0] sm:$0xff]  ;;  %v952_v50 = vld [vmem:[%s16712_s2 + $0x1cd8] sm:$0xff] }
 0x2d2   :  { %7223 = vmatpush1.bf16.msra.mxu0 %v11093_v13  ;;  %7305 = vmatpush1.bf16.msra.mxu1 %v11095_v17  ;;  %v11253_v13 = vcombine.low %v807_v62, %v823_v63  ;;  %v11255_v17 = vcombine.low %v808_v0, %v824_v1  ;;  %v11381_v62 = vcombine.low %v935_v45, %v951_v46 }
 0x2d3   :  { %7224 = vmatprep.subr.bf16.mxu0 %v11126_v20  ;;  %7306 = vmatprep.subr.bf16.mxu1 %v11128_v21  ;;  %v11286_v20 = vcombine.high %v839_v6, %v855_v7  ;;  %v11288_v21 = vcombine.high %v840_v8, %v856_v11  ;;  %v11383_v63 = vcombine.low %v936_v49, %v952_v50 }
 0x2d6   :  { %7225 = vmatpush1.bf16.msra.mxu0 %v11125_v29  ;;  %7307 = vmatpush1.bf16.msra.mxu1 %v11127_v30  ;;  %v11285_v29 = vcombine.low %v839_v6, %v855_v7  ;;  %v11287_v30 = vcombine.low %v840_v8, %v856_v11 }
 0x2d7   :  { %7226 = vmatprep.subr.bf16.mxu0 %v11158_v15  ;;  %7308 = vmatprep.subr.bf16.mxu1 %v11160_v32  ;;  %v11318_v15 = vcombine.high %v871_v25, %v887_v26  ;;  %v11320_v32 = vcombine.high %v872_v27, %v888_v28 }
 0x2d8   :  { %v14840_v43 = vpop.f32.mrb[12].mxu0  ;;  %v14848_v47 = vpop.f32.mrb[12].mxu1 }
 0x2d9   :  { %v14850_v48 = vpop.f32.mrb[13].mxu0  ;;  %v14858_v51 = vpop.f32.mrb[13].mxu1 }
 0x2da   :  { %v6926_v52 = vpop.f32.mrb[14].mxu0  ;;  %7227 = vmatpush1.bf16.msra.mxu0 %v11157_v40  ;;  %v7008_v55 = vpop.f32.mrb[14].mxu1  ;;  %7309 = vmatpush1.bf16.msra.mxu1 %v11159_v41  ;;  %v11317_v40 = vcombine.low %v871_v25, %v887_v26  ;;  %v11319_v41 = vcombine.low %v872_v27, %v888_v28 }
 0x2db   :  { %v6927_v56 = vpop.f32.mrb[15].mxu0  ;;  %7228 = vmatprep.subr.bf16.mxu0 %v11190_v42  ;;  %v7009_v60 = vpop.f32.mrb[15].mxu1  ;;  %7310 = vmatprep.subr.bf16.mxu1 %v11192_v44  ;;  %v11350_v42 = vcombine.high %v903_v33, %v919_v34  ;;  %v11352_v44 = vcombine.high %v904_v37, %v920_v38  ;;  %v11349_v52 = vcombine.low %v903_v33, %v919_v34 }
 0x2dc   :  { %v11382_v55 = vcombine.high %v935_v45, %v951_v46  ;;  %v11384_v56 = vcombine.high %v936_v49, %v952_v50  ;;  %v968_v60 = vld [vmem:[%s16712_s2 + $0x1d58] sm:$0xff] }
 0x2de   :  { %7229 = vmatpush1.bf16.msra.mxu0 %v11189_v54  ;;  %7311 = vmatpush1.bf16.msra.mxu1 %v11191_v58  ;;  %v11351_v54 = vcombine.low %v904_v37, %v920_v38  ;;  %v967_v58 = vld [vmem:[%s16712_s2 + $0x1d50] sm:$0xff] }
 0x2df   :  { %7230 = vmatprep.subr.bf16.mxu0 %v11222_v59  ;;  %7312 = vmatprep.subr.bf16.mxu1 %v11224_v61  ;;  %v983_v59 = vld [vmem:[%s16712_s2 + $0x1dd0] sm:$0xff]  ;;  %v984_v61 = vld [vmem:[%s16712_s2 + $0x1dd8] sm:$0xff] }
 0x2e0   :  { %v11414_v0 = vcombine.high %v967_v58, %v983_v59  ;;  %v11416_v1 = vcombine.high %v968_v60, %v984_v61  ;;  %v11413_v6 = vcombine.low %v967_v58, %v983_v59  ;;  %v11415_v7 = vcombine.low %v968_v60, %v984_v61 }
 0x2e2   :  { %7231 = vmatpush1.bf16.msra.mxu0 %v11221_v2  ;;  %7313 = vmatpush1.bf16.msra.mxu1 %v11223_v3  ;;  %v999_v2 = vld [vmem:[%s16712_s2 + $0x1e50] sm:$0xff] }
 0x2e3   :  { %7232 = vmatprep.subr.bf16.mxu0 %v11254_v4  ;;  %7314 = vmatprep.subr.bf16.mxu1 %v11256_v5  ;;  %v1015_v3 = vld [vmem:[%s16712_s2 + $0x1ed0] sm:$0xff]  ;;  %v1000_v4 = vld [vmem:[%s16712_s2 + $0x1e58] sm:$0xff] }
 0x2e4   :  { %v1016_v5 = vld [vmem:[%s16712_s2 + $0x1ed8] sm:$0xff]  ;;  %v11446_v8 = vcombine.high %v999_v2, %v1015_v3  ;;  %v11445_v25 = vcombine.low %v999_v2, %v1015_v3 }
 0x2e5   :  { %v11448_v11 = vcombine.high %v1000_v4, %v1016_v5  ;;  %v11447_v26 = vcombine.low %v1000_v4, %v1016_v5 }
 0x2e6   :  { %7233 = vmatpush1.bf16.msra.mxu0 %v11253_v13  ;;  %7315 = vmatpush1.bf16.msra.mxu1 %v11255_v17  ;;  %v1031_v13 = vld [vmem:[%s16712_s2 + $0x1f50] sm:$0xff] }
 0x2e7   :  { %7234 = vmatprep.subr.bf16.mxu0 %v11286_v20  ;;  %7316 = vmatprep.subr.bf16.mxu1 %v11288_v21  ;;  %v1047_v17 = vld [vmem:[%s16712_s2 + $0x1fd0] sm:$0xff]  ;;  %v1032_v20 = vld [vmem:[%s16712_s2 + $0x1f58] sm:$0xff] }
 0x2e8   :  { %v1048_v21 = vld [vmem:[%s16712_s2 + $0x1fd8] sm:$0xff]  ;;  %v11478_v27 = vcombine.high %v1031_v13, %v1047_v17  ;;  %v11477_v33 = vcombine.low %v1031_v13, %v1047_v17 }
 0x2e9   :  { %v11480_v28 = vcombine.high %v1032_v20, %v1048_v21  ;;  %v11479_v34 = vcombine.low %v1032_v20, %v1048_v21 }
 0x2ea   :  { %7235 = vmatpush1.bf16.msra.mxu0 %v11285_v29  ;;  %7317 = vmatpush1.bf16.msra.mxu1 %v11287_v30  ;;  %v41_v29 = vld [vmem:[%s16712_s2 + $0x60] sm:$0xff] }
 0x2eb   :  { %7236 = vmatprep.subr.bf16.mxu0 %v11318_v15  ;;  %7318 = vmatprep.subr.bf16.mxu1 %v11320_v32  ;;  %v57_v30 = vld [vmem:[%s16712_s2 + $0xe0] sm:$0xff]  ;;  %v42_v15 = vld [vmem:[%s16712_s2 + $0x68] sm:$0xff] }
 0x2ec   :  { %v58_v32 = vld [vmem:[%s16712_s2 + $0xe8] sm:$0xff]  ;;  %v10490_v37 = vcombine.high %v41_v29, %v57_v30  ;;  %v10489_v45 = vcombine.low %v41_v29, %v57_v30 }
 0x2ed   :  { %v10492_v38 = vcombine.high %v42_v15, %v58_v32  ;;  %v10491_v46 = vcombine.low %v42_v15, %v58_v32 }
 0x2ee   :  { %7237 = vmatpush1.bf16.msra.mxu0 %v11317_v40  ;;  %7319 = vmatpush1.bf16.msra.mxu1 %v11319_v41  ;;  %v73_v40 = vld [vmem:[%s16712_s2 + $0x160] sm:$0xff] }
 0x2ef   :  { %7238 = vmatprep.subr.bf16.mxu0 %v11350_v42  ;;  %7320 = vmatprep.subr.bf16.mxu1 %v11352_v44  ;;  %v89_v41 = vld [vmem:[%s16712_s2 + $0x1e0] sm:$0xff]  ;;  %v74_v42 = vld [vmem:[%s16712_s2 + $0x168] sm:$0xff] }
 0x2f0   :  { %v90_v44 = vld [vmem:[%s16712_s2 + $0x1e8] sm:$0xff]  ;;  %v10522_v49 = vcombine.high %v73_v40, %v89_v41  ;;  %v10521_v58 = vcombine.low %v73_v40, %v89_v41 }
 0x2f1   :  { %v10524_v50 = vcombine.high %v74_v42, %v90_v44  ;;  %v10523_v59 = vcombine.low %v74_v42, %v90_v44 }
 0x2f2   :  { %7239 = vmatpush1.bf16.msra.mxu0 %v11349_v52  ;;  %7321 = vmatpush1.bf16.msra.mxu1 %v11351_v54  ;;  %v105_v52 = vld [vmem:[%s16712_s2 + $0x260] sm:$0xff] }
 0x2f3   :  { %7240 = vmatprep.subr.bf16.mxu0 %v11382_v55  ;;  %7322 = vmatprep.subr.bf16.mxu1 %v11384_v56  ;;  %v121_v54 = vld [vmem:[%s16712_s2 + $0x2e0] sm:$0xff]  ;;  %v106_v55 = vld [vmem:[%s16712_s2 + $0x268] sm:$0xff] }
 0x2f4   :  { %v122_v56 = vld [vmem:[%s16712_s2 + $0x2e8] sm:$0xff]  ;;  %v10554_v60 = vcombine.high %v105_v52, %v121_v54  ;;  %v10553_v2 = vcombine.low %v105_v52, %v121_v54 }
 0x2f5   :  { %v10556_v61 = vcombine.high %v106_v55, %v122_v56  ;;  %v10555_v3 = vcombine.low %v106_v55, %v122_v56 }
 0x2f6   :  { %7241 = vmatpush1.bf16.msra.mxu0 %v11381_v62  ;;  %7323 = vmatpush1.bf16.msra.mxu1 %v11383_v63  ;;  %v137_v62 = vld [vmem:[%s16712_s2 + $0x360] sm:$0xff] }
 0x2f7   :  { %7242 = vmatprep.subr.bf16.mxu0 %v11414_v0  ;;  %7324 = vmatprep.subr.bf16.mxu1 %v11416_v1  ;;  %v153_v63 = vld [vmem:[%s16712_s2 + $0x3e0] sm:$0xff]  ;;  %v138_v0 = vld [vmem:[%s16712_s2 + $0x368] sm:$0xff] }
 0x2f8   :  { %v154_v1 = vld [vmem:[%s16712_s2 + $0x3e8] sm:$0xff]  ;;  %v10586_v4 = vcombine.high %v137_v62, %v153_v63  ;;  %v10585_v13 = vcombine.low %v137_v62, %v153_v63 }
 0x2f9   :  { %v10588_v5 = vcombine.high %v138_v0, %v154_v1  ;;  %v10587_v17 = vcombine.low %v138_v0, %v154_v1 }
 0x2fa   :  { %7243 = vmatpush1.bf16.msra.mxu0 %v11413_v6  ;;  %7325 = vmatpush1.bf16.msra.mxu1 %v11415_v7  ;;  %v169_v6 = vld [vmem:[%s16712_s2 + $0x460] sm:$0xff] }
 0x2fb   :  { %7244 = vmatprep.subr.bf16.mxu0 %v11446_v8  ;;  %7326 = vmatprep.subr.bf16.mxu1 %v11448_v11  ;;  %v185_v7 = vld [vmem:[%s16712_s2 + $0x4e0] sm:$0xff]  ;;  %v170_v8 = vld [vmem:[%s16712_s2 + $0x468] sm:$0xff] }
 0x2fc   :  { %v186_v11 = vld [vmem:[%s16712_s2 + $0x4e8] sm:$0xff]  ;;  %v10618_v20 = vcombine.high %v169_v6, %v185_v7  ;;  %v10617_v29 = vcombine.low %v169_v6, %v185_v7 }
 0x2fd   :  { %v10620_v21 = vcombine.high %v170_v8, %v186_v11  ;;  %v10619_v30 = vcombine.low %v170_v8, %v186_v11 }
 0x2fe   :  { %7245 = vmatpush1.bf16.msra.mxu0 %v11445_v25  ;;  %7327 = vmatpush1.bf16.msra.mxu1 %v11447_v26  ;;  %v201_v25 = vld [vmem:[%s16712_s2 + $0x560] sm:$0xff] }
 0x2ff   :  { %7246 = vmatprep.subr.bf16.mxu0 %v11478_v27  ;;  %7328 = vmatprep.subr.bf16.mxu1 %v11480_v28  ;;  %v217_v26 = vld [vmem:[%s16712_s2 + $0x5e0] sm:$0xff]  ;;  %v202_v27 = vld [vmem:[%s16712_s2 + $0x568] sm:$0xff] }
 0x300   :  { %v218_v28 = vld [vmem:[%s16712_s2 + $0x5e8] sm:$0xff]  ;;  %v10650_v15 = vcombine.high %v201_v25, %v217_v26  ;;  %v10649_v40 = vcombine.low %v201_v25, %v217_v26 }
 0x301   :  { %v10652_v32 = vcombine.high %v202_v27, %v218_v28  ;;  %v10651_v41 = vcombine.low %v202_v27, %v218_v28 }
 0x302   :  { %7247 = vmatpush1.bf16.msra.mxu0 %v11477_v33  ;;  %7329 = vmatpush1.bf16.msra.mxu1 %v11479_v34  ;;  %v233_v33 = vld [vmem:[%s16712_s2 + $0x660] sm:$0xff] }
 0x303   :  { %7339 = vmatprep.subr.bf16.mxu0 %v10490_v37  ;;  %7421 = vmatprep.subr.bf16.mxu1 %v10492_v38  ;;  %v249_v34 = vld [vmem:[%s16712_s2 + $0x6e0] sm:$0xff]  ;;  %v234_v37 = vld [vmem:[%s16712_s2 + $0x668] sm:$0xff] }
 0x304   :  { %v250_v38 = vld [vmem:[%s16712_s2 + $0x6e8] sm:$0xff]  ;;  %v10682_v42 = vcombine.high %v233_v33, %v249_v34  ;;  %v10681_v52 = vcombine.low %v233_v33, %v249_v34 }
 0x305   :  { %7249 = vmatmul.mubr.bf16.vlgmr.msra.gmra.mrb[20].mxu0 %v12986_v24  ;;  %7331 = vmatmul.mubr.bf16.vlgmr.msra.gmra.mrb[20].mxu1 %v12986_v24  ;;  %v10684_v44 = vcombine.high %v234_v37, %v250_v38  ;;  %v10683_v54 = vcombine.low %v234_v37, %v250_v38 }
 0x306   :  { %7340 = vmatpush1.bf16.msra.mxu0 %v10489_v45  ;;  %7422 = vmatpush1.bf16.msra.mxu1 %v10491_v46  ;;  %v265_v45 = vld [vmem:[%s16712_s2 + $0x760] sm:$0xff] }
 0x307   :  { %7341 = vmatprep.subr.bf16.mxu0 %v10522_v49  ;;  %7423 = vmatprep.subr.bf16.mxu1 %v10524_v50  ;;  %v281_v46 = vld [vmem:[%s16712_s2 + $0x7e0] sm:$0xff]  ;;  %v266_v49 = vld [vmem:[%s16712_s2 + $0x768] sm:$0xff] }
 0x308   :  { %7371 = vmatprep.mubr.bf16.mxu0 %v12645_v57  ;;  %7453 = vmatprep.mubr.bf16.mxu1 %v12645_v57  ;;  %v282_v50 = vld [vmem:[%s16712_s2 + $0x7e8] sm:$0xff]  ;;  %v10714_v55 = vcombine.high %v265_v45, %v281_v46  ;;  %v10713_v62 = vcombine.low %v265_v45, %v281_v46 }
 0x309   :  { %v10716_v56 = vcombine.high %v266_v49, %v282_v50  ;;  %v10715_v63 = vcombine.low %v266_v49, %v282_v50 }
 0x30a   :  { %7342 = vmatpush1.bf16.msra.mxu0 %v10521_v58  ;;  %7424 = vmatpush1.bf16.msra.mxu1 %v10523_v59  ;;  %v297_v58 = vld [vmem:[%s16712_s2 + $0x860] sm:$0xff] }
 0x30b   :  { %7343 = vmatprep.subr.bf16.mxu0 %v10554_v60  ;;  %7425 = vmatprep.subr.bf16.mxu1 %v10556_v61  ;;  %v313_v59 = vld [vmem:[%s16712_s2 + $0x8e0] sm:$0xff]  ;;  %v298_v60 = vld [vmem:[%s16712_s2 + $0x868] sm:$0xff] }
 0x30c   :  { %v314_v61 = vld [vmem:[%s16712_s2 + $0x8e8] sm:$0xff]  ;;  %v10746_v0 = vcombine.high %v297_v58, %v313_v59  ;;  %v10745_v6 = vcombine.low %v297_v58, %v313_v59 }
 0x30d   :  { %v10748_v1 = vcombine.high %v298_v60, %v314_v61  ;;  %v10747_v7 = vcombine.low %v298_v60, %v314_v61 }
 0x30e   :  { %7344 = vmatpush1.bf16.msra.mxu0 %v10553_v2  ;;  %7426 = vmatpush1.bf16.msra.mxu1 %v10555_v3  ;;  %v329_v2 = vld [vmem:[%s16712_s2 + $0x960] sm:$0xff] }
 0x30f   :  { %7345 = vmatprep.subr.bf16.mxu0 %v10586_v4  ;;  %7427 = vmatprep.subr.bf16.mxu1 %v10588_v5  ;;  %v345_v3 = vld [vmem:[%s16712_s2 + $0x9e0] sm:$0xff]  ;;  %v330_v4 = vld [vmem:[%s16712_s2 + $0x968] sm:$0xff] }
 0x310   :  { %v346_v5 = vld [vmem:[%s16712_s2 + $0x9e8] sm:$0xff]  ;;  %v10778_v8 = vcombine.high %v329_v2, %v345_v3  ;;  %v10777_v25 = vcombine.low %v329_v2, %v345_v3 }
 0x311   :  { %v10780_v11 = vcombine.high %v330_v4, %v346_v5  ;;  %v10779_v26 = vcombine.low %v330_v4, %v346_v5 }
 0x312   :  { %7346 = vmatpush1.bf16.msra.mxu0 %v10585_v13  ;;  %7428 = vmatpush1.bf16.msra.mxu1 %v10587_v17  ;;  %v361_v13 = vld [vmem:[%s16712_s2 + $0xa60] sm:$0xff] }
 0x313   :  { %7347 = vmatprep.subr.bf16.mxu0 %v10618_v20  ;;  %7429 = vmatprep.subr.bf16.mxu1 %v10620_v21  ;;  %v377_v17 = vld [vmem:[%s16712_s2 + $0xae0] sm:$0xff]  ;;  %v362_v20 = vld [vmem:[%s16712_s2 + $0xa68] sm:$0xff] }
 0x314   :  { %v378_v21 = vld [vmem:[%s16712_s2 + $0xae8] sm:$0xff]  ;;  %v10810_v27 = vcombine.high %v361_v13, %v377_v17  ;;  %v10809_v33 = vcombine.low %v361_v13, %v377_v17 }
 0x315   :  { %v10812_v28 = vcombine.high %v362_v20, %v378_v21  ;;  %v10811_v34 = vcombine.low %v362_v20, %v378_v21 }
 0x316   :  { %7348 = vmatpush1.bf16.msra.mxu0 %v10617_v29  ;;  %7430 = vmatpush1.bf16.msra.mxu1 %v10619_v30  ;;  %v393_v29 = vld [vmem:[%s16712_s2 + $0xb60] sm:$0xff] }
 0x317   :  { %7349 = vmatprep.subr.bf16.mxu0 %v10650_v15  ;;  %7431 = vmatprep.subr.bf16.mxu1 %v10652_v32  ;;  %v409_v30 = vld [vmem:[%s16712_s2 + $0xbe0] sm:$0xff]  ;;  %v394_v15 = vld [vmem:[%s16712_s2 + $0xb68] sm:$0xff] }
 0x318   :  { %v410_v32 = vld [vmem:[%s16712_s2 + $0xbe8] sm:$0xff]  ;;  %v10842_v37 = vcombine.high %v393_v29, %v409_v30  ;;  %v10841_v45 = vcombine.low %v393_v29, %v409_v30 }
 0x319   :  { %v10844_v38 = vcombine.high %v394_v15, %v410_v32  ;;  %v10843_v46 = vcombine.low %v394_v15, %v410_v32 }
 0x31a   :  { %7350 = vmatpush1.bf16.msra.mxu0 %v10649_v40  ;;  %7432 = vmatpush1.bf16.msra.mxu1 %v10651_v41  ;;  %v425_v40 = vld [vmem:[%s16712_s2 + $0xc60] sm:$0xff] }
 0x31b   :  { %7351 = vmatprep.subr.bf16.mxu0 %v10682_v42  ;;  %7433 = vmatprep.subr.bf16.mxu1 %v10684_v44  ;;  %v441_v41 = vld [vmem:[%s16712_s2 + $0xce0] sm:$0xff]  ;;  %v426_v42 = vld [vmem:[%s16712_s2 + $0xc68] sm:$0xff] }
 0x31c   :  { %v442_v44 = vld [vmem:[%s16712_s2 + $0xce8] sm:$0xff]  ;;  %v10874_v49 = vcombine.high %v425_v40, %v441_v41  ;;  %v10873_v58 = vcombine.low %v425_v40, %v441_v41 }
 0x31d   :  { %v10876_v50 = vcombine.high %v426_v42, %v442_v44  ;;  %v10875_v59 = vcombine.low %v426_v42, %v442_v44 }
 0x31e   :  { %7352 = vmatpush1.bf16.msra.mxu0 %v10681_v52  ;;  %7434 = vmatpush1.bf16.msra.mxu1 %v10683_v54  ;;  %v457_v52 = vld [vmem:[%s16712_s2 + $0xd60] sm:$0xff] }
 0x31f   :  { %7353 = vmatprep.subr.bf16.mxu0 %v10714_v55  ;;  %7435 = vmatprep.subr.bf16.mxu1 %v10716_v56  ;;  %v473_v54 = vld [vmem:[%s16712_s2 + $0xde0] sm:$0xff]  ;;  %v458_v55 = vld [vmem:[%s16712_s2 + $0xd68] sm:$0xff] }
 0x320   :  { %v474_v56 = vld [vmem:[%s16712_s2 + $0xde8] sm:$0xff]  ;;  %v10906_v60 = vcombine.high %v457_v52, %v473_v54  ;;  %v10905_v2 = vcombine.low %v457_v52, %v473_v54 }
 0x321   :  { %v10908_v61 = vcombine.high %v458_v55, %v474_v56  ;;  %v10907_v3 = vcombine.low %v458_v55, %v474_v56 }
 0x322   :  { %7354 = vmatpush1.bf16.msra.mxu0 %v10713_v62  ;;  %7436 = vmatpush1.bf16.msra.mxu1 %v10715_v63  ;;  %v489_v62 = vld [vmem:[%s16712_s2 + $0xe60] sm:$0xff] }
 0x323   :  { %7355 = vmatprep.subr.bf16.mxu0 %v10746_v0  ;;  %7437 = vmatprep.subr.bf16.mxu1 %v10748_v1  ;;  %v505_v63 = vld [vmem:[%s16712_s2 + $0xee0] sm:$0xff]  ;;  %v490_v0 = vld [vmem:[%s16712_s2 + $0xe68] sm:$0xff] }
 0x324   :  { %v506_v1 = vld [vmem:[%s16712_s2 + $0xee8] sm:$0xff]  ;;  %v10938_v4 = vcombine.high %v489_v62, %v505_v63  ;;  %v10937_v13 = vcombine.low %v489_v62, %v505_v63 }
 0x325   :  { %v10940_v5 = vcombine.high %v490_v0, %v506_v1  ;;  %v10939_v17 = vcombine.low %v490_v0, %v506_v1 }
 0x326   :  { %7356 = vmatpush1.bf16.msra.mxu0 %v10745_v6  ;;  %7438 = vmatpush1.bf16.msra.mxu1 %v10747_v7  ;;  %v521_v6 = vld [vmem:[%s16712_s2 + $0xf60] sm:$0xff] }
 0x327   :  { %7357 = vmatprep.subr.bf16.mxu0 %v10778_v8  ;;  %7439 = vmatprep.subr.bf16.mxu1 %v10780_v11  ;;  %v537_v7 = vld [vmem:[%s16712_s2 + $0xfe0] sm:$0xff]  ;;  %v522_v8 = vld [vmem:[%s16712_s2 + $0xf68] sm:$0xff] }
 0x328   :  { %v538_v11 = vld [vmem:[%s16712_s2 + $0xfe8] sm:$0xff]  ;;  %v10970_v20 = vcombine.high %v521_v6, %v537_v7  ;;  %v10969_v29 = vcombine.low %v521_v6, %v537_v7 }
 0x329   :  { %v10972_v21 = vcombine.high %v522_v8, %v538_v11  ;;  %v10971_v30 = vcombine.low %v522_v8, %v538_v11 }
 0x32a   :  { %7358 = vmatpush1.bf16.msra.mxu0 %v10777_v25  ;;  %7440 = vmatpush1.bf16.msra.mxu1 %v10779_v26  ;;  %v553_v25 = vld [vmem:[%s16712_s2 + $0x1060] sm:$0xff] }
 0x32b   :  { %7359 = vmatprep.subr.bf16.mxu0 %v10810_v27  ;;  %7441 = vmatprep.subr.bf16.mxu1 %v10812_v28  ;;  %v569_v26 = vld [vmem:[%s16712_s2 + $0x10e0] sm:$0xff]  ;;  %v554_v27 = vld [vmem:[%s16712_s2 + $0x1068] sm:$0xff] }
 0x32c   :  { %v570_v28 = vld [vmem:[%s16712_s2 + $0x10e8] sm:$0xff]  ;;  %v11002_v15 = vcombine.high %v553_v25, %v569_v26  ;;  %v11001_v40 = vcombine.low %v553_v25, %v569_v26 }
 0x32d   :  { %v11004_v32 = vcombine.high %v554_v27, %v570_v28  ;;  %v11003_v41 = vcombine.low %v554_v27, %v570_v28 }
 0x32e   :  { %7360 = vmatpush1.bf16.msra.mxu0 %v10809_v33  ;;  %7442 = vmatpush1.bf16.msra.mxu1 %v10811_v34  ;;  %v585_v33 = vld [vmem:[%s16712_s2 + $0x1160] sm:$0xff] }
 0x32f   :  { %7361 = vmatprep.subr.bf16.mxu0 %v10842_v37  ;;  %7443 = vmatprep.subr.bf16.mxu1 %v10844_v38  ;;  %v601_v34 = vld [vmem:[%s16712_s2 + $0x11e0] sm:$0xff]  ;;  %v586_v37 = vld [vmem:[%s16712_s2 + $0x1168] sm:$0xff] }
 0x330   :  { %v602_v38 = vld [vmem:[%s16712_s2 + $0x11e8] sm:$0xff]  ;;  %v11034_v42 = vcombine.high %v585_v33, %v601_v34  ;;  %v11033_v52 = vcombine.low %v585_v33, %v601_v34 }
 0x331   :  { %v11036_v44 = vcombine.high %v586_v37, %v602_v38  ;;  %v11035_v54 = vcombine.low %v586_v37, %v602_v38 }
 0x332   :  { %7362 = vmatpush1.bf16.msra.mxu0 %v10841_v45  ;;  %7444 = vmatpush1.bf16.msra.mxu1 %v10843_v46  ;;  %v617_v45 = vld [vmem:[%s16712_s2 + $0x1260] sm:$0xff] }
 0x333   :  { %7363 = vmatprep.subr.bf16.mxu0 %v10874_v49  ;;  %7445 = vmatprep.subr.bf16.mxu1 %v10876_v50  ;;  %v633_v46 = vld [vmem:[%s16712_s2 + $0x12e0] sm:$0xff]  ;;  %v618_v49 = vld [vmem:[%s16712_s2 + $0x1268] sm:$0xff] }
 0x334   :  { %v634_v50 = vld [vmem:[%s16712_s2 + $0x12e8] sm:$0xff]  ;;  %v11066_v55 = vcombine.high %v617_v45, %v633_v46  ;;  %v11065_v62 = vcombine.low %v617_v45, %v633_v46 }
 0x335   :  { %v11068_v56 = vcombine.high %v618_v49, %v634_v50  ;;  %v11067_v63 = vcombine.low %v618_v49, %v634_v50  ;;  %v778_v46 = vld [vmem:[%s16712_s2 + $0x1768] sm:$0xff] }
 0x336   :  { %7364 = vmatpush1.bf16.msra.mxu0 %v10873_v58  ;;  %7446 = vmatpush1.bf16.msra.mxu1 %v10875_v59  ;;  %v649_v58 = vld [vmem:[%s16712_s2 + $0x1360] sm:$0xff]  ;;  %v794_v49 = vld [vmem:[%s16712_s2 + $0x17e8] sm:$0xff] }
 0x337   :  { %7365 = vmatprep.subr.bf16.mxu0 %v10906_v60  ;;  %7447 = vmatprep.subr.bf16.mxu1 %v10908_v61  ;;  %v665_v59 = vld [vmem:[%s16712_s2 + $0x13e0] sm:$0xff]  ;;  %v650_v60 = vld [vmem:[%s16712_s2 + $0x1368] sm:$0xff] }
 0x338   :  { %v666_v61 = vld [vmem:[%s16712_s2 + $0x13e8] sm:$0xff]  ;;  %v11098_v0 = vcombine.high %v649_v58, %v665_v59  ;;  %v11097_v6 = vcombine.low %v649_v58, %v665_v59 }
 0x339   :  { %v11100_v1 = vcombine.high %v650_v60, %v666_v61  ;;  %v11099_v7 = vcombine.low %v650_v60, %v666_v61  ;;  %v11228_v61 = vcombine.high %v778_v46, %v794_v49 }
 0x33a   :  { %7366 = vmatpush1.bf16.msra.mxu0 %v10905_v2  ;;  %7448 = vmatpush1.bf16.msra.mxu1 %v10907_v3  ;;  %v681_v2 = vld [vmem:[%s16712_s2 + $0x1460] sm:$0xff] }
 0x33b   :  { %7367 = vmatprep.subr.bf16.mxu0 %v10938_v4  ;;  %7449 = vmatprep.subr.bf16.mxu1 %v10940_v5  ;;  %v697_v3 = vld [vmem:[%s16712_s2 + $0x14e0] sm:$0xff]  ;;  %v682_v4 = vld [vmem:[%s16712_s2 + $0x1468] sm:$0xff] }
 0x33c   :  { %v698_v5 = vld [vmem:[%s16712_s2 + $0x14e8] sm:$0xff]  ;;  %v11130_v8 = vcombine.high %v681_v2, %v697_v3  ;;  %v11129_v25 = vcombine.low %v681_v2, %v697_v3  ;;  %v11227_v3 = vcombine.low %v778_v46, %v794_v49 }
 0x33d   :  { %v11132_v11 = vcombine.high %v682_v4, %v698_v5  ;;  %v11131_v26 = vcombine.low %v682_v4, %v698_v5 }
 0x33e   :  { %7368 = vmatpush1.bf16.msra.mxu0 %v10937_v13  ;;  %7450 = vmatpush1.bf16.msra.mxu1 %v10939_v17  ;;  %v713_v13 = vld [vmem:[%s16712_s2 + $0x1560] sm:$0xff] }
 0x33f   :  { %7369 = vmatprep.subr.bf16.mxu0 %v10970_v20  ;;  %7451 = vmatprep.subr.bf16.mxu1 %v10972_v21  ;;  %v729_v17 = vld [vmem:[%s16712_s2 + $0x15e0] sm:$0xff]  ;;  %v714_v20 = vld [vmem:[%s16712_s2 + $0x1568] sm:$0xff] }
 0x340   :  { %v730_v21 = vld [vmem:[%s16712_s2 + $0x15e8] sm:$0xff]  ;;  %v11162_v27 = vcombine.high %v713_v13, %v729_v17  ;;  %v11161_v33 = vcombine.low %v713_v13, %v729_v17 }
 0x341   :  { %v11164_v28 = vcombine.high %v714_v20, %v730_v21  ;;  %v11163_v34 = vcombine.low %v714_v20, %v730_v21 }
 0x342   :  { %7370 = vmatpush1.bf16.msra.mxu0 %v10969_v29  ;;  %7452 = vmatpush1.bf16.msra.mxu1 %v10971_v30  ;;  %v745_v29 = vld [vmem:[%s16712_s2 + $0x1660] sm:$0xff] }
 0x343   :  { %7380 = vmatprep.subr.bf16.mxu0 %v11002_v15  ;;  %7462 = vmatprep.subr.bf16.mxu1 %v11004_v32  ;;  %v761_v30 = vld [vmem:[%s16712_s2 + $0x16e0] sm:$0xff]  ;;  %v746_v15 = vld [vmem:[%s16712_s2 + $0x1668] sm:$0xff] }
 0x344   :  { %v762_v32 = vld [vmem:[%s16712_s2 + $0x16e8] sm:$0xff]  ;;  %v11194_v37 = vcombine.high %v745_v29, %v761_v30 }
 0x345   :  { %7372 = vmatmul.mubr.bf16.vlgmr.msra.gmra.mrb[24].mxu0 %v12771_v12  ;;  %7454 = vmatmul.mubr.bf16.vlgmr.msra.gmra.mrb[24].mxu1 %v12771_v12  ;;  %v11195_v58 = vcombine.low %v746_v15, %v762_v32 }
 0x346   :  { %7381 = vmatpush1.bf16.msra.mxu0 %v11001_v40  ;;  %7463 = vmatpush1.bf16.msra.mxu1 %v11003_v41  ;;  %v11196_v40 = vcombine.high %v746_v15, %v762_v32  ;;  %v777_v41 = vld [vmem:[%s16712_s2 + $0x1760] sm:$0xff] }
 0x347   :  { %7382 = vmatprep.subr.bf16.mxu0 %v11034_v42  ;;  %7464 = vmatprep.subr.bf16.mxu1 %v11036_v44  ;;  %v793_v42 = vld [vmem:[%s16712_s2 + $0x17e0] sm:$0xff] }
 0x348   :  { %7412 = vmatprep.mubr.bf16.mxu0 %v12798_v23  ;;  %7494 = vmatprep.mubr.bf16.mxu1 %v12798_v23  ;;  %v11226_v59 = vcombine.high %v777_v41, %v793_v42  ;;  %v11225_v2 = vcombine.low %v777_v41, %v793_v42 }
 0x34a   :  { %7383 = vmatpush1.bf16.msra.mxu0 %v11033_v52  ;;  %7465 = vmatpush1.bf16.msra.mxu1 %v11035_v54  ;;  %v11193_v54 = vcombine.low %v745_v29, %v761_v30 }
 0x34b   :  { %7384 = vmatprep.subr.bf16.mxu0 %v11066_v55  ;;  %7466 = vmatprep.subr.bf16.mxu1 %v11068_v56 }
 0x34e   :  { %7385 = vmatpush1.bf16.msra.mxu0 %v11065_v62  ;;  %7467 = vmatpush1.bf16.msra.mxu1 %v11067_v63  ;;  %v809_v62 = vld [vmem:[%s16712_s2 + $0x1860] sm:$0xff] }
 0x34f   :  { %7386 = vmatprep.subr.bf16.mxu0 %v11098_v0  ;;  %7468 = vmatprep.subr.bf16.mxu1 %v11100_v1  ;;  %v825_v63 = vld [vmem:[%s16712_s2 + $0x18e0] sm:$0xff]  ;;  %v810_v0 = vld [vmem:[%s16712_s2 + $0x1868] sm:$0xff] }
 0x350   :  { %v826_v1 = vld [vmem:[%s16712_s2 + $0x18e8] sm:$0xff]  ;;  %v11258_v4 = vcombine.high %v809_v62, %v825_v63  ;;  %v11257_v13 = vcombine.low %v809_v62, %v825_v63  ;;  %v969_v62 = vld [vmem:[%s16712_s2 + $0x1d60] sm:$0xff] }
 0x351   :  { %v11260_v5 = vcombine.high %v810_v0, %v826_v1  ;;  %v11259_v17 = vcombine.low %v810_v0, %v826_v1  ;;  %v985_v63 = vld [vmem:[%s16712_s2 + $0x1de0] sm:$0xff]  ;;  %v970_v0 = vld [vmem:[%s16712_s2 + $0x1d68] sm:$0xff] }
 0x352   :  { %7387 = vmatpush1.bf16.msra.mxu0 %v11097_v6  ;;  %7469 = vmatpush1.bf16.msra.mxu1 %v11099_v7  ;;  %v841_v6 = vld [vmem:[%s16712_s2 + $0x1960] sm:$0xff]  ;;  %v986_v1 = vld [vmem:[%s16712_s2 + $0x1de8] sm:$0xff] }
 0x353   :  { %7388 = vmatprep.subr.bf16.mxu0 %v11130_v8  ;;  %7470 = vmatprep.subr.bf16.mxu1 %v11132_v11  ;;  %v857_v7 = vld [vmem:[%s16712_s2 + $0x19e0] sm:$0xff]  ;;  %v842_v8 = vld [vmem:[%s16712_s2 + $0x1968] sm:$0xff] }
 0x354   :  { %v858_v11 = vld [vmem:[%s16712_s2 + $0x19e8] sm:$0xff]  ;;  %v11290_v20 = vcombine.high %v841_v6, %v857_v7  ;;  %v11289_v29 = vcombine.low %v841_v6, %v857_v7  ;;  %v1001_v6 = vld [vmem:[%s16712_s2 + $0x1e60] sm:$0xff] }
 0x355   :  { %v11292_v21 = vcombine.high %v842_v8, %v858_v11  ;;  %v11291_v30 = vcombine.low %v842_v8, %v858_v11  ;;  %v1017_v7 = vld [vmem:[%s16712_s2 + $0x1ee0] sm:$0xff]  ;;  %v1002_v8 = vld [vmem:[%s16712_s2 + $0x1e68] sm:$0xff] }
 0x356   :  { %7389 = vmatpush1.bf16.msra.mxu0 %v11129_v25  ;;  %7471 = vmatpush1.bf16.msra.mxu1 %v11131_v26  ;;  %v873_v25 = vld [vmem:[%s16712_s2 + $0x1a60] sm:$0xff]  ;;  %v1018_v11 = vld [vmem:[%s16712_s2 + $0x1ee8] sm:$0xff] }
 0x357   :  { %7390 = vmatprep.subr.bf16.mxu0 %v11162_v27  ;;  %7472 = vmatprep.subr.bf16.mxu1 %v11164_v28  ;;  %v889_v26 = vld [vmem:[%s16712_s2 + $0x1ae0] sm:$0xff]  ;;  %v874_v27 = vld [vmem:[%s16712_s2 + $0x1a68] sm:$0xff] }
 0x358   :  { %v15240_v38 = vpop.f32.mrb[16].mxu0  ;;  %v15248_v44 = vpop.f32.mrb[16].mxu1  ;;  %v890_v28 = vld [vmem:[%s16712_s2 + $0x1ae8] sm:$0xff]  ;;  %v11322_v15 = vcombine.high %v873_v25, %v889_v26  ;;  %v11321_v41 = vcombine.low %v873_v25, %v889_v26  ;;  %v1033_v25 = vld [vmem:[%s16712_s2 + $0x1f60] sm:$0xff] }
 0x359   :  { %v15250_v45 = vpop.f32.mrb[17].mxu0  ;;  %v15258_v50 = vpop.f32.mrb[17].mxu1  ;;  %v11324_v32 = vcombine.high %v874_v27, %v890_v28  ;;  %v11323_v42 = vcombine.low %v874_v27, %v890_v28  ;;  %v1049_v26 = vld [vmem:[%s16712_s2 + $0x1fe0] sm:$0xff]  ;;  %v1034_v27 = vld [vmem:[%s16712_s2 + $0x1f68] sm:$0xff] }
 0x35a   :  { %v7090_v52 = vpop.f32.mrb[18].mxu0  ;;  %7391 = vmatpush1.bf16.msra.mxu0 %v11161_v33  ;;  %v7172_v55 = vpop.f32.mrb[18].mxu1  ;;  %7473 = vmatpush1.bf16.msra.mxu1 %v11163_v34  ;;  %v905_v33 = vld [vmem:[%s16712_s2 + $0x1b60] sm:$0xff]  ;;  %v1050_v28 = vld [vmem:[%s16712_s2 + $0x1fe8] sm:$0xff] }
 0x35b   :  { %v7091_v56 = vpop.f32.mrb[19].mxu0  ;;  %7392 = vmatprep.subr.bf16.mxu0 %v11194_v37  ;;  %v7173_v60 = vpop.f32.mrb[19].mxu1  ;;  %7474 = vmatprep.subr.bf16.mxu1 %v11196_v40  ;;  %v921_v34 = vld [vmem:[%s16712_s2 + $0x1be0] sm:$0xff]  ;;  %v906_v37 = vld [vmem:[%s16712_s2 + $0x1b68] sm:$0xff] }
 0x35c   :  { %v922_v40 = vld [vmem:[%s16712_s2 + $0x1be8] sm:$0xff]  ;;  %v11354_v46 = vcombine.high %v905_v33, %v921_v34  ;;  %v937_v52 = vld [vmem:[%s16712_s2 + $0x1c60] sm:$0xff] }
 0x35d   :  { %v11356_v49 = vcombine.high %v906_v37, %v922_v40  ;;  %v938_v55 = vld [vmem:[%s16712_s2 + $0x1c68] sm:$0xff] }
 0x35e   :  { %7393 = vmatpush1.bf16.msra.mxu0 %v11193_v54  ;;  %7475 = vmatpush1.bf16.msra.mxu1 %v11195_v58  ;;  %v953_v54 = vld [vmem:[%s16712_s2 + $0x1ce0] sm:$0xff]  ;;  %v954_v56 = vld [vmem:[%s16712_s2 + $0x1ce8] sm:$0xff]  ;;  %v11353_v58 = vcombine.low %v905_v33, %v921_v34  ;;  %v43_v33 = vld [vmem:[%s16712_s2 + $0x70] sm:$0xff] }
 0x35f   :  { %7394 = vmatprep.subr.bf16.mxu0 %v11226_v59  ;;  %7476 = vmatprep.subr.bf16.mxu1 %v11228_v61  ;;  %v11355_v59 = vcombine.low %v906_v37, %v922_v40  ;;  %v11386_v60 = vcombine.high %v937_v52, %v953_v54  ;;  %v11388_v61 = vcombine.high %v938_v55, %v954_v56  ;;  %v59_v34 = vld [vmem:[%s16712_s2 + $0xf0] sm:$0xff]  ;;  %v44_v37 = vld [vmem:[%s16712_s2 + $0x78] sm:$0xff] }
 0x360   :  { %v60_v40 = vld [vmem:[%s16712_s2 + $0xf8] sm:$0xff] }
 0x362   :  { %7395 = vmatpush1.bf16.msra.mxu0 %v11225_v2  ;;  %7477 = vmatpush1.bf16.msra.mxu1 %v11227_v3  ;;  %v11385_v2 = vcombine.low %v937_v52, %v953_v54  ;;  %v11387_v3 = vcombine.low %v938_v55, %v954_v56  ;;  %v75_v52 = vld [vmem:[%s16712_s2 + $0x170] sm:$0xff]  ;;  %v76_v55 = vld [vmem:[%s16712_s2 + $0x178] sm:$0xff] }
 0x363   :  { %7396 = vmatprep.subr.bf16.mxu0 %v11258_v4  ;;  %7478 = vmatprep.subr.bf16.mxu1 %v11260_v5  ;;  %v11418_v4 = vcombine.high %v969_v62, %v985_v63  ;;  %v11420_v5 = vcombine.high %v970_v0, %v986_v1  ;;  %v91_v54 = vld [vmem:[%s16712_s2 + $0x1f0] sm:$0xff]  ;;  %v92_v56 = vld [vmem:[%s16712_s2 + $0x1f8] sm:$0xff] }
 0x366   :  { %7397 = vmatpush1.bf16.msra.mxu0 %v11257_v13  ;;  %7479 = vmatpush1.bf16.msra.mxu1 %v11259_v17  ;;  %v11417_v13 = vcombine.low %v969_v62, %v985_v63  ;;  %v11419_v17 = vcombine.low %v970_v0, %v986_v1  ;;  %v107_v62 = vld [vmem:[%s16712_s2 + $0x270] sm:$0xff]  ;;  %v108_v0 = vld [vmem:[%s16712_s2 + $0x278] sm:$0xff] }
 0x367   :  { %7398 = vmatprep.subr.bf16.mxu0 %v11290_v20  ;;  %7480 = vmatprep.subr.bf16.mxu1 %v11292_v21  ;;  %v11450_v20 = vcombine.high %v1001_v6, %v1017_v7  ;;  %v11452_v21 = vcombine.high %v1002_v8, %v1018_v11  ;;  %v123_v63 = vld [vmem:[%s16712_s2 + $0x2f0] sm:$0xff]  ;;  %v124_v1 = vld [vmem:[%s16712_s2 + $0x2f8] sm:$0xff] }
 0x36a   :  { %7399 = vmatpush1.bf16.msra.mxu0 %v11289_v29  ;;  %7481 = vmatpush1.bf16.msra.mxu1 %v11291_v30  ;;  %v11449_v29 = vcombine.low %v1001_v6, %v1017_v7  ;;  %v11451_v30 = vcombine.low %v1002_v8, %v1018_v11  ;;  %v139_v6 = vld [vmem:[%s16712_s2 + $0x370] sm:$0xff]  ;;  %v140_v8 = vld [vmem:[%s16712_s2 + $0x378] sm:$0xff] }
 0x36b   :  { %7400 = vmatprep.subr.bf16.mxu0 %v11322_v15  ;;  %7482 = vmatprep.subr.bf16.mxu1 %v11324_v32  ;;  %v11482_v15 = vcombine.high %v1033_v25, %v1049_v26  ;;  %v11484_v32 = vcombine.high %v1034_v27, %v1050_v28  ;;  %v155_v7 = vld [vmem:[%s16712_s2 + $0x3f0] sm:$0xff]  ;;  %v156_v11 = vld [vmem:[%s16712_s2 + $0x3f8] sm:$0xff] }
 0x36e   :  { %7401 = vmatpush1.bf16.msra.mxu0 %v11321_v41  ;;  %7483 = vmatpush1.bf16.msra.mxu1 %v11323_v42  ;;  %v11481_v41 = vcombine.low %v1033_v25, %v1049_v26  ;;  %v11483_v42 = vcombine.low %v1034_v27, %v1050_v28  ;;  %v171_v25 = vld [vmem:[%s16712_s2 + $0x470] sm:$0xff]  ;;  %v188_v27 = vld [vmem:[%s16712_s2 + $0x4f8] sm:$0xff]  ;;  %v10589_v28 = vcombine.low %v139_v6, %v155_v7 }
 0x36f   :  { %7402 = vmatprep.subr.bf16.mxu0 %v11354_v46  ;;  %7484 = vmatprep.subr.bf16.mxu1 %v11356_v49  ;;  %v10494_v46 = vcombine.high %v43_v33, %v59_v34  ;;  %v10496_v49 = vcombine.high %v44_v37, %v60_v40  ;;  %v187_v26 = vld [vmem:[%s16712_s2 + $0x4f0] sm:$0xff] }
 0x372   :  { %7403 = vmatpush1.bf16.msra.mxu0 %v11353_v58  ;;  %7485 = vmatpush1.bf16.msra.mxu1 %v11355_v59  ;;  %v10493_v58 = vcombine.low %v43_v33, %v59_v34  ;;  %v10495_v59 = vcombine.low %v44_v37, %v60_v40  ;;  %v219_v33 = vld [vmem:[%s16712_s2 + $0x5f0] sm:$0xff]  ;;  %v204_v34 = vld [vmem:[%s16712_s2 + $0x578] sm:$0xff]  ;;  %v10621_v40 = vcombine.low %v171_v25, %v187_v26 }
 0x373   :  { %7404 = vmatprep.subr.bf16.mxu0 %v11386_v60  ;;  %7486 = vmatprep.subr.bf16.mxu1 %v11388_v61  ;;  %v10526_v60 = vcombine.high %v75_v52, %v91_v54  ;;  %v10528_v61 = vcombine.high %v76_v55, %v92_v56  ;;  %v220_v37 = vld [vmem:[%s16712_s2 + $0x5f8] sm:$0xff] }
 0x376   :  { %7405 = vmatpush1.bf16.msra.mxu0 %v11385_v2  ;;  %7487 = vmatpush1.bf16.msra.mxu1 %v11387_v3  ;;  %v10525_v2 = vcombine.low %v75_v52, %v91_v54  ;;  %v10527_v3 = vcombine.low %v76_v55, %v92_v56  ;;  %v251_v52 = vld [vmem:[%s16712_s2 + $0x6f0] sm:$0xff]  ;;  %v236_v54 = vld [vmem:[%s16712_s2 + $0x678] sm:$0xff] }
 0x377   :  { %7406 = vmatprep.subr.bf16.mxu0 %v11418_v4  ;;  %7488 = vmatprep.subr.bf16.mxu1 %v11420_v5  ;;  %v10558_v4 = vcombine.high %v107_v62, %v123_v63  ;;  %v10560_v5 = vcombine.high %v108_v0, %v124_v1  ;;  %v252_v55 = vld [vmem:[%s16712_s2 + $0x6f8] sm:$0xff] }
 0x37a   :  { %7407 = vmatpush1.bf16.msra.mxu0 %v11417_v13  ;;  %7489 = vmatpush1.bf16.msra.mxu1 %v11419_v17  ;;  %v10557_v13 = vcombine.low %v107_v62, %v123_v63  ;;  %v10559_v17 = vcombine.low %v108_v0, %v124_v1  ;;  %v283_v62 = vld [vmem:[%s16712_s2 + $0x7f0] sm:$0xff]  ;;  %v268_v63 = vld [vmem:[%s16712_s2 + $0x778] sm:$0xff] }
 0x37b   :  { %7408 = vmatprep.subr.bf16.mxu0 %v11450_v20  ;;  %7490 = vmatprep.subr.bf16.mxu1 %v11452_v21  ;;  %v10590_v20 = vcombine.high %v139_v6, %v155_v7  ;;  %v10592_v21 = vcombine.high %v140_v8, %v156_v11  ;;  %v284_v0 = vld [vmem:[%s16712_s2 + $0x7f8] sm:$0xff]  ;;  %v315_v6 = vld [vmem:[%s16712_s2 + $0x8f0] sm:$0xff] }
 0x37c   :  { %v300_v7 = vld [vmem:[%s16712_s2 + $0x878] sm:$0xff] }
 0x37e   :  { %7409 = vmatpush1.bf16.msra.mxu0 %v11449_v29  ;;  %7491 = vmatpush1.bf16.msra.mxu1 %v11451_v30  ;;  %v10591_v29 = vcombine.low %v140_v8, %v156_v11  ;;  %v10622_v30 = vcombine.high %v171_v25, %v187_v26  ;;  %v316_v8 = vld [vmem:[%s16712_s2 + $0x8f8] sm:$0xff]  ;;  %v347_v25 = vld [vmem:[%s16712_s2 + $0x9f0] sm:$0xff] }
 0x37f   :  { %7410 = vmatprep.subr.bf16.mxu0 %v11482_v15  ;;  %7492 = vmatprep.subr.bf16.mxu1 %v11484_v32  ;;  %v203_v32 = vld [vmem:[%s16712_s2 + $0x570] sm:$0xff]  ;;  %v332_v26 = vld [vmem:[%s16712_s2 + $0x978] sm:$0xff] }
 0x380   :  { %v10653_v56 = vcombine.low %v203_v32, %v219_v33 }
 0x382   :  { %7411 = vmatpush1.bf16.msra.mxu0 %v11481_v41  ;;  %7493 = vmatpush1.bf16.msra.mxu1 %v11483_v42  ;;  %v10654_v42 = vcombine.high %v203_v32, %v219_v33  ;;  %v379_v32 = vld [vmem:[%s16712_s2 + $0xaf0] sm:$0xff]  ;;  %v364_v33 = vld [vmem:[%s16712_s2 + $0xa78] sm:$0xff] }
 0x383   :  { %7503 = vmatprep.subr.bf16.mxu0 %v10494_v46  ;;  %7585 = vmatprep.subr.bf16.mxu1 %v10496_v49  ;;  %v10656_v46 = vcombine.high %v204_v34, %v220_v37  ;;  %v235_v49 = vld [vmem:[%s16712_s2 + $0x670] sm:$0xff] }
 0x384   :  { %v10685_v1 = vcombine.low %v235_v49, %v251_v52 }
 0x385   :  { %7413 = vmatmul.mubr.bf16.vlgmr.msra.gmra.mrb[24].mxu0 %v12986_v24  ;;  %7495 = vmatmul.mubr.bf16.vlgmr.msra.gmra.mrb[24].mxu1 %v12986_v24 }
 0x386   :  { %7504 = vmatpush1.bf16.msra.mxu0 %v10493_v58  ;;  %7586 = vmatpush1.bf16.msra.mxu1 %v10495_v59  ;;  %v10655_v58 = vcombine.low %v204_v34, %v220_v37  ;;  %v10686_v59 = vcombine.high %v235_v49, %v251_v52  ;;  %v380_v34 = vld [vmem:[%s16712_s2 + $0xaf8] sm:$0xff]  ;;  %v411_v49 = vld [vmem:[%s16712_s2 + $0xbf0] sm:$0xff] }
 0x387   :  { %7505 = vmatprep.subr.bf16.mxu0 %v10526_v60  ;;  %7587 = vmatprep.subr.bf16.mxu1 %v10528_v61  ;;  %v10688_v60 = vcombine.high %v236_v54, %v252_v55  ;;  %v267_v61 = vld [vmem:[%s16712_s2 + $0x770] sm:$0xff]  ;;  %v396_v52 = vld [vmem:[%s16712_s2 + $0xb78] sm:$0xff] }
 0x388   :  { %7535 = vmatprep.mubr.bf16.mxu0 %v12645_v57  ;;  %7617 = vmatprep.mubr.bf16.mxu1 %v12645_v57  ;;  %v172_v57 = vld [vmem:[%s16712_s2 + $0x478] sm:$0xff]  ;;  %v10717_v11 = vcombine.low %v267_v61, %v283_v62 }
 0x389   :  { %v10624_v15 = vcombine.high %v172_v57, %v188_v27  ;;  %v10623_v41 = vcombine.low %v172_v57, %v188_v27  ;;  %v348_v57 = vld [vmem:[%s16712_s2 + $0x9f8] sm:$0xff] }
 0x38a   :  { %7506 = vmatpush1.bf16.msra.mxu0 %v10525_v2  ;;  %7588 = vmatpush1.bf16.msra.mxu1 %v10527_v3  ;;  %v10687_v2 = vcombine.low %v236_v54, %v252_v55  ;;  %v10718_v3 = vcombine.high %v267_v61, %v283_v62  ;;  %v412_v54 = vld [vmem:[%s16712_s2 + $0xbf8] sm:$0xff]  ;;  %v443_v61 = vld [vmem:[%s16712_s2 + $0xcf0] sm:$0xff] }
 0x38b   :  { %7507 = vmatprep.subr.bf16.mxu0 %v10558_v4  ;;  %7589 = vmatprep.subr.bf16.mxu1 %v10560_v5  ;;  %v10720_v4 = vcombine.high %v268_v63, %v284_v0  ;;  %v299_v5 = vld [vmem:[%s16712_s2 + $0x870] sm:$0xff]  ;;  %v428_v62 = vld [vmem:[%s16712_s2 + $0xc78] sm:$0xff] }
 0x38c   :  { %v10749_v27 = vcombine.low %v299_v5, %v315_v6 }
 0x38e   :  { %7508 = vmatpush1.bf16.msra.mxu0 %v10557_v13  ;;  %7590 = vmatpush1.bf16.msra.mxu1 %v10559_v17  ;;  %v10719_v13 = vcombine.low %v268_v63, %v284_v0  ;;  %v10750_v17 = vcombine.high %v299_v5, %v315_v6  ;;  %v444_v63 = vld [vmem:[%s16712_s2 + $0xcf8] sm:$0xff]  ;;  %v475_v5 = vld [vmem:[%s16712_s2 + $0xdf0] sm:$0xff] }
 0x38f   :  { %7509 = vmatprep.subr.bf16.mxu0 %v10590_v20  ;;  %7591 = vmatprep.subr.bf16.mxu1 %v10592_v21  ;;  %v10752_v20 = vcombine.high %v300_v7, %v316_v8  ;;  %v331_v21 = vld [vmem:[%s16712_s2 + $0x970] sm:$0xff]  ;;  %v460_v6 = vld [vmem:[%s16712_s2 + $0xd78] sm:$0xff] }
 0x390   :  { %v10781_v37 = vcombine.low %v331_v21, %v347_v25 }
 0x392   :  { %7510 = vmatpush1.bf16.msra.mxu0 %v10589_v28  ;;  %7592 = vmatpush1.bf16.msra.mxu1 %v10591_v29  ;;  %v10751_v28 = vcombine.low %v300_v7, %v316_v8  ;;  %v10782_v29 = vcombine.high %v331_v21, %v347_v25  ;;  %v476_v7 = vld [vmem:[%s16712_s2 + $0xdf8] sm:$0xff]  ;;  %v507_v21 = vld [vmem:[%s16712_s2 + $0xef0] sm:$0xff] }
 0x393   :  { %7511 = vmatprep.subr.bf16.mxu0 %v10622_v30  ;;  %7593 = vmatprep.subr.bf16.mxu1 %v10624_v15  ;;  %v10784_v30 = vcombine.high %v332_v26, %v348_v57  ;;  %v363_v15 = vld [vmem:[%s16712_s2 + $0xa70] sm:$0xff]  ;;  %v492_v25 = vld [vmem:[%s16712_s2 + $0xe78] sm:$0xff] }
 0x394   :  { %v10813_v55 = vcombine.low %v363_v15, %v379_v32 }
 0x396   :  { %7512 = vmatpush1.bf16.msra.mxu0 %v10621_v40  ;;  %7594 = vmatpush1.bf16.msra.mxu1 %v10623_v41  ;;  %v10783_v40 = vcombine.low %v332_v26, %v348_v57  ;;  %v10814_v41 = vcombine.high %v363_v15, %v379_v32  ;;  %v508_v26 = vld [vmem:[%s16712_s2 + $0xef8] sm:$0xff]  ;;  %v539_v15 = vld [vmem:[%s16712_s2 + $0xff0] sm:$0xff] }
 0x397   :  { %7513 = vmatprep.subr.bf16.mxu0 %v10654_v42  ;;  %7595 = vmatprep.subr.bf16.mxu1 %v10656_v46  ;;  %v10816_v42 = vcombine.high %v364_v33, %v380_v34  ;;  %v395_v46 = vld [vmem:[%s16712_s2 + $0xb70] sm:$0xff]  ;;  %v524_v32 = vld [vmem:[%s16712_s2 + $0xf78] sm:$0xff] }
 0x398   :  { %v10845_v0 = vcombine.low %v395_v46, %v411_v49 }
 0x39a   :  { %7514 = vmatpush1.bf16.msra.mxu0 %v10653_v56  ;;  %7596 = vmatpush1.bf16.msra.mxu1 %v10655_v58  ;;  %v10815_v56 = vcombine.low %v364_v33, %v380_v34  ;;  %v10846_v58 = vcombine.high %v395_v46, %v411_v49  ;;  %v540_v33 = vld [vmem:[%s16712_s2 + $0xff8] sm:$0xff]  ;;  %v571_v46 = vld [vmem:[%s16712_s2 + $0x10f0] sm:$0xff] }
 0x39b   :  { %7515 = vmatprep.subr.bf16.mxu0 %v10686_v59  ;;  %7597 = vmatprep.subr.bf16.mxu1 %v10688_v60  ;;  %v10848_v59 = vcombine.high %v396_v52, %v412_v54  ;;  %v427_v60 = vld [vmem:[%s16712_s2 + $0xc70] sm:$0xff]  ;;  %v556_v49 = vld [vmem:[%s16712_s2 + $0x1078] sm:$0xff] }
 0x39c   :  { %v10877_v8 = vcombine.low %v427_v60, %v443_v61 }
 0x39e   :  { %7516 = vmatpush1.bf16.msra.mxu0 %v10685_v1  ;;  %7598 = vmatpush1.bf16.msra.mxu1 %v10687_v2  ;;  %v10847_v1 = vcombine.low %v396_v52, %v412_v54  ;;  %v10878_v2 = vcombine.high %v427_v60, %v443_v61  ;;  %v572_v52 = vld [vmem:[%s16712_s2 + $0x10f8] sm:$0xff]  ;;  %v603_v60 = vld [vmem:[%s16712_s2 + $0x11f0] sm:$0xff] }
 0x39f   :  { %7517 = vmatprep.subr.bf16.mxu0 %v10718_v3  ;;  %7599 = vmatprep.subr.bf16.mxu1 %v10720_v4  ;;  %v10880_v3 = vcombine.high %v428_v62, %v444_v63  ;;  %v459_v4 = vld [vmem:[%s16712_s2 + $0xd70] sm:$0xff]  ;;  %v588_v61 = vld [vmem:[%s16712_s2 + $0x1178] sm:$0xff] }
 0x3a0   :  { %v10909_v57 = vcombine.low %v459_v4, %v475_v5 }
 0x3a2   :  { %7518 = vmatpush1.bf16.msra.mxu0 %v10717_v11  ;;  %7600 = vmatpush1.bf16.msra.mxu1 %v10719_v13  ;;  %v10879_v11 = vcombine.low %v428_v62, %v444_v63  ;;  %v10910_v13 = vcombine.high %v459_v4, %v475_v5  ;;  %v604_v62 = vld [vmem:[%s16712_s2 + $0x11f8] sm:$0xff]  ;;  %v635_v4 = vld [vmem:[%s16712_s2 + $0x12f0] sm:$0xff] }
 0x3a3   :  { %7519 = vmatprep.subr.bf16.mxu0 %v10750_v17  ;;  %7601 = vmatprep.subr.bf16.mxu1 %v10752_v20  ;;  %v10912_v17 = vcombine.high %v460_v6, %v476_v7  ;;  %v491_v20 = vld [vmem:[%s16712_s2 + $0xe70] sm:$0xff]  ;;  %v620_v5 = vld [vmem:[%s16712_s2 + $0x1278] sm:$0xff] }
 0x3a4   :  { %v10941_v34 = vcombine.low %v491_v20, %v507_v21 }
 0x3a6   :  { %7520 = vmatpush1.bf16.msra.mxu0 %v10749_v27  ;;  %7602 = vmatpush1.bf16.msra.mxu1 %v10751_v28  ;;  %v10911_v27 = vcombine.low %v460_v6, %v476_v7  ;;  %v10942_v28 = vcombine.high %v491_v20, %v507_v21  ;;  %v636_v6 = vld [vmem:[%s16712_s2 + $0x12f8] sm:$0xff]  ;;  %v667_v20 = vld [vmem:[%s16712_s2 + $0x13f0] sm:$0xff] }
 0x3a7   :  { %7521 = vmatprep.subr.bf16.mxu0 %v10782_v29  ;;  %7603 = vmatprep.subr.bf16.mxu1 %v10784_v30  ;;  %v10944_v29 = vcombine.high %v492_v25, %v508_v26  ;;  %v523_v30 = vld [vmem:[%s16712_s2 + $0xf70] sm:$0xff]  ;;  %v668_v21 = vld [vmem:[%s16712_s2 + $0x13f8] sm:$0xff] }
 0x3a8   :  { %v10973_v54 = vcombine.low %v523_v30, %v539_v15 }
 0x3aa   :  { %7522 = vmatpush1.bf16.msra.mxu0 %v10781_v37  ;;  %7604 = vmatpush1.bf16.msra.mxu1 %v10783_v40  ;;  %v10943_v37 = vcombine.low %v492_v25, %v508_v26  ;;  %v10974_v40 = vcombine.high %v523_v30, %v539_v15  ;;  %v11071_v26 = vcombine.low %v620_v5, %v636_v6  ;;  %v700_v30 = vld [vmem:[%s16712_s2 + $0x14f8] sm:$0xff] }
 0x3ab   :  { %7523 = vmatprep.subr.bf16.mxu0 %v10814_v41  ;;  %7605 = vmatprep.subr.bf16.mxu1 %v10816_v42  ;;  %v10976_v41 = vcombine.high %v524_v32, %v540_v33  ;;  %v555_v42 = vld [vmem:[%s16712_s2 + $0x1070] sm:$0xff] }
 0x3ac   :  { %v11005_v63 = vcombine.low %v555_v42, %v571_v46 }
 0x3ae   :  { %7524 = vmatpush1.bf16.msra.mxu0 %v10813_v55  ;;  %7606 = vmatpush1.bf16.msra.mxu1 %v10815_v56  ;;  %v10975_v55 = vcombine.low %v524_v32, %v540_v33  ;;  %v11006_v56 = vcombine.high %v555_v42, %v571_v46  ;;  %v732_v42 = vld [vmem:[%s16712_s2 + $0x15f8] sm:$0xff] }
 0x3af   :  { %7525 = vmatprep.subr.bf16.mxu0 %v10846_v58  ;;  %7607 = vmatprep.subr.bf16.mxu1 %v10848_v59  ;;  %v11008_v58 = vcombine.high %v556_v49, %v572_v52  ;;  %v587_v59 = vld [vmem:[%s16712_s2 + $0x1170] sm:$0xff] }
 0x3b0   :  { %v11037_v7 = vcombine.low %v587_v59, %v603_v60 }
 0x3b2   :  { %7526 = vmatpush1.bf16.msra.mxu0 %v10845_v0  ;;  %7608 = vmatpush1.bf16.msra.mxu1 %v10847_v1  ;;  %v11007_v0 = vcombine.low %v556_v49, %v572_v52  ;;  %v11038_v1 = vcombine.high %v587_v59, %v603_v60  ;;  %v764_v59 = vld [vmem:[%s16712_s2 + $0x16f8] sm:$0xff] }
 0x3b3   :  { %7527 = vmatprep.subr.bf16.mxu0 %v10878_v2  ;;  %7609 = vmatprep.subr.bf16.mxu1 %v10880_v3  ;;  %v11040_v2 = vcombine.high %v588_v61, %v604_v62  ;;  %v619_v3 = vld [vmem:[%s16712_s2 + $0x1270] sm:$0xff] }
 0x3b4   :  { %v11069_v25 = vcombine.low %v619_v3, %v635_v4 }
 0x3b6   :  { %7528 = vmatpush1.bf16.msra.mxu0 %v10877_v8  ;;  %7610 = vmatpush1.bf16.msra.mxu1 %v10879_v11  ;;  %v11039_v8 = vcombine.low %v588_v61, %v604_v62  ;;  %v11070_v11 = vcombine.high %v619_v3, %v635_v4 }
 0x3b7   :  { %7529 = vmatprep.subr.bf16.mxu0 %v10910_v13  ;;  %7611 = vmatprep.subr.bf16.mxu1 %v10912_v17  ;;  %v11072_v13 = vcombine.high %v620_v5, %v636_v6  ;;  %v651_v17 = vld [vmem:[%s16712_s2 + $0x1370] sm:$0xff]  ;;  %v780_v5 = vld [vmem:[%s16712_s2 + $0x1778] sm:$0xff] }
 0x3b8   :  { %v11101_v15 = vcombine.low %v651_v17, %v667_v20  ;;  %v796_v6 = vld [vmem:[%s16712_s2 + $0x17f8] sm:$0xff] }
 0x3ba   :  { %7530 = vmatpush1.bf16.msra.mxu0 %v10909_v57  ;;  %7612 = vmatpush1.bf16.msra.mxu1 %v10911_v27  ;;  %v11102_v57 = vcombine.high %v651_v17, %v667_v20 }
 0x3bb   :  { %7531 = vmatprep.subr.bf16.mxu0 %v10942_v28  ;;  %7613 = vmatprep.subr.bf16.mxu1 %v10944_v29  ;;  %v683_v28 = vld [vmem:[%s16712_s2 + $0x1470] sm:$0xff] }
 0x3bc   :  { %v699_v29 = vld [vmem:[%s16712_s2 + $0x14f0] sm:$0xff] }
 0x3bd   :  { %v11134_v33 = vcombine.high %v683_v28, %v699_v29  ;;  %v11133_v46 = vcombine.low %v683_v28, %v699_v29  ;;  %v828_v28 = vld [vmem:[%s16712_s2 + $0x18f8] sm:$0xff] }
 0x3be   :  { %7532 = vmatpush1.bf16.msra.mxu0 %v10941_v34  ;;  %7614 = vmatpush1.bf16.msra.mxu1 %v10943_v37  ;;  %v715_v37 = vld [vmem:[%s16712_s2 + $0x1570] sm:$0xff] }
 0x3bf   :  { %7533 = vmatprep.subr.bf16.mxu0 %v10974_v40  ;;  %7615 = vmatprep.subr.bf16.mxu1 %v10976_v41  ;;  %v731_v40 = vld [vmem:[%s16712_s2 + $0x15f0] sm:$0xff]  ;;  %v716_v41 = vld [vmem:[%s16712_s2 + $0x1578] sm:$0xff] }
 0x3c0   :  { %v11166_v52 = vcombine.high %v715_v37, %v731_v40  ;;  %v11165_v60 = vcombine.low %v715_v37, %v731_v40  ;;  %v11167_v61 = vcombine.low %v716_v41, %v732_v42  ;;  %v860_v37 = vld [vmem:[%s16712_s2 + $0x19f8] sm:$0xff] }
 0x3c2   :  { %7534 = vmatpush1.bf16.msra.mxu0 %v10973_v54  ;;  %7616 = vmatpush1.bf16.msra.mxu1 %v10975_v55  ;;  %v11168_v54 = vcombine.high %v716_v41, %v732_v42  ;;  %v747_v55 = vld [vmem:[%s16712_s2 + $0x1670] sm:$0xff] }
 0x3c3   :  { %7544 = vmatprep.subr.bf16.mxu0 %v11006_v56  ;;  %7626 = vmatprep.subr.bf16.mxu1 %v11008_v58  ;;  %v763_v56 = vld [vmem:[%s16712_s2 + $0x16f0] sm:$0xff]  ;;  %v748_v58 = vld [vmem:[%s16712_s2 + $0x1678] sm:$0xff] }
 0x3c4   :  { %v11198_v62 = vcombine.high %v747_v55, %v763_v56  ;;  %v11199_v20 = vcombine.low %v748_v58, %v764_v59 }
 0x3c5   :  { %7536 = vmatmul.mubr.bf16.vlgmr.msra.gmra.mrb[28].mxu0 %v12771_v12  ;;  %7618 = vmatmul.mubr.bf16.vlgmr.msra.gmra.mrb[28].mxu1 %v12771_v12  ;;  %v652_v12 = vld [vmem:[%s16712_s2 + $0x1378] sm:$0xff] }
 0x3c6   :  { %7545 = vmatpush1.bf16.msra.mxu0 %v11005_v63  ;;  %7627 = vmatpush1.bf16.msra.mxu1 %v11007_v0  ;;  %v11104_v27 = vcombine.high %v652_v12, %v668_v21  ;;  %v11103_v32 = vcombine.low %v652_v12, %v668_v21  ;;  %v11200_v0 = vcombine.high %v748_v58, %v764_v59 }
 0x3c7   :  { %7546 = vmatprep.subr.bf16.mxu0 %v11038_v1  ;;  %7628 = vmatprep.subr.bf16.mxu1 %v11040_v2  ;;  %v779_v1 = vld [vmem:[%s16712_s2 + $0x1770] sm:$0xff] }
 0x3c8   :  { %7576 = vmatprep.mubr.bf16.mxu0 %v12798_v23  ;;  %7658 = vmatprep.mubr.bf16.mxu1 %v12798_v23  ;;  %v684_v23 = vld [vmem:[%s16712_s2 + $0x1478] sm:$0xff]  ;;  %v795_v2 = vld [vmem:[%s16712_s2 + $0x17f0] sm:$0xff] }
 0x3c9   :  { %v11136_v34 = vcombine.high %v684_v23, %v700_v30  ;;  %v11135_v49 = vcombine.low %v684_v23, %v700_v30  ;;  %v11230_v12 = vcombine.high %v779_v1, %v795_v2  ;;  %v11229_v29 = vcombine.low %v779_v1, %v795_v2  ;;  %v924_v1 = vld [vmem:[%s16712_s2 + $0x1bf8] sm:$0xff] }
 0x3ca   :  { %7547 = vmatpush1.bf16.msra.mxu0 %v11037_v7  ;;  %7629 = vmatpush1.bf16.msra.mxu1 %v11039_v8  ;;  %v11231_v23 = vcombine.low %v780_v5, %v796_v6 }
 0x3cb   :  { %7548 = vmatprep.subr.bf16.mxu0 %v11070_v11  ;;  %7630 = vmatprep.subr.bf16.mxu1 %v11072_v13  ;;  %v11197_v11 = vcombine.low %v747_v55, %v763_v56  ;;  %v892_v55 = vld [vmem:[%s16712_s2 + $0x1af8] sm:$0xff] }
 0x3ce   :  { %7549 = vmatpush1.bf16.msra.mxu0 %v11069_v25  ;;  %7631 = vmatpush1.bf16.msra.mxu1 %v11071_v26  ;;  %v11232_v25 = vcombine.high %v780_v5, %v796_v6  ;;  %v811_v26 = vld [vmem:[%s16712_s2 + $0x1870] sm:$0xff] }
 0x3cf   :  { %7550 = vmatprep.subr.bf16.mxu0 %v11102_v57  ;;  %7632 = vmatprep.subr.bf16.mxu1 %v11104_v27  ;;  %v827_v57 = vld [vmem:[%s16712_s2 + $0x18f0] sm:$0xff]  ;;  %v812_v27 = vld [vmem:[%s16712_s2 + $0x1878] sm:$0xff] }
 0x3d0   :  { %v11262_v30 = vcombine.high %v811_v26, %v827_v57  ;;  %v11261_v40 = vcombine.low %v811_v26, %v827_v57  ;;  %v11263_v41 = vcombine.low %v812_v27, %v828_v28 }
 0x3d2   :  { %7551 = vmatpush1.bf16.msra.mxu0 %v11101_v15  ;;  %7633 = vmatpush1.bf16.msra.mxu1 %v11103_v32  ;;  %v11264_v15 = vcombine.high %v812_v27, %v828_v28  ;;  %v843_v32 = vld [vmem:[%s16712_s2 + $0x1970] sm:$0xff] }
 0x3d3   :  { %7552 = vmatprep.subr.bf16.mxu0 %v11134_v33  ;;  %7634 = vmatprep.subr.bf16.mxu1 %v11136_v34  ;;  %v859_v33 = vld [vmem:[%s16712_s2 + $0x19f0] sm:$0xff]  ;;  %v844_v34 = vld [vmem:[%s16712_s2 + $0x1978] sm:$0xff] }
 0x3d4   :  { %v11294_v42 = vcombine.high %v843_v32, %v859_v33  ;;  %v11293_v56 = vcombine.low %v843_v32, %v859_v33  ;;  %v11295_v58 = vcombine.low %v844_v34, %v860_v37  ;;  %v971_v27 = vld [vmem:[%s16712_s2 + $0x1d70] sm:$0xff] }
 0x3d5   :  { %v987_v28 = vld [vmem:[%s16712_s2 + $0x1df0] sm:$0xff] }
 0x3d6   :  { %7553 = vmatpush1.bf16.msra.mxu0 %v11133_v46  ;;  %7635 = vmatpush1.bf16.msra.mxu1 %v11135_v49  ;;  %v11296_v46 = vcombine.high %v844_v34, %v860_v37  ;;  %v875_v49 = vld [vmem:[%s16712_s2 + $0x1a70] sm:$0xff]  ;;  %v11422_v33 = vcombine.high %v971_v27, %v987_v28 }
 0x3d7   :  { %7554 = vmatprep.subr.bf16.mxu0 %v11166_v52  ;;  %7636 = vmatprep.subr.bf16.mxu1 %v11168_v54  ;;  %v891_v52 = vld [vmem:[%s16712_s2 + $0x1af0] sm:$0xff]  ;;  %v876_v54 = vld [vmem:[%s16712_s2 + $0x1a78] sm:$0xff] }
 0x3d8   :  { %v15640_v63 = vpop.f32.mrb[20].mxu0  ;;  %v15648_v3 = vpop.f32.mrb[20].mxu1  ;;  %v11326_v59 = vcombine.high %v875_v49, %v891_v52  ;;  %v11325_v2 = vcombine.low %v875_v49, %v891_v52  ;;  %v11327_v5 = vcombine.low %v876_v54, %v892_v55  ;;  %v1003_v37 = vld [vmem:[%s16712_s2 + $0x1e70] sm:$0xff]  ;;  %v15752_v49 = vld [vmem:[%s16713_s3] sm:$0xff] }
 0x3d9   :  { %v15650_v4 = vpop.f32.mrb[21].mxu0  ;;  %v15658_v7 = vpop.f32.mrb[21].mxu1 }
 0x3da   :  { %v7254_v8 = vpop.f32.mrb[22].mxu0  ;;  %7555 = vmatpush1.bf16.msra.mxu0 %v11165_v60  ;;  %v7336_v13 = vpop.f32.mrb[22].mxu1  ;;  %7637 = vmatpush1.bf16.msra.mxu1 %v11167_v61  ;;  %v11328_v60 = vcombine.high %v876_v54, %v892_v55  ;;  %v907_v61 = vld [vmem:[%s16712_s2 + $0x1b70] sm:$0xff]  ;;  %v11421_v54 = vcombine.low %v971_v27, %v987_v28  ;;  %v12205_v28 = vld [vmem:[%s16714_s4 + $0xc8] sm:$0xff]  }
 0x3db   :  { %v7255_v17 = vpop.f32.mrb[23].mxu0  ;;  %7556 = vmatprep.subr.bf16.mxu0 %v11198_v62  ;;  %v7337_v21 = vpop.f32.mrb[23].mxu1  ;;  %7638 = vmatprep.subr.bf16.mxu1 %v11200_v0  ;;  %v923_v62 = vld [vmem:[%s16712_s2 + $0x1bf0] sm:$0xff]  ;;  %v908_v0 = vld [vmem:[%s16712_s2 + $0x1b78] sm:$0xff] }
 0x3dc   :  { %v11358_v6 = vcombine.high %v907_v61, %v923_v62  ;;  %v11360_v8 = vcombine.high %v908_v0, %v924_v1  ;;  %v955_v13 = vld [vmem:[%s16712_s2 + $0x1cf0] sm:$0xff]  ;;  %v1061_v17 = vlaneseq  ;;  %v11357_v21 = vcombine.low %v907_v61, %v923_v62  ;;  %v1036_v62 = vld [vmem:[%s16712_s2 + $0x1f78] sm:$0xff] }
 0x3de   :  { %7557 = vmatpush1.bf16.msra.mxu0 %v11197_v11  ;;  %7639 = vmatpush1.bf16.msra.mxu1 %v11199_v20  ;;  %v939_v11 = vld [vmem:[%s16712_s2 + $0x1c70] sm:$0xff]  ;;  %v940_v20 = vld [vmem:[%s16712_s2 + $0x1c78] sm:$0xff] }
 0x3df   :  { %7558 = vmatprep.subr.bf16.mxu0 %v11230_v12  ;;  %7640 = vmatprep.subr.bf16.mxu1 %v11232_v25  ;;  %v956_v12 = vld [vmem:[%s16712_s2 + $0x1cf8] sm:$0xff]  ;;  %v11359_v25 = vcombine.low %v908_v0, %v924_v1  ;;  %v11390_v26 = vcombine.high %v939_v11, %v955_v13 }
 0x3e0   :  { %v11392_v57 = vcombine.high %v940_v20, %v956_v12  ;;  %v11391_v32 = vcombine.low %v940_v20, %v956_v12  ;;  %v1052_v0 = vld [vmem:[%s16712_s2 + $0x1ff8] sm:$0xff]  ;;  %v12200_v12 = vld [vmem:[%s16714_s4 + $0x40] sm:$0xff]  }
 0x3e1   :  { %v11487_v20 = vcombine.low %v1036_v62, %v1052_v0 }
 0x3e2   :  { %7559 = vmatpush1.bf16.msra.mxu0 %v11229_v29  ;;  %7641 = vmatpush1.bf16.msra.mxu1 %v11231_v23  ;;  %v15726_v29 = vshrl.u32 %v1061_v17, 7  ;;  %v972_v23 = vld [vmem:[%s16712_s2 + $0x1d78] sm:$0xff] }
 0x3e3   :  { %7560 = vmatprep.subr.bf16.mxu0 %v11262_v30  ;;  %7642 = vmatprep.subr.bf16.mxu1 %v11264_v15  ;;  %v988_v30 = vld [vmem:[%s16712_s2 + $0x1df8] sm:$0xff]  ;;  %v11389_v15 = vcombine.low %v939_v11, %v955_v13 }
 0x3e4   :  { %v11424_v34 = vcombine.high %v972_v23, %v988_v30  ;;  %v15755_v52 = vsub.s32 3, %v15726_v29  ;;  %v11423_v55 = vcombine.low %v972_v23, %v988_v30  ;;  %v12206_v30 = vld [vmem:[%s16714_s4 + $0x8] sm:$0xff]  }
 0x3e6   :  { %7561 = vmatpush1.bf16.msra.mxu0 %v11261_v40  ;;  %7643 = vmatpush1.bf16.msra.mxu1 %v11263_v41  ;;  %v1019_v40 = vld [vmem:[%s16712_s2 + $0x1ef0] sm:$0xff]  ;;  %v15741_v41 = vsub.s32 1, %v15726_v29  ;;  %v1076_v1 = vrot.slane %v15752_v49, %v15755_v52 }
 0x3e7   :  { %7562 = vmatprep.subr.bf16.mxu0 %v11294_v42  ;;  %7644 = vmatprep.subr.bf16.mxu1 %v11296_v46  ;;  %v1004_v42 = vld [vmem:[%s16712_s2 + $0x1e78] sm:$0xff] }
 0x3e8   :  { %v1020_v46 = vld [vmem:[%s16712_s2 + $0x1ef8] sm:$0xff]  ;;  %v1068_v61 = vrot.slane %v15752_v49, %v15741_v41  ;;  %v12101_v13 = vadd.f32 %v13658_v39, %v1076_v1  ;;  %v12203_v39 = vld [vmem:[%s16714_s4 + $0x80] sm:$0xff]   ;;  %v15853_v1 = vsub.s32 7, %v15726_v29 }
 0x3ea   :  { %7563 = vmatpush1.bf16.msra.mxu0 %v11293_v56  ;;  %7645 = vmatpush1.bf16.msra.mxu1 %v11295_v58  ;;  %v11454_v56 = vcombine.high %v1003_v37, %v1019_v40  ;;  %v11456_v58 = vcombine.high %v1004_v42, %v1020_v46  ;;  %v12099_v11 = vadd.f32 %v13650_v36, %v1068_v61  ;;  %v12202_v36 = vld [vmem:[%s16714_s4] sm:$0xff]   ;;  %v15844_v61 = vsub.s32 2, %v15726_v29 }
 0x3eb   :  { %7564 = vmatprep.subr.bf16.mxu0 %v11326_v59  ;;  %7646 = vmatprep.subr.bf16.mxu1 %v11328_v60  ;;  %v1035_v59 = vld [vmem:[%s16712_s2 + $0x1f70] sm:$0xff] }
 0x3ec   :  { %v1051_v60 = vld [vmem:[%s16712_s2 + $0x1ff0] sm:$0xff] }
 0x3ed   :  { %v11485_v17 = vcombine.low %v1035_v59, %v1051_v60 }
 0x3ee   :  { %7565 = vmatpush1.bf16.msra.mxu0 %v11325_v2  ;;  %7647 = vmatpush1.bf16.msra.mxu1 %v11327_v5  ;;  %v11453_v2 = vcombine.low %v1003_v37, %v1019_v40  ;;  %v11455_v5 = vcombine.low %v1004_v42, %v1020_v46  ;;  %v12212_v37 = vld [vmem:[%s16714_s4 + $0x58] sm:$0xff]  }
 0x3ef   :  { %7566 = vmatprep.subr.bf16.mxu0 %v11358_v6  ;;  %7648 = vmatprep.subr.bf16.mxu1 %v11360_v8  ;;  %v11486_v6 = vcombine.high %v1035_v59, %v1051_v60  ;;  %v11488_v8 = vcombine.high %v1036_v62, %v1052_v0  ;;  %v12213_v40 = vld [vmem:[%s16714_s4 + $0xd8] sm:$0xff]   ;;  %v12219_v59 = vld [vmem:[%s16714_s4 + $0xa0] sm:$0xff]   ;;  %v12220_v60 = vld [vmem:[%s16714_s4 + $0x68] sm:$0xff]   ;;  %v15850_v0 = vsub.s32 5, %v15726_v29 }
 0x3f0   :  { %v12214_v42 = vld [vmem:[%s16714_s4 + $0x18] sm:$0xff]   ;;  %v12221_v62 = vld [vmem:[%s16714_s4 + $0xe8] sm:$0xff]  }
 0x3f1   :  { %v12215_v46 = vld [vmem:[%s16714_s4 + $0x98] sm:$0xff]  }
 0x3f2   :  { %7567 = vmatpush1.bf16.msra.mxu0 %v11357_v21  ;;  %7649 = vmatpush1.bf16.msra.mxu1 %v11359_v25  ;;  %v12201_v21 = vld [vmem:[%s16714_s4 + $0xc0] sm:$0xff]   ;;  %v7668_v25 = vmax.f32 %v12099_v11, 0.0  ;;  %v1072_v11 = vrot.slane %v15752_v49, %v15844_v61 }
 0x3f3   :  { %7568 = vmatprep.subr.bf16.mxu0 %v11390_v26  ;;  %7650 = vmatprep.subr.bf16.mxu1 %v11392_v57  ;;  %v7670_v26 = vmax.f32 %v12101_v13, 0.0  ;;  %v12204_v57 = vld [vmem:[%s16714_s4 + $0x48] sm:$0xff]   ;;  %v12225_v13 = vld [vmem:[%s16714_s4 + $0xf0] sm:$0xff]  }
 0x3f4   :  { %v7700_v27 = vpack.c.bf16 %v7668_v25, %v7668_v25  ;;  %v12227_v25 = vld [vmem:[%s16714_s4 + $0xb0] sm:$0xff]  }
 0x3f5   :  { %v7702_v23 = vpack.c.bf16 %v7670_v26, %v7670_v26  ;;  %v12228_v26 = vld [vmem:[%s16714_s4 + $0x78] sm:$0xff]  }
 0x3f6   :  { %7569 = vmatpush1.bf16.msra.mxu0 %v11389_v15  ;;  %7651 = vmatpush1.bf16.msra.mxu1 %v11391_v32  ;;  %v12207_v15 = vld [vmem:[%s16714_s4 + $0x88] sm:$0xff]   ;;  %v12208_v32 = vld [vmem:[%s16714_s4 + $0x50] sm:$0xff]  }
 0x3f7   :  { %7570 = vmatprep.subr.bf16.mxu0 %v11422_v33  ;;  %7652 = vmatprep.subr.bf16.mxu1 %v11424_v34  ;;  %v12210_v33 = vld [vmem:[%s16714_s4 + $0x10] sm:$0xff]  }
 0x3f8   :  { %v12211_v34 = vld [vmem:[%s16714_s4 + $0x90] sm:$0xff]  }
 0x3fa   :  { %7571 = vmatpush1.bf16.msra.mxu0 %v11421_v54  ;;  %7653 = vmatpush1.bf16.msra.mxu1 %v11423_v55  ;;  %v12216_v54 = vld [vmem:[%s16714_s4 + $0x60] sm:$0xff]  }
 0x3fb   :  { %7572 = vmatprep.subr.bf16.mxu0 %v11454_v56  ;;  %7654 = vmatprep.subr.bf16.mxu1 %v11456_v58  ;;  %v12217_v55 = vld [vmem:[%s16714_s4 + $0xe0] sm:$0xff]   ;;  %v15835_v58 = vsub.s32 0, %v15726_v29 }
 0x3fc   :  { %v12218_v56 = vld [vmem:[%s16714_s4 + $0x20] sm:$0xff]  }
 0x3fe   :  { %7573 = vmatpush1.bf16.msra.mxu0 %v11453_v2  ;;  %7655 = vmatpush1.bf16.msra.mxu1 %v11455_v5  ;;  %v12222_v2 = vld [vmem:[%s16714_s4 + $0x28] sm:$0xff]   ;;  %v1064_v5 = vrot.slane %v15752_v49, %v15835_v58 }
 0x3ff   :  { %7574 = vmatprep.subr.bf16.mxu0 %v11486_v6  ;;  %7656 = vmatprep.subr.bf16.mxu1 %v11488_v8  ;;  %v12223_v6 = vld [vmem:[%s16714_s4 + $0xa8] sm:$0xff]   ;;  %v12224_v8 = vld [vmem:[%s16714_s4 + $0x70] sm:$0xff]  }
 0x402   :  { %7575 = vmatpush1.bf16.msra.mxu0 %v11485_v17  ;;  %7657 = vmatpush1.bf16.msra.mxu1 %v11487_v20  ;;  %v1084_v17 = vrot.slane %v15752_v49, %v15850_v0  ;;  %v1092_v20 = vrot.slane %v15752_v49, %v15853_v1 }
 0x403   :  { %11746 = vmatprep.subr.bf16.mxu0 %v12200_v12  ;;  %11768 = vmatprep.subr.bf16.mxu1 %v12201_v21  ;;  %v12226_v12 = vld [vmem:[%s16714_s4 + $0x30] sm:$0xff]   ;;  %v12098_v21 = vadd.f32 %v13640_v31, %v1064_v5  ;;  %v12245_v5 = vld [vmem:[%s16714_s4 + $0x1d8] sm:$0xff]  }
 0x404   :  { %v12105_v31 = vadd.f32 %v14058_v18, %v1092_v20  ;;  %v15955_v20 = vsub.s32 4, %v15726_v29 }
 0x405   :  { %7577 = vmatmul.mubr.bf16.vlgmr.msra.gmra.mrb[28].mxu0 %v12986_v24  ;;  %7659 = vmatmul.mubr.bf16.vlgmr.msra.gmra.mrb[28].mxu1 %v12986_v24  ;;  %v12209_v24 = vld [vmem:[%s16714_s4 + $0xd0] sm:$0xff]  }
 0x406   :  { %11747 = vmatpush3.bf16.msra.mxu0 %v12202_v36  ;;  %9818 = vmatprep.mubr.bf16.mxu0 %v7700_v27  ;;  %v12100_v36 = vadd.f32 %v13648_v35, %v1072_v11  ;;  %v12230_v27 = vld [vmem:[%s16714_s4 + $0x38] sm:$0xff]   ;;  %v12248_v11 = vld [vmem:[%s16714_s4 + $0x160] sm:$0xff]  }
 0x407   :  { %11769 = vmatpush3.bf16.msra.mxu1 %v12203_v39  ;;  %9858 = vmatprep.mubr.bf16.mxu1 %v7702_v23  ;;  %v12229_v39 = vld [vmem:[%s16714_s4 + $0xf8] sm:$0xff]   ;;  %v12232_v23 = vld [vmem:[%s16714_s4 + $0x140] sm:$0xff]  }
 0x408   :  { %11748 = vmatprep.subr.bf16.mxu0 %v12204_v57  ;;  %11770 = vmatprep.subr.bf16.mxu1 %v12205_v28  ;;  %v12103_v57 = vadd.f32 %v14050_v16, %v1084_v17  ;;  %v7667_v28 = vmax.f32 %v12098_v21, 0.0  ;;  %v12231_v35 = vld [vmem:[%s16714_s4 + $0xb8] sm:$0xff]   ;;  %v12233_v16 = vld [vmem:[%s16714_s4 + $0x1c0] sm:$0xff]   ;;  %v12252_v21 = vld [vmem:[%s16714_s4 + $0x168] sm:$0xff]  }
 0x409   :  { %v12250_v17 = vld [vmem:[%s16714_s4 + $0x120] sm:$0xff]  }
 0x40a   :  { %11749 = vmatpush3.bf16.msra.mxu0 %v12206_v30  ;;  %v7669_v30 = vmax.f32 %v12100_v36, 0.0  ;;  %v7672_v18 = vmax.f32 %v12103_v57, 0.0  ;;  %v15972_v36 = vld [vmem:[%s16713_s3 + $0x8] sm:$0xff]  ;;  %v1080_v57 = vrot.slane %v15752_v49, %v15955_v20 }
 0x40b   :  { %11771 = vmatpush3.bf16.msra.mxu1 %v12207_v15  ;;  %11750 = vmatprep.subr.bf16.mxu0 %v12208_v32  ;;  %v7674_v15 = vmax.f32 %v12105_v31, 0.0  ;;  %v12234_v32 = vld [vmem:[%s16714_s4 + $0x100] sm:$0xff]   ;;  %v12256_v31 = vld [vmem:[%s16714_s4 + $0x170] sm:$0xff]  }
 0x40c   :  { %11772 = vmatprep.subr.bf16.mxu1 %v12209_v24  ;;  %v7699_v24 = vpack.c.bf16 %v7667_v28, %v7667_v28  ;;  %v12257_v28 = vld [vmem:[%s16714_s4 + $0x1f0] sm:$0xff]  }
 0x40e   :  { %11751 = vmatpush3.bf16.msra.mxu0 %v12210_v33  ;;  %v12235_v33 = vld [vmem:[%s16714_s4 + $0x180] sm:$0xff]  }
 0x40f   :  { %11773 = vmatpush3.bf16.msra.mxu1 %v12211_v34  ;;  %11752 = vmatprep.subr.bf16.mxu0 %v12212_v37  ;;  %v7701_v34 = vpack.c.bf16 %v7669_v30, %v7669_v30  ;;  %v12236_v37 = vld [vmem:[%s16714_s4 + $0x148] sm:$0xff]   ;;  %v12258_v30 = vld [vmem:[%s16714_s4 + $0x130] sm:$0xff]  }
 0x410   :  { %11774 = vmatprep.subr.bf16.mxu1 %v12213_v40  ;;  %v7704_v40 = vpack.c.bf16 %v7672_v18, %v7672_v18  ;;  %v12260_v18 = vld [vmem:[%s16714_s4 + $0x178] sm:$0xff]  }
 0x412   :  { %11753 = vmatpush3.bf16.msra.mxu0 %v12214_v42  ;;  %v12237_v42 = vld [vmem:[%s16714_s4 + $0x1c8] sm:$0xff]  }
 0x413   :  { %11775 = vmatpush3.bf16.msra.mxu1 %v12215_v46  ;;  %11754 = vmatprep.subr.bf16.mxu0 %v12216_v54  ;;  %v7706_v46 = vpack.c.bf16 %v7674_v15, %v7674_v15  ;;  %v12238_v54 = vld [vmem:[%s16714_s4 + $0x108] sm:$0xff]  }
 0x414   :  { %11776 = vmatprep.subr.bf16.mxu1 %v12217_v55  ;;  %v12239_v55 = vld [vmem:[%s16714_s4 + $0x188] sm:$0xff]  }
 0x416   :  { %11755 = vmatpush3.bf16.msra.mxu0 %v12218_v56  ;;  %v12240_v56 = vld [vmem:[%s16714_s4 + $0x150] sm:$0xff]  }
 0x417   :  { %11777 = vmatpush3.bf16.msra.mxu1 %v12219_v59  ;;  %11756 = vmatprep.subr.bf16.mxu0 %v12220_v60  ;;  %v12241_v59 = vld [vmem:[%s16714_s4 + $0x1d0] sm:$0xff]  }
 0x418   :  { %11778 = vmatprep.subr.bf16.mxu1 %v12221_v62  ;;  %v12242_v60 = vld [vmem:[%s16714_s4 + $0x110] sm:$0xff]  }
 0x419   :  { %v12243_v62 = vld [vmem:[%s16714_s4 + $0x190] sm:$0xff]  }
 0x41a   :  { %11757 = vmatpush3.bf16.msra.mxu0 %v12222_v2  ;;  %v12244_v2 = vld [vmem:[%s16714_s4 + $0x158] sm:$0xff]  }
 0x41b   :  { %11779 = vmatpush3.bf16.msra.mxu1 %v12223_v6  ;;  %11758 = vmatprep.subr.bf16.mxu0 %v12224_v8  ;;  %v12246_v6 = vld [vmem:[%s16714_s4 + $0x118] sm:$0xff]  }
 0x41c   :  { %11780 = vmatprep.subr.bf16.mxu1 %v12225_v13  ;;  %v12247_v8 = vld [vmem:[%s16714_s4 + $0x198] sm:$0xff]   ;;  %v12249_v13 = vld [vmem:[%s16714_s4 + $0x1e0] sm:$0xff]  }
 0x41e   :  { %11759 = vmatpush3.bf16.msra.mxu0 %v12226_v12  ;;  %v12251_v12 = vld [vmem:[%s16714_s4 + $0x1a0] sm:$0xff]  }
 0x41f   :  { %11781 = vmatpush3.bf16.msra.mxu1 %v12227_v25  ;;  %11760 = vmatprep.subr.bf16.mxu0 %v12228_v26  ;;  %v15964_v25 = vsub.s32 6, %v15726_v29  ;;  %v12253_v26 = vld [vmem:[%s16714_s4 + $0x1e8] sm:$0xff]  }
 0x420   :  { %11782 = vmatprep.subr.bf16.mxu1 %v12229_v39  ;;  %v12254_v39 = vld [vmem:[%s16714_s4 + $0x128] sm:$0xff]  }
 0x421   :  { %v12255_v29 = vld [vmem:[%s16714_s4 + $0x1a8] sm:$0xff]  }
 0x422   :  { %11761 = vmatpush3.bf16.msra.mxu0 %v12230_v27  ;;  %v1088_v27 = vrot.slane %v15752_v49, %v15964_v25  ;;  %v12259_v49 = vld [vmem:[%s16714_s4 + $0x1b0] sm:$0xff]  }
 0x423   :  { %11783 = vmatpush3.bf16.msra.mxu1 %v12231_v35  ;;  %11790 = vmatprep.subr.bf16.mxu0 %v12232_v23  ;;  %v1100_v35 = vrot.slane %v15972_v36, %v15741_v41  ;;  %v1108_v23 = vrot.slane %v15972_v36, %v15755_v52 }
 0x424   :  { %11812 = vmatprep.subr.bf16.mxu1 %v12233_v16  ;;  %v12102_v16 = vadd.f32 %v14040_v9, %v1080_v57  ;;  %v12104_v15 = vadd.f32 %v14048_v14, %v1088_v27  ;;  %v12263_v14 = vld [vmem:[%s16714_s4 + $0x1b8] sm:$0xff]   ;;  %v12280_v57 = vld [vmem:[%s16714_s4 + $0x260] sm:$0xff]  }
 0x425   :  { %9819 = vmatmul.mubr.bf16.vlgmr.msra.gmra.mrb[32].mxu0 %v7699_v24  ;;  %v12107_v24 = vadd.f32 %v14450_v19, %v1100_v35  ;;  %v12109_v9 = vadd.f32 %v14458_v22, %v1108_v23  ;;  %v12265_v19 = vld [vmem:[%s16714_s4 + $0x2c0] sm:$0xff]   ;;  %v12285_v35 = vld [vmem:[%s16714_s4 + $0x2e8] sm:$0xff]  }
 0x426   :  { %9859 = vmatmul.mubr.bf16.vlgmr.msra.gmra.mrb[32].mxu1 %v7701_v34  ;;  %11791 = vmatpush3.bf16.msra.mxu0 %v12234_v32  ;;  %v12261_v32 = vld [vmem:[%s16714_s4 + $0x1f8] sm:$0xff]   ;;  %v7671_v34 = vmax.f32 %v12102_v16, 0.0  ;;  %v12283_v27 = vld [vmem:[%s16714_s4 + $0x2a0] sm:$0xff]   ;;  %v12286_v23 = vld [vmem:[%s16714_s4 + $0x228] sm:$0xff]  }
 0x427   :  { %9898 = vmatprep.mubr.bf16.mxu0 %v7704_v40  ;;  %11813 = vmatpush3.bf16.msra.mxu1 %v12235_v33  ;;  %v12262_v33 = vld [vmem:[%s16714_s4 + $0x138] sm:$0xff]   ;;  %v7673_v40 = vmax.f32 %v12104_v15, 0.0  ;;  %v7676_v22 = vmax.f32 %v12107_v24, 0.0  ;;  %v12287_v16 = vld [vmem:[%s16714_s4 + $0x2a8] sm:$0xff]   ;;  %v1116_v24 = vrot.slane %v15972_v36, %v15850_v0 }
 0x428   :  { %9938 = vmatprep.mubr.bf16.mxu1 %v7706_v46  ;;  %11792 = vmatprep.subr.bf16.mxu0 %v12236_v37  ;;  %v12264_v37 = vld [vmem:[%s16714_s4 + $0x240] sm:$0xff]  }
 0x429   :  { %11814 = vmatprep.subr.bf16.mxu1 %v12237_v42  ;;  %v7678_v42 = vmax.f32 %v12109_v9, 0.0  ;;  %v12266_v46 = vld [vmem:[%s16714_s4 + $0x200] sm:$0xff]  }
 0x42a   :  { %11793 = vmatpush3.bf16.msra.mxu0 %v12238_v54  ;;  %v7703_v54 = vpack.c.bf16 %v7671_v34, %v7671_v34  ;;  %v1124_v34 = vrot.slane %v15972_v36, %v15853_v1 }
 0x42b   :  { %11815 = vmatpush3.bf16.msra.mxu1 %v12239_v55  ;;  %11794 = vmatprep.subr.bf16.mxu0 %v12240_v56  ;;  %v12267_v55 = vld [vmem:[%s16714_s4 + $0x280] sm:$0xff]   ;;  %v7705_v56 = vpack.c.bf16 %v7673_v40, %v7673_v40  ;;  %v12290_v40 = vld [vmem:[%s16714_s4 + $0x230] sm:$0xff]  }
 0x42c   :  { %11816 = vmatprep.subr.bf16.mxu1 %v12241_v59  ;;  %v12268_v59 = vld [vmem:[%s16714_s4 + $0x248] sm:$0xff]  }
 0x42e   :  { %11795 = vmatpush3.bf16.msra.mxu0 %v12242_v60  ;;  %v7708_v60 = vpack.c.bf16 %v7676_v22, %v7676_v22 }
 0x42f   :  { %11817 = vmatpush3.bf16.msra.mxu1 %v12243_v62  ;;  %11796 = vmatprep.subr.bf16.mxu0 %v12244_v2  ;;  %v12269_v62 = vld [vmem:[%s16714_s4 + $0x2c8] sm:$0xff]   ;;  %v7710_v2 = vpack.c.bf16 %v7678_v42, %v7678_v42 }
 0x430   :  { %11818 = vmatprep.subr.bf16.mxu1 %v12245_v5  ;;  %v12270_v5 = vld [vmem:[%s16714_s4 + $0x208] sm:$0xff]  }
 0x432   :  { %11797 = vmatpush3.bf16.msra.mxu0 %v12246_v6  ;;  %v12271_v6 = vld [vmem:[%s16714_s4 + $0x288] sm:$0xff]  }
 0x433   :  { %11819 = vmatpush3.bf16.msra.mxu1 %v12247_v8  ;;  %11798 = vmatprep.subr.bf16.mxu0 %v12248_v11  ;;  %v12272_v8 = vld [vmem:[%s16714_s4 + $0x250] sm:$0xff]  }
 0x434   :  { %11820 = vmatprep.subr.bf16.mxu1 %v12249_v13  ;;  %v12273_v11 = vld [vmem:[%s16714_s4 + $0x2d0] sm:$0xff]  }
 0x435   :  { %v12274_v13 = vld [vmem:[%s16714_s4 + $0x210] sm:$0xff]  }
 0x436   :  { %11799 = vmatpush3.bf16.msra.mxu0 %v12250_v17  ;;  %v12275_v17 = vld [vmem:[%s16714_s4 + $0x290] sm:$0xff]  }
 0x437   :  { %11821 = vmatpush3.bf16.msra.mxu1 %v12251_v12  ;;  %11800 = vmatprep.subr.bf16.mxu0 %v12252_v21  ;;  %v12276_v12 = vld [vmem:[%s16714_s4 + $0x258] sm:$0xff]  }
 0x438   :  { %11822 = vmatprep.subr.bf16.mxu1 %v12253_v26  ;;  %v12277_v21 = vld [vmem:[%s16714_s4 + $0x2d8] sm:$0xff]  }
 0x439   :  { %v12278_v26 = vld [vmem:[%s16714_s4 + $0x218] sm:$0xff]  }
 0x43a   :  { %11801 = vmatpush3.bf16.msra.mxu0 %v12254_v39  ;;  %v12279_v39 = vld [vmem:[%s16714_s4 + $0x298] sm:$0xff]  }
 0x43b   :  { %11823 = vmatpush3.bf16.msra.mxu1 %v12255_v29  ;;  %11802 = vmatprep.subr.bf16.mxu0 %v12256_v31  ;;  %v12281_v29 = vld [vmem:[%s16714_s4 + $0x2e0] sm:$0xff]  }
 0x43c   :  { %11824 = vmatprep.subr.bf16.mxu1 %v12257_v28  ;;  %v12282_v31 = vld [vmem:[%s16714_s4 + $0x220] sm:$0xff]   ;;  %v12284_v28 = vld [vmem:[%s16714_s4 + $0x268] sm:$0xff]  }
 0x43e   :  { %11803 = vmatpush3.bf16.msra.mxu0 %v12258_v30  ;;  %v1096_v30 = vrot.slane %v15972_v36, %v15835_v58 }
 0x43f   :  { %11825 = vmatpush3.bf16.msra.mxu1 %v12259_v49  ;;  %11804 = vmatprep.subr.bf16.mxu0 %v12260_v18  ;;  %v12288_v49 = vld [vmem:[%s16714_s4 + $0x270] sm:$0xff]   ;;  %v1104_v18 = vrot.slane %v15972_v36, %v15844_v61 }
 0x440   :  { %11826 = vmatprep.subr.bf16.mxu1 %v12261_v32  ;;  %v12289_v32 = vld [vmem:[%s16714_s4 + $0x2f0] sm:$0xff]  }
 0x442   :  { %11805 = vmatpush3.bf16.msra.mxu0 %v12262_v33 }
 0x443   :  { %11827 = vmatpush3.bf16.msra.mxu1 %v12263_v14  ;;  %11834 = vmatprep.subr.bf16.mxu0 %v12264_v37 }
 0x444   :  { %11856 = vmatprep.subr.bf16.mxu1 %v12265_v19  ;;  %v12106_v19 = vadd.f32 %v14440_v10, %v1096_v30  ;;  %v12293_v10 = vld [vmem:[%s16714_s4 + $0x2f8] sm:$0xff]  }
 0x445   :  { %9899 = vmatmul.mubr.bf16.vlgmr.msra.gmra.mrb[36].mxu0 %v7703_v54  ;;  %v12292_v54 = vld [vmem:[%s16714_s4 + $0x278] sm:$0xff]  }
 0x446   :  { %9939 = vmatmul.mubr.bf16.vlgmr.msra.gmra.mrb[36].mxu1 %v7705_v56  ;;  %11835 = vmatpush3.bf16.msra.mxu0 %v12266_v46  ;;  %v12291_v46 = vld [vmem:[%s16714_s4 + $0x2b0] sm:$0xff]   ;;  %v12308_v30 = vld [vmem:[%s16714_s4 + $0x358] sm:$0xff]  }
 0x447   :  { %9978 = vmatprep.mubr.bf16.mxu0 %v7708_v60  ;;  %11857 = vmatpush3.bf16.msra.mxu1 %v12267_v55  ;;  %v12108_v55 = vadd.f32 %v14448_v53, %v1104_v18  ;;  %v12113_v60 = vadd.f32 %v14858_v51, %v1124_v34  ;;  %v12295_v53 = vld [vmem:[%s16714_s4 + $0x2b8] sm:$0xff]   ;;  %v12314_v34 = vld [vmem:[%s16714_s4 + $0x320] sm:$0xff]  }
 0x448   :  { %10018 = vmatprep.mubr.bf16.mxu1 %v7710_v2  ;;  %11836 = vmatprep.subr.bf16.mxu0 %v12268_v59  ;;  %v12111_v59 = vadd.f32 %v14850_v48, %v1116_v24  ;;  %v7675_v2 = vmax.f32 %v12106_v19, 0.0  ;;  %v12297_v48 = vld [vmem:[%s16714_s4 + $0x3c0] sm:$0xff]   ;;  %v12311_v18 = vld [vmem:[%s16714_s4 + $0x398] sm:$0xff]   ;;  %v12317_v19 = vld [vmem:[%s16714_s4 + $0x3e8] sm:$0xff]  }
 0x449   :  { %11858 = vmatprep.subr.bf16.mxu1 %v12269_v62  ;;  %v12294_v62 = vld [vmem:[%s16714_s4 + $0x238] sm:$0xff]   ;;  %v12313_v24 = vld [vmem:[%s16714_s4 + $0x3e0] sm:$0xff]  }
 0x44a   :  { %11837 = vmatpush3.bf16.msra.mxu0 %v12270_v5  ;;  %v12296_v5 = vld [vmem:[%s16714_s4 + $0x340] sm:$0xff]   ;;  %v7680_v51 = vmax.f32 %v12111_v59, 0.0 }
 0x44b   :  { %11859 = vmatpush3.bf16.msra.mxu1 %v12271_v6  ;;  %11838 = vmatprep.subr.bf16.mxu0 %v12272_v8  ;;  %v7677_v6 = vmax.f32 %v12108_v55, 0.0  ;;  %v7682_v8 = vmax.f32 %v12113_v60, 0.0  ;;  %v12320_v55 = vld [vmem:[%s16714_s4 + $0x370] sm:$0xff]  }
 0x44c   :  { %11860 = vmatprep.subr.bf16.mxu1 %v12273_v11  ;;  %v12298_v11 = vld [vmem:[%s16714_s4 + $0x300] sm:$0xff]  }
 0x44e   :  { %11839 = vmatpush3.bf16.msra.mxu0 %v12274_v13  ;;  %v7707_v13 = vpack.c.bf16 %v7675_v2, %v7675_v2 }
 0x44f   :  { %11861 = vmatpush3.bf16.msra.mxu1 %v12275_v17  ;;  %11840 = vmatprep.subr.bf16.mxu0 %v12276_v12  ;;  %v12299_v17 = vld [vmem:[%s16714_s4 + $0x380] sm:$0xff]   ;;  %v7709_v12 = vpack.c.bf16 %v7677_v6, %v7677_v6  ;;  %v12325_v6 = vld [vmem:[%s16714_s4 + $0x3f8] sm:$0xff]  }
 0x450   :  { %11862 = vmatprep.subr.bf16.mxu1 %v12277_v21  ;;  %v12300_v21 = vld [vmem:[%s16714_s4 + $0x348] sm:$0xff]  }
 0x452   :  { %11841 = vmatpush3.bf16.msra.mxu0 %v12278_v26  ;;  %v7712_v26 = vpack.c.bf16 %v7680_v51, %v7680_v51  ;;  %v12326_v51 = vld [vmem:[%s16714_s4 + $0x338] sm:$0xff]  }
 0x453   :  { %11863 = vmatpush3.bf16.msra.mxu1 %v12279_v39  ;;  %11842 = vmatprep.subr.bf16.mxu0 %v12280_v57  ;;  %v12301_v39 = vld [vmem:[%s16714_s4 + $0x3c8] sm:$0xff]   ;;  %v7714_v57 = vpack.c.bf16 %v7682_v8, %v7682_v8 }
 0x454   :  { %11864 = vmatprep.subr.bf16.mxu1 %v12281_v29  ;;  %v12302_v29 = vld [vmem:[%s16714_s4 + $0x308] sm:$0xff]  }
 0x456   :  { %11843 = vmatpush3.bf16.msra.mxu0 %v12282_v31  ;;  %v12303_v31 = vld [vmem:[%s16714_s4 + $0x388] sm:$0xff]  }
 0x457   :  { %11865 = vmatpush3.bf16.msra.mxu1 %v12283_v27  ;;  %11844 = vmatprep.subr.bf16.mxu0 %v12284_v28  ;;  %v12304_v27 = vld [vmem:[%s16714_s4 + $0x350] sm:$0xff]  }
 0x458   :  { %v16095_v15 = vpop.f32.mrb[24].mxu0  ;;  %11866 = vmatprep.subr.bf16.mxu1 %v12285_v35  ;;  %v16102_v9 = vpop.f32.mrb[24].mxu1  ;;  %v12305_v28 = vld [vmem:[%s16714_s4 + $0x3d0] sm:$0xff]  }
 0x459   :  { %v16104_v33 = vpop.f32.mrb[25].mxu0  ;;  %v16108_v14 = vpop.f32.mrb[25].mxu1  ;;  %v12306_v35 = vld [vmem:[%s16714_s4 + $0x310] sm:$0xff]  }
 0x45a   :  { %v7418_v37 = vpop.f32.mrb[26].mxu0  ;;  %11845 = vmatpush3.bf16.msra.mxu0 %v12286_v23  ;;  %v7500_v22 = vpop.f32.mrb[26].mxu1  ;;  %v12307_v23 = vld [vmem:[%s16714_s4 + $0x390] sm:$0xff]  }
 0x45b   :  { %11867 = vmatpush3.bf16.msra.mxu1 %v12287_v16  ;;  %v7419_v42 = vpop.f32.mrb[27].mxu0  ;;  %11846 = vmatprep.subr.bf16.mxu0 %v12288_v49  ;;  %v7501_v56 = vpop.f32.mrb[27].mxu1  ;;  %v12309_v16 = vld [vmem:[%s16714_s4 + $0x3d8] sm:$0xff]   ;;  %v12315_v37 = vld [vmem:[%s16714_s4 + $0x3a0] sm:$0xff]   ;;  %v16201_v22 = vld [vmem:[%s16713_s3 + $0x10] sm:$0xff] }
 0x45c   :  { %11868 = vmatprep.subr.bf16.mxu1 %v12289_v32  ;;  %v12310_v49 = vld [vmem:[%s16714_s4 + $0x318] sm:$0xff]   ;;  %v12312_v32 = vld [vmem:[%s16714_s4 + $0x360] sm:$0xff]   ;;  %v12318_v42 = vld [vmem:[%s16714_s4 + $0x328] sm:$0xff]   ;;  %v1120_v56 = vrot.slane %v15972_v36, %v15964_v25  ;;  %v1132_v59 = vrot.slane %v16201_v22, %v15741_v41  ;;  %v1140_v60 = vrot.slane %v16201_v22, %v15755_v52 }
 0x45e   :  { %11847 = vmatpush3.bf16.msra.mxu0 %v12290_v40  ;;  %v12316_v40 = vld [vmem:[%s16714_s4 + $0x368] sm:$0xff]  }
 0x45f   :  { %11869 = vmatpush3.bf16.msra.mxu1 %v12291_v46  ;;  %11848 = vmatprep.subr.bf16.mxu0 %v12292_v54  ;;  %v1112_v46 = vrot.slane %v15972_v36, %v15955_v20  ;;  %v12319_v54 = vld [vmem:[%s16714_s4 + $0x3a8] sm:$0xff]   ;;  %v12323_v36 = vld [vmem:[%s16714_s4 + $0x3b0] sm:$0xff]  }
 0x460   :  { %11870 = vmatprep.subr.bf16.mxu1 %v12293_v10  ;;  %v12321_v10 = vld [vmem:[%s16714_s4 + $0x3f0] sm:$0xff]  }
 0x461   :  { %v12110_v2 = vadd.f32 %v14840_v43, %v1112_v46  ;;  %v12117_v43 = vadd.f32 %v15258_v50, %v1140_v60  ;;  %v12348_v46 = vld [vmem:[%s16714_s4 + $0x468] sm:$0xff]   ;;  %v1136_v60 = vrot.slane %v16201_v22, %v15844_v61 }
 0x462   :  { %11849 = vmatpush3.bf16.msra.mxu0 %v12294_v62  ;;  %v12322_v62 = vld [vmem:[%s16714_s4 + $0x330] sm:$0xff]  }
 0x463   :  { %11871 = vmatpush3.bf16.msra.mxu1 %v12295_v53  ;;  %11878 = vmatprep.subr.bf16.mxu0 %v12296_v5  ;;  %v12324_v53 = vld [vmem:[%s16714_s4 + $0x378] sm:$0xff]   ;;  %v12112_v5 = vadd.f32 %v14848_v47, %v1120_v56  ;;  %v7679_v8 = vmax.f32 %v12110_v2, 0.0  ;;  %v1128_v56 = vrot.slane %v16201_v22, %v15835_v58  ;;  %v1148_v2 = vrot.slane %v16201_v22, %v15850_v0 }
 0x464   :  { %11900 = vmatprep.subr.bf16.mxu1 %v12297_v48  ;;  %v12115_v48 = vadd.f32 %v15250_v45, %v1132_v59  ;;  %v12327_v47 = vld [vmem:[%s16714_s4 + $0x3b8] sm:$0xff]   ;;  %v12329_v45 = vld [vmem:[%s16714_s4 + $0x4c0] sm:$0xff]   ;;  %v12352_v59 = vld [vmem:[%s16714_s4 + $0x470] sm:$0xff]  }
 0x465   :  { %9979 = vmatmul.mubr.bf16.vlgmr.msra.gmra.mrb[40].mxu0 %v7707_v13  ;;  %v7681_v13 = vmax.f32 %v12112_v5, 0.0  ;;  %v12114_v5 = vadd.f32 %v15240_v38, %v1128_v56  ;;  %v1144_v56 = vrot.slane %v16201_v22, %v15955_v20 }
 0x466   :  { %10019 = vmatmul.mubr.bf16.vlgmr.msra.gmra.mrb[40].mxu1 %v7709_v12  ;;  %11879 = vmatpush3.bf16.msra.mxu0 %v12298_v11  ;;  %v12328_v11 = vld [vmem:[%s16714_s4 + $0x440] sm:$0xff]   ;;  %v7684_v50 = vmax.f32 %v12115_v48, 0.0  ;;  %v12356_v48 = vld [vmem:[%s16714_s4 + $0x478] sm:$0xff]  }
 0x467   :  { %10058 = vmatprep.mubr.bf16.mxu0 %v7712_v26  ;;  %11901 = vmatpush3.bf16.msra.mxu1 %v12299_v17  ;;  %v7686_v17 = vmax.f32 %v12117_v43, 0.0  ;;  %v12330_v12 = vld [vmem:[%s16714_s4 + $0x400] sm:$0xff]   ;;  %v12116_v43 = vadd.f32 %v15248_v44, %v1136_v60  ;;  %v12359_v44 = vld [vmem:[%s16714_s4 + $0x4b8] sm:$0xff]   ;;  %v1152_v60 = vrot.slane %v16201_v22, %v15964_v25 }
 0x468   :  { %10098 = vmatprep.mubr.bf16.mxu1 %v7714_v57  ;;  %11880 = vmatprep.subr.bf16.mxu0 %v12300_v21  ;;  %v7711_v21 = vpack.c.bf16 %v7679_v8, %v7679_v8  ;;  %v12331_v26 = vld [vmem:[%s16714_s4 + $0x480] sm:$0xff]   ;;  %v12332_v57 = vld [vmem:[%s16714_s4 + $0x448] sm:$0xff]   ;;  %v12119_v8 = vadd.f32 %v15650_v4, %v1148_v2 }
 0x469   :  { %11902 = vmatprep.subr.bf16.mxu1 %v12301_v39  ;;  %v7713_v39 = vpack.c.bf16 %v7681_v13, %v7681_v13  ;;  %v12360_v13 = vld [vmem:[%s16714_s4 + $0x540] sm:$0xff]  }
 0x46a   :  { %11881 = vmatpush3.bf16.msra.mxu0 %v12302_v29  ;;  %v7716_v29 = vpack.c.bf16 %v7684_v50, %v7684_v50  ;;  %v12361_v4 = vld [vmem:[%s16714_s4 + $0x5c0] sm:$0xff]  }
 0x46b   :  { %11903 = vmatpush3.bf16.msra.mxu1 %v12303_v31  ;;  %11882 = vmatprep.subr.bf16.mxu0 %v12304_v27  ;;  %v12333_v31 = vld [vmem:[%s16714_s4 + $0x4c8] sm:$0xff]   ;;  %v7718_v27 = vpack.c.bf16 %v7686_v17, %v7686_v17  ;;  %v12362_v17 = vld [vmem:[%s16714_s4 + $0x500] sm:$0xff]  }
 0x46c   :  { %11904 = vmatprep.subr.bf16.mxu1 %v12305_v28  ;;  %v12334_v28 = vld [vmem:[%s16714_s4 + $0x408] sm:$0xff]  }
 0x46e   :  { %11883 = vmatpush3.bf16.msra.mxu0 %v12306_v35  ;;  %v12335_v35 = vld [vmem:[%s16714_s4 + $0x488] sm:$0xff]  }
 0x46f   :  { %11905 = vmatpush3.bf16.msra.mxu1 %v12307_v23  ;;  %11884 = vmatprep.subr.bf16.mxu0 %v12308_v30  ;;  %v12336_v23 = vld [vmem:[%s16714_s4 + $0x450] sm:$0xff]  }
 0x470   :  { %11906 = vmatprep.subr.bf16.mxu1 %v12309_v16  ;;  %v12337_v30 = vld [vmem:[%s16714_s4 + $0x4d0] sm:$0xff]  }
 0x471   :  { %v12338_v16 = vld [vmem:[%s16714_s4 + $0x410] sm:$0xff]  }
 0x472   :  { %11885 = vmatpush3.bf16.msra.mxu0 %v12310_v49  ;;  %v12339_v49 = vld [vmem:[%s16714_s4 + $0x490] sm:$0xff]  }
 0x473   :  { %11907 = vmatpush3.bf16.msra.mxu1 %v12311_v18  ;;  %11886 = vmatprep.subr.bf16.mxu0 %v12312_v32  ;;  %v12340_v18 = vld [vmem:[%s16714_s4 + $0x458] sm:$0xff]  }
 0x474   :  { %11908 = vmatprep.subr.bf16.mxu1 %v12313_v24  ;;  %v12341_v32 = vld [vmem:[%s16714_s4 + $0x4d8] sm:$0xff]  }
 0x475   :  { %v12342_v24 = vld [vmem:[%s16714_s4 + $0x418] sm:$0xff]  }
 0x476   :  { %11887 = vmatpush3.bf16.msra.mxu0 %v12314_v34  ;;  %v12343_v34 = vld [vmem:[%s16714_s4 + $0x498] sm:$0xff]  }
 0x477   :  { %11909 = vmatpush3.bf16.msra.mxu1 %v12315_v37  ;;  %11888 = vmatprep.subr.bf16.mxu0 %v12316_v40  ;;  %v12344_v37 = vld [vmem:[%s16714_s4 + $0x460] sm:$0xff]  }
 0x478   :  { %11910 = vmatprep.subr.bf16.mxu1 %v12317_v19  ;;  %v12345_v40 = vld [vmem:[%s16714_s4 + $0x4e0] sm:$0xff]  }
 0x479   :  { %v12346_v19 = vld [vmem:[%s16714_s4 + $0x420] sm:$0xff]  }
 0x47a   :  { %11889 = vmatpush3.bf16.msra.mxu0 %v12318_v42  ;;  %v12347_v42 = vld [vmem:[%s16714_s4 + $0x4a0] sm:$0xff]  }
 0x47b   :  { %11911 = vmatpush3.bf16.msra.mxu1 %v12319_v54  ;;  %11890 = vmatprep.subr.bf16.mxu0 %v12320_v55  ;;  %v12349_v54 = vld [vmem:[%s16714_s4 + $0x4e8] sm:$0xff]  }
 0x47c   :  { %11912 = vmatprep.subr.bf16.mxu1 %v12321_v10  ;;  %v12350_v55 = vld [vmem:[%s16714_s4 + $0x428] sm:$0xff]  }
 0x47d   :  { %v12351_v10 = vld [vmem:[%s16714_s4 + $0x4a8] sm:$0xff]  }
 0x47e   :  { %11891 = vmatpush3.bf16.msra.mxu0 %v12322_v62  ;;  %v12353_v62 = vld [vmem:[%s16714_s4 + $0x4f0] sm:$0xff]  }
 0x47f   :  { %11913 = vmatpush3.bf16.msra.mxu1 %v12323_v36  ;;  %11892 = vmatprep.subr.bf16.mxu0 %v12324_v53  ;;  %v1156_v36 = vrot.slane %v16201_v22, %v15853_v1  ;;  %v12354_v53 = vld [vmem:[%s16714_s4 + $0x430] sm:$0xff]  }
 0x480   :  { %11914 = vmatprep.subr.bf16.mxu1 %v12325_v6  ;;  %v12355_v6 = vld [vmem:[%s16714_s4 + $0x4b0] sm:$0xff]  }
 0x481   :  { %v12121_v38 = vadd.f32 %v15658_v7, %v1156_v36  ;;  %v7688_v7 = vmax.f32 %v12119_v8, 0.0  ;;  %v12387_v22 = vld [vmem:[%s16714_s4 + $0x5b0] sm:$0xff]   ;;  %v12392_v8 = vld [vmem:[%s16714_s4 + $0x640] sm:$0xff]  }
 0x482   :  { %11893 = vmatpush3.bf16.msra.mxu0 %v12326_v51  ;;  %v12357_v51 = vld [vmem:[%s16714_s4 + $0x4f8] sm:$0xff]  }
 0x483   :  { %11915 = vmatpush3.bf16.msra.mxu1 %v12327_v47  ;;  %11922 = vmatprep.subr.bf16.mxu0 %v12328_v11  ;;  %v12358_v47 = vld [vmem:[%s16714_s4 + $0x438] sm:$0xff]   ;;  %v7683_v11 = vmax.f32 %v12114_v5, 0.0  ;;  %v7690_v50 = vmax.f32 %v12121_v38, 0.0  ;;  %v12118_v5 = vadd.f32 %v15640_v63, %v1144_v56 }
 0x484   :  { %11944 = vmatprep.subr.bf16.mxu1 %v12329_v45  ;;  %v7685_v45 = vmax.f32 %v12116_v43, 0.0  ;;  %v12390_v43 = vld [vmem:[%s16714_s4 + $0x538] sm:$0xff]  }
 0x485   :  { %10059 = vmatmul.mubr.bf16.vlgmr.msra.gmra.mrb[44].mxu0 %v7711_v21  ;;  %v12363_v21 = vld [vmem:[%s16714_s4 + $0x580] sm:$0xff]  }
 0x486   :  { %10099 = vmatmul.mubr.bf16.vlgmr.msra.gmra.mrb[44].mxu1 %v7713_v39  ;;  %11923 = vmatpush3.bf16.msra.mxu0 %v12330_v12  ;;  %v7715_v12 = vpack.c.bf16 %v7683_v11, %v7683_v11  ;;  %v12364_v39 = vld [vmem:[%s16714_s4 + $0x548] sm:$0xff]   ;;  %v12394_v11 = vld [vmem:[%s16714_s4 + $0x600] sm:$0xff]  }
 0x487   :  { %10138 = vmatprep.mubr.bf16.mxu0 %v7716_v29  ;;  %11945 = vmatpush3.bf16.msra.mxu1 %v12331_v26  ;;  %v7717_v26 = vpack.c.bf16 %v7685_v45, %v7685_v45  ;;  %v12365_v29 = vld [vmem:[%s16714_s4 + $0x5c8] sm:$0xff]  }
 0x488   :  { %10178 = vmatprep.mubr.bf16.mxu1 %v7718_v27  ;;  %11924 = vmatprep.subr.bf16.mxu0 %v12332_v57  ;;  %v7720_v57 = vpack.c.bf16 %v7688_v7, %v7688_v7  ;;  %v12366_v27 = vld [vmem:[%s16714_s4 + $0x508] sm:$0xff]  }
 0x489   :  { %11946 = vmatprep.subr.bf16.mxu1 %v12333_v31  ;;  %v7722_v31 = vpack.c.bf16 %v7690_v50, %v7690_v50  ;;  %v12397_v50 = vld [vmem:[%s16714_s4 + $0x6c8] sm:$0xff]  }
 0x48a   :  { %11925 = vmatpush3.bf16.msra.mxu0 %v12334_v28  ;;  %v12367_v28 = vld [vmem:[%s16714_s4 + $0x588] sm:$0xff]  }
 0x48b   :  { %11947 = vmatpush3.bf16.msra.mxu1 %v12335_v35  ;;  %11926 = vmatprep.subr.bf16.mxu0 %v12336_v23  ;;  %v12368_v35 = vld [vmem:[%s16714_s4 + $0x550] sm:$0xff]  }
 0x48c   :  { %11948 = vmatprep.subr.bf16.mxu1 %v12337_v30  ;;  %v12369_v23 = vld [vmem:[%s16714_s4 + $0x5d0] sm:$0xff]  }
 0x48d   :  { %v12370_v30 = vld [vmem:[%s16714_s4 + $0x510] sm:$0xff]  }
 0x48e   :  { %11927 = vmatpush3.bf16.msra.mxu0 %v12338_v16  ;;  %v12371_v16 = vld [vmem:[%s16714_s4 + $0x590] sm:$0xff]  }
 0x48f   :  { %11949 = vmatpush3.bf16.msra.mxu1 %v12339_v49  ;;  %11928 = vmatprep.subr.bf16.mxu0 %v12340_v18  ;;  %v12372_v49 = vld [vmem:[%s16714_s4 + $0x558] sm:$0xff]  }
 0x490   :  { %11950 = vmatprep.subr.bf16.mxu1 %v12341_v32  ;;  %v12373_v18 = vld [vmem:[%s16714_s4 + $0x5d8] sm:$0xff]  }
 0x491   :  { %v12374_v32 = vld [vmem:[%s16714_s4 + $0x518] sm:$0xff]  }
 0x492   :  { %11929 = vmatpush3.bf16.msra.mxu0 %v12342_v24  ;;  %v12375_v24 = vld [vmem:[%s16714_s4 + $0x598] sm:$0xff]  }
 0x493   :  { %11951 = vmatpush3.bf16.msra.mxu1 %v12343_v34  ;;  %11930 = vmatprep.subr.bf16.mxu0 %v12344_v37  ;;  %v12376_v34 = vld [vmem:[%s16714_s4 + $0x560] sm:$0xff]  }
 0x494   :  { %11952 = vmatprep.subr.bf16.mxu1 %v12345_v40  ;;  %v12377_v37 = vld [vmem:[%s16714_s4 + $0x5e0] sm:$0xff]  }
 0x495   :  { %v12378_v40 = vld [vmem:[%s16714_s4 + $0x520] sm:$0xff]  }
 0x496   :  { %11931 = vmatpush3.bf16.msra.mxu0 %v12346_v19  ;;  %v12379_v19 = vld [vmem:[%s16714_s4 + $0x5a0] sm:$0xff]  }
 0x497   :  { %11953 = vmatpush3.bf16.msra.mxu1 %v12347_v42  ;;  %11932 = vmatprep.subr.bf16.mxu0 %v12348_v46  ;;  %v12380_v42 = vld [vmem:[%s16714_s4 + $0x568] sm:$0xff]  }
 0x498   :  { %11954 = vmatprep.subr.bf16.mxu1 %v12349_v54  ;;  %v12381_v46 = vld [vmem:[%s16714_s4 + $0x5e8] sm:$0xff]   ;;  %v16422_v54 = vld [vmem:[%s16713_s3 + $0x18] sm:$0xff] }
 0x499   :  { %v1164_v2 = vrot.slane %v16422_v54, %v15741_v41  ;;  %v1172_v36 = vrot.slane %v16422_v54, %v15755_v52  ;;  %v12388_v41 = vld [vmem:[%s16714_s4 + $0x578] sm:$0xff]  }
 0x49a   :  { %11933 = vmatpush3.bf16.msra.mxu0 %v12350_v55  ;;  %v12382_v55 = vld [vmem:[%s16714_s4 + $0x528] sm:$0xff]   ;;  %v12389_v52 = vld [vmem:[%s16714_s4 + $0x5f8] sm:$0xff]  }
 0x49b   :  { %11955 = vmatpush3.bf16.msra.mxu1 %v12351_v10  ;;  %11934 = vmatprep.subr.bf16.mxu0 %v12352_v59  ;;  %v12383_v10 = vld [vmem:[%s16714_s4 + $0x5a8] sm:$0xff]   ;;  %v12384_v59 = vld [vmem:[%s16714_s4 + $0x570] sm:$0xff]   ;;  %v12125_v63 = vadd.f32 %v16108_v14, %v1172_v36 }
 0x49c   :  { %11956 = vmatprep.subr.bf16.mxu1 %v12353_v62  ;;  %v12385_v62 = vld [vmem:[%s16714_s4 + $0x5f0] sm:$0xff]  }
 0x49e   :  { %11935 = vmatpush3.bf16.msra.mxu0 %v12354_v53  ;;  %v12386_v53 = vld [vmem:[%s16714_s4 + $0x530] sm:$0xff]  }
 0x49f   :  { %11957 = vmatpush3.bf16.msra.mxu1 %v12355_v6  ;;  %11936 = vmatprep.subr.bf16.mxu0 %v12356_v48  ;;  %v12120_v6 = vadd.f32 %v15648_v3, %v1152_v60  ;;  %v12123_v48 = vadd.f32 %v16104_v33, %v1164_v2  ;;  %v12391_v3 = vld [vmem:[%s16714_s4 + $0x5b8] sm:$0xff]   ;;  %v12393_v33 = vld [vmem:[%s16714_s4 + $0x6c0] sm:$0xff]  }
 0x4a0   :  { %11958 = vmatprep.subr.bf16.mxu1 %v12357_v51  ;;  %v7687_v51 = vmax.f32 %v12118_v5, 0.0 }
 0x4a1   :  { %v7689_v38 = vmax.f32 %v12120_v6, 0.0  ;;  %v7692_v14 = vmax.f32 %v12123_v48, 0.0  ;;  %v12422_v6 = vld [vmem:[%s16714_s4 + $0x638] sm:$0xff]   ;;  %v12424_v48 = vld [vmem:[%s16714_s4 + $0x740] sm:$0xff]  }
 0x4a2   :  { %11937 = vmatpush3.bf16.msra.mxu0 %v12358_v47  ;;  %v7694_v47 = vmax.f32 %v12125_v63, 0.0 }
 0x4a3   :  { %11959 = vmatpush3.bf16.msra.mxu1 %v12359_v44  ;;  %11966 = vmatprep.subr.bf16.mxu0 %v12360_v13  ;;  %v7719_v44 = vpack.c.bf16 %v7687_v51, %v7687_v51  ;;  %v12395_v13 = vld [vmem:[%s16714_s4 + $0x680] sm:$0xff]   ;;  %v7721_v45 = vpack.c.bf16 %v7689_v38, %v7689_v38  ;;  %v7724_v7 = vpack.c.bf16 %v7692_v14, %v7692_v14 }
 0x4a4   :  { %11988 = vmatprep.subr.bf16.mxu1 %v12361_v4  ;;  %v12396_v4 = vld [vmem:[%s16714_s4 + $0x648] sm:$0xff]  }
 0x4a5   :  { %10139 = vmatmul.mubr.bf16.vlgmr.msra.gmra.mrb[48].mxu0 %v7715_v12  ;;  %v12398_v12 = vld [vmem:[%s16714_s4 + $0x608] sm:$0xff]  }
 0x4a6   :  { %10179 = vmatmul.mubr.bf16.vlgmr.msra.gmra.mrb[48].mxu1 %v7717_v26  ;;  %11967 = vmatpush3.bf16.msra.mxu0 %v12362_v17  ;;  %v7726_v17 = vpack.c.bf16 %v7694_v47, %v7694_v47  ;;  %v12400_v26 = vld [vmem:[%s16714_s4 + $0x650] sm:$0xff]   ;;  %v12428_v47 = vld [vmem:[%s16714_s4 + $0x748] sm:$0xff]  }
 0x4a7   :  { %10218 = vmatprep.mubr.bf16.mxu0 %v7720_v57  ;;  %11989 = vmatpush3.bf16.msra.mxu1 %v12363_v21  ;;  %v12399_v21 = vld [vmem:[%s16714_s4 + $0x688] sm:$0xff]   ;;  %v12402_v57 = vld [vmem:[%s16714_s4 + $0x610] sm:$0xff]  }
 0x4a8   :  { %10258 = vmatprep.mubr.bf16.mxu1 %v7722_v31  ;;  %11968 = vmatprep.subr.bf16.mxu0 %v12364_v39  ;;  %v12401_v39 = vld [vmem:[%s16714_s4 + $0x6d0] sm:$0xff]   ;;  %v12404_v31 = vld [vmem:[%s16714_s4 + $0x658] sm:$0xff]  }
 0x4a9   :  { %11990 = vmatprep.subr.bf16.mxu1 %v12365_v29  ;;  %v12403_v29 = vld [vmem:[%s16714_s4 + $0x690] sm:$0xff]  }
 0x4aa   :  { %11969 = vmatpush3.bf16.msra.mxu0 %v12366_v27  ;;  %v12405_v27 = vld [vmem:[%s16714_s4 + $0x6d8] sm:$0xff]  }
 0x4ab   :  { %11991 = vmatpush3.bf16.msra.mxu1 %v12367_v28  ;;  %11970 = vmatprep.subr.bf16.mxu0 %v12368_v35  ;;  %v12406_v28 = vld [vmem:[%s16714_s4 + $0x618] sm:$0xff]  }
 0x4ac   :  { %11992 = vmatprep.subr.bf16.mxu1 %v12369_v23  ;;  %v12407_v35 = vld [vmem:[%s16714_s4 + $0x698] sm:$0xff]   ;;  %v12408_v23 = vld [vmem:[%s16714_s4 + $0x660] sm:$0xff]  }
 0x4ae   :  { %11971 = vmatpush3.bf16.msra.mxu0 %v12370_v30  ;;  %v12409_v30 = vld [vmem:[%s16714_s4 + $0x6e0] sm:$0xff]  }
 0x4af   :  { %11993 = vmatpush3.bf16.msra.mxu1 %v12371_v16  ;;  %11972 = vmatprep.subr.bf16.mxu0 %v12372_v49  ;;  %v12410_v16 = vld [vmem:[%s16714_s4 + $0x620] sm:$0xff]  }
 0x4b0   :  { %11994 = vmatprep.subr.bf16.mxu1 %v12373_v18  ;;  %v12411_v49 = vld [vmem:[%s16714_s4 + $0x6a0] sm:$0xff]   ;;  %v12412_v18 = vld [vmem:[%s16714_s4 + $0x668] sm:$0xff]  }
 0x4b2   :  { %11973 = vmatpush3.bf16.msra.mxu0 %v12374_v32  ;;  %v12413_v32 = vld [vmem:[%s16714_s4 + $0x6e8] sm:$0xff]  }
 0x4b3   :  { %11995 = vmatpush3.bf16.msra.mxu1 %v12375_v24  ;;  %11974 = vmatprep.subr.bf16.mxu0 %v12376_v34  ;;  %v12414_v24 = vld [vmem:[%s16714_s4 + $0x628] sm:$0xff]   ;;  %v1160_v34 = vrot.slane %v16422_v54, %v15835_v58  ;;  %v12417_v58 = vld [vmem:[%s16714_s4 + $0x6f0] sm:$0xff]  }
 0x4b4   :  { %11996 = vmatprep.subr.bf16.mxu1 %v12377_v37  ;;  %v12415_v37 = vld [vmem:[%s16714_s4 + $0x6a8] sm:$0xff]  }
 0x4b6   :  { %11975 = vmatpush3.bf16.msra.mxu0 %v12378_v40  ;;  %v12416_v40 = vld [vmem:[%s16714_s4 + $0x670] sm:$0xff]  }
 0x4b7   :  { %11997 = vmatpush3.bf16.msra.mxu1 %v12379_v19  ;;  %11976 = vmatprep.subr.bf16.mxu0 %v12380_v42  ;;  %v1168_v19 = vrot.slane %v16422_v54, %v15844_v61  ;;  %v12418_v61 = vld [vmem:[%s16714_s4 + $0x630] sm:$0xff]  }
 0x4b8   :  { %11998 = vmatprep.subr.bf16.mxu1 %v12381_v46 }
 0x4ba   :  { %11977 = vmatpush3.bf16.msra.mxu0 %v12382_v55  ;;  %v1180_v55 = vrot.slane %v16422_v54, %v15850_v0  ;;  %v12419_v0 = vld [vmem:[%s16714_s4 + $0x6b0] sm:$0xff]  }
 0x4bb   :  { %11999 = vmatpush3.bf16.msra.mxu1 %v12383_v10  ;;  %11978 = vmatprep.subr.bf16.mxu0 %v12384_v59  ;;  %v1188_v10 = vrot.slane %v16422_v54, %v15853_v1  ;;  %v12420_v1 = vld [vmem:[%s16714_s4 + $0x678] sm:$0xff]  }
 0x4bc   :  { %12000 = vmatprep.subr.bf16.mxu1 %v12385_v62  ;;  %v12122_v62 = vadd.f32 %v16095_v15, %v1160_v34  ;;  %v12421_v15 = vld [vmem:[%s16714_s4 + $0x6f8] sm:$0xff]   ;;  %v12449_v34 = vld [vmem:[%s16714_s4 + $0x7f0] sm:$0xff]  }
 0x4be   :  { %11979 = vmatpush3.bf16.msra.mxu0 %v12386_v53  ;;  %v12124_v53 = vadd.f32 %v16102_v9, %v1168_v19  ;;  %v12423_v9 = vld [vmem:[%s16714_s4 + $0x6b8] sm:$0xff]  }
 0x4bf   :  { %12001 = vmatpush3.bf16.msra.mxu1 %v12387_v22  ;;  %11980 = vmatprep.subr.bf16.mxu0 %v12388_v41 }
 0x4c0   :  { %12002 = vmatprep.subr.bf16.mxu1 %v12389_v52  ;;  %v7691_v52 = vmax.f32 %v12122_v62, 0.0  ;;  %v7693_v63 = vmax.f32 %v12124_v53, 0.0 }
 0x4c2   :  { %11981 = vmatpush3.bf16.msra.mxu0 %v12390_v43  ;;  %v12425_v43 = vld [vmem:[%s16714_s4 + $0x7c0] sm:$0xff]   ;;  %v7723_v38 = vpack.c.bf16 %v7691_v52, %v7691_v52  ;;  %v7725_v14 = vpack.c.bf16 %v7693_v63, %v7693_v63 }
 0x4c3   :  { %12003 = vmatpush3.bf16.msra.mxu1 %v12391_v3  ;;  %12010 = vmatprep.subr.bf16.mxu0 %v12392_v8  ;;  %v12426_v8 = vld [vmem:[%s16714_s4 + $0x700] sm:$0xff]  }
 0x4c4   :  { %12032 = vmatprep.subr.bf16.mxu1 %v12393_v33  ;;  %v12427_v33 = vld [vmem:[%s16714_s4 + $0x780] sm:$0xff]  }
 0x4c5   :  { %10219 = vmatmul.mubr.bf16.vlgmr.msra.gmra.mrb[52].mxu0 %v7719_v44  ;;  %v12429_v44 = vld [vmem:[%s16714_s4 + $0x7c8] sm:$0xff]  }
 0x4c6   :  { %10259 = vmatmul.mubr.bf16.vlgmr.msra.gmra.mrb[52].mxu1 %v7721_v45  ;;  %12011 = vmatpush3.bf16.msra.mxu0 %v12394_v11  ;;  %v12430_v45 = vld [vmem:[%s16714_s4 + $0x708] sm:$0xff]  }
 0x4c7   :  { %10298 = vmatprep.mubr.bf16.mxu0 %v7724_v7  ;;  %12033 = vmatpush3.bf16.msra.mxu1 %v12395_v13  ;;  %v12432_v7 = vld [vmem:[%s16714_s4 + $0x750] sm:$0xff]  }
 0x4c8   :  { %10338 = vmatprep.mubr.bf16.mxu1 %v7726_v17  ;;  %12012 = vmatprep.subr.bf16.mxu0 %v12396_v4  ;;  %v12431_v4 = vld [vmem:[%s16714_s4 + $0x788] sm:$0xff]   ;;  %v12434_v17 = vld [vmem:[%s16714_s4 + $0x710] sm:$0xff]  }
 0x4c9   :  { %12034 = vmatprep.subr.bf16.mxu1 %v12397_v50  ;;  %v12433_v50 = vld [vmem:[%s16714_s4 + $0x7d0] sm:$0xff]  }
 0x4ca   :  { %12013 = vmatpush3.bf16.msra.mxu0 %v12398_v12  ;;  %v12435_v12 = vld [vmem:[%s16714_s4 + $0x790] sm:$0xff]  }
 0x4cb   :  { %12035 = vmatpush3.bf16.msra.mxu1 %v12399_v21  ;;  %12014 = vmatprep.subr.bf16.mxu0 %v12400_v26  ;;  %v12436_v21 = vld [vmem:[%s16714_s4 + $0x758] sm:$0xff]  }
 0x4cc   :  { %12036 = vmatprep.subr.bf16.mxu1 %v12401_v39  ;;  %v12437_v26 = vld [vmem:[%s16714_s4 + $0x7d8] sm:$0xff]  }
 0x4cd   :  { %v12438_v39 = vld [vmem:[%s16714_s4 + $0x718] sm:$0xff]  }
 0x4ce   :  { %12015 = vmatpush3.bf16.msra.mxu0 %v12402_v57  ;;  %v12439_v57 = vld [vmem:[%s16714_s4 + $0x798] sm:$0xff]  }
 0x4cf   :  { %12037 = vmatpush3.bf16.msra.mxu1 %v12403_v29  ;;  %12016 = vmatprep.subr.bf16.mxu0 %v12404_v31  ;;  %v12440_v29 = vld [vmem:[%s16714_s4 + $0x760] sm:$0xff]  }
 0x4d0   :  { %12038 = vmatprep.subr.bf16.mxu1 %v12405_v27  ;;  %v12441_v31 = vld [vmem:[%s16714_s4 + $0x7e0] sm:$0xff]  }
 0x4d1   :  { %v12442_v27 = vld [vmem:[%s16714_s4 + $0x720] sm:$0xff]  }
 0x4d2   :  { %12017 = vmatpush3.bf16.msra.mxu0 %v12406_v28  ;;  %v12443_v28 = vld [vmem:[%s16714_s4 + $0x7a0] sm:$0xff]  }
 0x4d3   :  { %12039 = vmatpush3.bf16.msra.mxu1 %v12407_v35  ;;  %12018 = vmatprep.subr.bf16.mxu0 %v12408_v23  ;;  %v12444_v35 = vld [vmem:[%s16714_s4 + $0x768] sm:$0xff]  }
 0x4d4   :  { %12040 = vmatprep.subr.bf16.mxu1 %v12409_v30  ;;  %v12445_v23 = vld [vmem:[%s16714_s4 + $0x7e8] sm:$0xff]  }
 0x4d5   :  { %v12446_v30 = vld [vmem:[%s16714_s4 + $0x728] sm:$0xff]  }
 0x4d6   :  { %12019 = vmatpush3.bf16.msra.mxu0 %v12410_v16  ;;  %v1176_v16 = vrot.slane %v16422_v54, %v15955_v20 }
 0x4d7   :  { %12041 = vmatpush3.bf16.msra.mxu1 %v12411_v49  ;;  %12020 = vmatprep.subr.bf16.mxu0 %v12412_v18  ;;  %v12447_v49 = vld [vmem:[%s16714_s4 + $0x7a8] sm:$0xff]   ;;  %v12448_v18 = vld [vmem:[%s16714_s4 + $0x770] sm:$0xff]  }
 0x4d8   :  { %v16545_v42 = vpop.f32.mrb[28].mxu0  ;;  %12042 = vmatprep.subr.bf16.mxu1 %v12413_v32  ;;  %v16550_v46 = vpop.f32.mrb[28].mxu1  ;;  %v1184_v32 = vrot.slane %v16422_v54, %v15964_v25  ;;  %v12450_v25 = vld [vmem:[%s16714_s4 + $0x730] sm:$0xff]  }
 0x4d9   :  { %v7580_v56 = vpop.f32.mrb[29].mxu0  ;;  %v7662_v59 = vpop.f32.mrb[29].mxu1  ;;  %v12126_v54 = vadd.f32 %v16545_v42, %v1176_v16  ;;  %v12453_v42 = vld [vmem:[%s16714_s4 + $0x7f8] sm:$0xff]  }
 0x4da   :  { %v7582_v60 = vpop.f32.mrb[30].mxu0  ;;  %12021 = vmatpush3.bf16.msra.mxu0 %v12414_v24  ;;  %v7664_v2 = vpop.f32.mrb[30].mxu1  ;;  %v12127_v22 = vadd.f32 %v7580_v56, %v1180_v55  ;;  %v12129_v41 = vadd.f32 %v7662_v59, %v1188_v10  ;;  %v12128_v62 = vadd.f32 %v16550_v46, %v1184_v32  ;;  %v12455_v46 = vld [vmem:[%s16714_s4 + $0x7b8] sm:$0xff]  }
 0x4db   :  { %12043 = vmatpush3.bf16.msra.mxu1 %v12415_v37  ;;  %v7583_v36 = vpop.f32.mrb[31].mxu0  ;;  %12022 = vmatprep.subr.bf16.mxu0 %v12416_v40  ;;  %v7665_v5 = vpop.f32.mrb[31].mxu1  ;;  %v11489_v37 = vld [vmem:[%s16715_s5] ss:$0 sm:$0xff]  ;;  %v12451_v60 = vld [vmem:[%s16714_s4 + $0x7b0] sm:$0xff]   ;;  %v7695_v53 = vmax.f32 %v12126_v54, 0.0 }
 0x4dc   :  { %12044 = vmatprep.subr.bf16.mxu1 %v12417_v58  ;;  %v7696_v51 = vmax.f32 %v12127_v22, 0.0  ;;  %v7698_v3 = vmax.f32 %v12129_v41, 0.0  ;;  %v7697_v5 = vmax.f32 %v12128_v62, 0.0 }
 0x4de   :  { %12023 = vmatpush3.bf16.msra.mxu0 %v12418_v61  ;;  %v7728_v11 = vpack.c.bf16 %v7696_v51, %v7696_v51  ;;  %v7730_v13 = vpack.c.bf16 %v7698_v3, %v7698_v3  ;;  %v12452_v61 = vld [vmem:[%s16714_s4 + $0x778] sm:$0xff]   ;;  %v7729_v22 = vpack.c.bf16 %v7697_v5, %v7697_v5 }
 0x4df   :  { %12045 = vmatpush3.bf16.msra.mxu1 %v12419_v0  ;;  %12024 = vmatprep.subr.bf16.mxu0 %v12420_v1  ;;  %v12454_v1 = vld [vmem:[%s16714_s4 + $0x738] sm:$0xff]   ;;  %s12506_s4 = smov [#allocation4]  }
 0x4e0   :  { %12046 = vmatprep.subr.bf16.mxu1 %v12421_v15  ;;  %v7727_v15 = vpack.c.bf16 %v7695_v53, %v7695_v53  ;;  %s10439_s9 = sshll.u32 %s12506_s4, 4  ;;  %s10440_s9 = int_to_ptr.vmem [resolvable:$true] %s10439_s9 }
 0x4e1   :  { %s12458_s12 = scalar_lea.vmem %s10440_s9, 128  ;;  %p12463_p1 = scmp.lt.s32.totalorder %s10440_s9, %s10440_s9 }
 0x4e2   :  { %12025 = vmatpush3.bf16.msra.mxu0 %v12422_v6  ;;  %p12459_p0 = scmp.ne.s32.totalorder %s10440_s9, %s12458_s12  ;;  %p12464_p2 = scmp.lt.s32.totalorder %s12458_s12, %s12458_s12 }
 0x4e3   :  { %12047 = vmatpush3.bf16.msra.mxu1 %v12423_v9  ;;  %12054 = vmatprep.subr.bf16.mxu0 %v12424_v48 }
 0x4e4   :  { %12076 = vmatprep.subr.bf16.mxu1 %v12425_v43  ;;  %p12465_p3 = por %p12464_p2, %p12463_p1 }
 0x4e5   :  { %10299 = vmatmul.mubr.bf16.vlgmr.msra.gmra.mrb[56].mxu0 %v7723_v38 }
 0x4e6   :  { %10339 = vmatmul.mubr.bf16.vlgmr.msra.gmra.mrb[56].mxu1 %v7725_v14  ;;  %12055 = vmatpush3.bf16.msra.mxu0 %v12426_v8  ;;  %p12466_p4 = pnand %p12465_p3, %p12459_p0 }
 0x4e7   :  { %10378 = vmatprep.mubr.bf16.mxu0 %v7728_v11  ;;  %12077 = vmatpush3.bf16.msra.mxu1 %v12427_v33 }
 0x4e8   :  { %10418 = vmatprep.mubr.bf16.mxu1 %v7730_v13  ;;  %12056 = vmatprep.subr.bf16.mxu0 %v12428_v47 }
 0x4e9   :  { %12078 = vmatprep.subr.bf16.mxu1 %v12429_v44 }
 0x4ea   :  { %12057 = vmatpush3.bf16.msra.mxu0 %v12430_v45 }
 0x4eb   :  { %12079 = vmatpush3.bf16.msra.mxu1 %v12431_v4  ;;  %12058 = vmatprep.subr.bf16.mxu0 %v12432_v7 }
 0x4ec   :  { %12080 = vmatprep.subr.bf16.mxu1 %v12433_v50 }
 0x4ee   :  { %12059 = vmatpush3.bf16.msra.mxu0 %v12434_v17 }
 0x4ef   :  { %12081 = vmatpush3.bf16.msra.mxu1 %v12435_v12  ;;  %12060 = vmatprep.subr.bf16.mxu0 %v12436_v21 }
 0x4f0   :  { %12082 = vmatprep.subr.bf16.mxu1 %v12437_v26 }
 0x4f2   :  { %12061 = vmatpush3.bf16.msra.mxu0 %v12438_v39 }
 0x4f3   :  { %12083 = vmatpush3.bf16.msra.mxu1 %v12439_v57  ;;  %12062 = vmatprep.subr.bf16.mxu0 %v12440_v29 }
 0x4f4   :  { %12084 = vmatprep.subr.bf16.mxu1 %v12441_v31 }
 0x4f6   :  { %12063 = vmatpush3.bf16.msra.mxu0 %v12442_v27 }
 0x4f7   :  { %12085 = vmatpush3.bf16.msra.mxu1 %v12443_v28  ;;  %12064 = vmatprep.subr.bf16.mxu0 %v12444_v35 }
 0x4f8   :  { %v11762_v24 = vpop.f32.mrb[32].mxu0  ;;  %12086 = vmatprep.subr.bf16.mxu1 %v12445_v23 }
 0x4f9   :  { %v11784_v20 = vpop.f32.mrb[32].mxu1  ;;  %v11763_v40 = vpop.f32.mrb[33].mxu0 }
 0x4fa   :  { %v11764_v19 = vadd.f32 %v11763_v40, %v11762_v24  ;;  %v11785_v58 = vpop.f32.mrb[33].mxu1  ;;  %v11765_v55 = vpop.f32.mrb[34].mxu0  ;;  %12065 = vmatpush3.bf16.msra.mxu0 %v12446_v30 }
 0x4fb   :  { %v11786_v56 = vadd.f32 %v11785_v58, %v11784_v20  ;;  %v11787_v10 = vpop.f32.mrb[34].mxu1  ;;  %12087 = vmatpush3.bf16.msra.mxu1 %v12447_v49  ;;  %v11766_v59 = vpop.f32.mrb[35].mxu0  ;;  %12066 = vmatprep.subr.bf16.mxu0 %v12448_v18 }
 0x4fc   :  { %v9821_v2 = vadd.f32 %v11764_v19, %v11489_v37  ;;  %v11788_v36 = vpop.f32.mrb[35].mxu1  ;;  %12088 = vmatprep.subr.bf16.mxu1 %v12449_v34 }
 0x4fe   :  { %v9861_v0 = vadd.f32 %v11786_v56, %v9821_v2  ;;  %12067 = vmatpush3.bf16.msra.mxu0 %v12450_v25 }
 0x4ff   :  { %12089 = vmatpush3.bf16.msra.mxu1 %v12451_v60  ;;  %12068 = vmatprep.subr.bf16.mxu0 %v12452_v61 }
 0x500   :  { %12090 = vmatprep.subr.bf16.mxu1 %v12453_v42 }
 0x502   :  { %12069 = vmatpush3.bf16.msra.mxu0 %v12454_v1 }
 0x503   :  { %12091 = vmatpush3.bf16.msra.mxu1 %v12455_v46 }
 0x505   :  { %10379 = vmatmul.mubr.bf16.vlgmr.msra.gmra.mrb[60].mxu0 %v7727_v15 }
 0x506   :  { %10419 = vmatmul.mubr.bf16.vlgmr.msra.gmra.mrb[60].mxu1 %v7729_v22 }
 0x518   :  { %v11806_v41 = vpop.f32.mrb[36].mxu0 }
 0x519   :  { %v11828_v6 = vpop.f32.mrb[36].mxu1  ;;  %v11807_v52 = vpop.f32.mrb[37].mxu0 }
 0x51a   :  { %v11808_v9 = vadd.f32 %v11807_v52, %v11806_v41  ;;  %v11829_v48 = vpop.f32.mrb[37].mxu1  ;;  %v11809_v63 = vpop.f32.mrb[38].mxu0 }
 0x51b   :  { %v11830_v43 = vadd.f32 %v11829_v48, %v11828_v6  ;;  %v11831_v51 = vpop.f32.mrb[38].mxu1  ;;  %v11810_v3 = vpop.f32.mrb[39].mxu0 }
 0x51c   :  { %v9901_v8 = vadd.f32 %v11808_v9, %v9861_v0  ;;  %v11832_v38 = vpop.f32.mrb[39].mxu1 }
 0x51e   :  { %v9941_v33 = vadd.f32 %v11830_v43, %v9901_v8 }
 0x538   :  { %v11850_v14 = vpop.f32.mrb[40].mxu0 }
 0x539   :  { %v11872_v47 = vpop.f32.mrb[40].mxu1  ;;  %v11851_v11 = vpop.f32.mrb[41].mxu0 }
 0x53a   :  { %v11852_v44 = vadd.f32 %v11851_v11, %v11850_v14  ;;  %v11873_v13 = vpop.f32.mrb[41].mxu1  ;;  %v11853_v45 = vpop.f32.mrb[42].mxu0 }
 0x53b   :  { %v11874_v4 = vadd.f32 %v11873_v13, %v11872_v47  ;;  %v11875_v7 = vpop.f32.mrb[42].mxu1  ;;  %v11854_v50 = vpop.f32.mrb[43].mxu0 }
 0x53c   :  { %v9981_v17 = vadd.f32 %v11852_v44, %v9941_v33  ;;  %v11876_v12 = vpop.f32.mrb[43].mxu1  ;;  %v10429_v7 = vstv %s16710_s0 }
 0x53e   :  { %v10021_v21 = vadd.f32 %v11874_v4, %v9981_v17 }
 0x558   :  { %v11894_v26 = vpop.f32.mrb[44].mxu0 }
 0x559   :  { %v11916_v39 = vpop.f32.mrb[44].mxu1  ;;  %v11895_v57 = vpop.f32.mrb[45].mxu0 }
 0x55a   :  { %v11896_v29 = vadd.f32 %v11895_v57, %v11894_v26  ;;  %v11917_v31 = vpop.f32.mrb[45].mxu1  ;;  %v11897_v27 = vpop.f32.mrb[46].mxu0 }
 0x55b   :  { %v11918_v28 = vadd.f32 %v11917_v31, %v11916_v39  ;;  %v11919_v35 = vpop.f32.mrb[46].mxu1  ;;  %v11898_v23 = vpop.f32.mrb[47].mxu0 }
 0x55c   :  { %v10061_v30 = vadd.f32 %v11896_v29, %v10021_v21  ;;  %v11920_v16 = vpop.f32.mrb[47].mxu1 }
 0x55e   :  { %v10101_v49 = vadd.f32 %v11918_v28, %v10061_v30 }
 0x578   :  { %v11938_v18 = vpop.f32.mrb[48].mxu0 }
 0x579   :  { %v11960_v32 = vpop.f32.mrb[48].mxu1  ;;  %v11939_v24 = vpop.f32.mrb[49].mxu0 }
 0x57a   :  { %v11940_v34 = vadd.f32 %v11939_v24, %v11938_v18  ;;  %v11961_v20 = vpop.f32.mrb[49].mxu1  ;;  %v11941_v37 = vpop.f32.mrb[50].mxu0 }
 0x57b   :  { %v11962_v40 = vadd.f32 %v11961_v20, %v11960_v32  ;;  %v11963_v19 = vpop.f32.mrb[50].mxu1  ;;  %v11942_v58 = vpop.f32.mrb[51].mxu0 }
 0x57c   :  { %v10141_v55 = vadd.f32 %v11940_v34, %v10101_v49  ;;  %v11964_v25 = vpop.f32.mrb[51].mxu1 }
 0x57e   :  { %v10181_v54 = vadd.f32 %v11962_v40, %v10141_v55 }
 0x598   :  { %v11982_v56 = vpop.f32.mrb[52].mxu0 }
 0x599   :  { %v12004_v10 = vpop.f32.mrb[52].mxu1  ;;  %v11983_v59 = vpop.f32.mrb[53].mxu0 }
 0x59a   :  { %v11984_v60 = vadd.f32 %v11983_v59, %v11982_v56  ;;  %v12005_v61 = vpop.f32.mrb[53].mxu1  ;;  %v11985_v62 = vpop.f32.mrb[54].mxu0 }
 0x59b   :  { %v12006_v2 = vadd.f32 %v12005_v61, %v12004_v10  ;;  %v12007_v36 = vpop.f32.mrb[54].mxu1  ;;  %v11986_v42 = vpop.f32.mrb[55].mxu0 }
 0x59c   :  { %v10221_v0 = vadd.f32 %v11984_v60, %v10181_v54  ;;  %v12008_v1 = vpop.f32.mrb[55].mxu1 }
 0x59e   :  { %v10261_v53 = vadd.f32 %v12006_v2, %v10221_v0 }
 0x5b8   :  { %v12026_v46 = vpop.f32.mrb[56].mxu0 }
 0x5b9   :  { %v12048_v5 = vpop.f32.mrb[56].mxu1  ;;  %v12027_v15 = vpop.f32.mrb[57].mxu0 }
 0x5ba   :  { %v12028_v22 = vadd.f32 %v12027_v15, %v12026_v46  ;;  %v12049_v41 = vpop.f32.mrb[57].mxu1  ;;  %v12029_v6 = vpop.f32.mrb[58].mxu0 }
 0x5bb   :  { %v12050_v52 = vadd.f32 %v12049_v41, %v12048_v5  ;;  %v12051_v9 = vpop.f32.mrb[58].mxu1  ;;  %v12030_v48 = vpop.f32.mrb[59].mxu0 }
 0x5bc   :  { %v10301_v63 = vadd.f32 %v12028_v22, %v10261_v53  ;;  %v12052_v43 = vpop.f32.mrb[59].mxu1 }
 0x5be   :  { %v10341_v51 = vadd.f32 %v12050_v52, %v10301_v63 }
 0x5d8   :  { %v12070_v3 = vpop.f32.mrb[60].mxu0 }
 0x5d9   :  { %v12092_v8 = vpop.f32.mrb[60].mxu1  ;;  %v12071_v38 = vpop.f32.mrb[61].mxu0 }
 0x5da   :  { %v12072_v33 = vadd.f32 %v12071_v38, %v12070_v3  ;;  %v12093_v14 = vpop.f32.mrb[61].mxu1  ;;  %v12073_v47 = vpop.f32.mrb[62].mxu0 }
 0x5db   :  { %v12094_v11 = vadd.f32 %v12093_v14, %v12092_v8  ;;  %v12095_v44 = vpop.f32.mrb[62].mxu1  ;;  %v12074_v13 = vpop.f32.mrb[63].mxu0 }
 0x5dc   :  { %v10381_v45 = vadd.f32 %v12072_v33, %v10341_v51  ;;  %v12096_v4 = vpop.f32.mrb[63].mxu1 }
 0x5de   :  { %v10421_v50 = vadd.f32 %v12094_v11, %v10381_v45 }
 0x5e0   :  { %10428 = vst.msk [vmem:[#allocation4] sm:$0xff] %vm10427_vm0, %v10421_v50  ;;  %v10430_v17 = vmul.f32 %v10429_v7, %v10421_v50 }
 0x5e1   :  { %12469 = shalt.err (!%p12466_p4)
}
 0x5e2   :  { %s12470_s15 = scalar_lea.hbm %s16716_s6, 128 }
 0x5e3   :  { %p12471_p5 = scmp.ne.s32.totalorder %s16716_s6, %s12470_s15  ;;  %p12474_p6 = scmp.lt.u32.totalorder %s12470_s15, %s16716_s6 }
 0x5e5   :  { %p12476_p7 = pnand %p12474_p6, %p12471_p5 }
 0x5e7   :  { %12479 = shalt.err (!%p12476_p7)
}
 0x5e8   :  { %10442 = dma.vmem_to_hbm [thread:$0]  %s10440_s9, 128, %s16716_s6, [#allocation5]   ;;  %12456 = vtanh.f32 %v10430_v17 }
 0x5e9   :  { %s12507_s2 = smov [#allocation6]  }
 0x5ea   :  { %s10449_s3 = sshll.u32 %s12507_s2, 4  ;;  %s10450_s3 = int_to_ptr.vmem [resolvable:$true] %s10449_s3 }
 0x5eb   :  { %s12480_s20 = scalar_lea.vmem %s10450_s3, 128  ;;  %p12485_p9 = scmp.lt.s32.totalorder %s10450_s3, %s10450_s3 }
 0x5ec   :  { %p12481_p8 = scmp.ne.s32.totalorder %s10450_s3, %s12480_s20  ;;  %p12486_p10 = scmp.lt.s32.totalorder %s12480_s20, %s12480_s20 }
 0x5ee   :  { %p12487_p11 = por %p12486_p10, %p12485_p9 }
 0x5f0   :  { %p12488_p12 = pnand %p12487_p11, %p12481_p8 }
 0x5f2   :  { %v12457_v12 = vpop.eup %12456 }
 0x5f3   :  { %10432 = vst.msk [vmem:[#allocation6] sm:$0xff] %vm10427_vm0, %v12457_v12 }
 0x5f4   :  { %12491 = shalt.err (!%p12488_p12)
}
 0x5f5   :  { %s12492_s23 = scalar_lea.hbm %s16717_s7, 128 }
 0x5f6   :  { %p12493_p13 = scmp.ne.s32.totalorder %s16717_s7, %s12492_s23  ;;  %p12496_p0 = scmp.lt.u32.totalorder %s12492_s23, %s16717_s7 }
 0x5f8   :  { %p12498_p1 = pnand %p12496_p0, %p12493_p13 }
 0x5fa   :  { %12501 = shalt.err (!%p12498_p1)
}
 0x5fb   :  { %10452 = dma.vmem_to_hbm [thread:$0]  %s10450_s3, 128, %s16717_s7, [#allocation7]  }
 0x5fc   :  { %12502 = dma.done.wait [#allocation5], 128  }
 0x5fd   :  { %12503 = vsyncadd [#allocation5], 4294967168 }
 0x5fe   :  { %12504 = dma.done.wait [#allocation7], 128  }
 0x5ff   :  { %12505 = vsyncadd [#allocation7], 4294967168 }
 0x600   :  { %10459 = vsyncpa [#allocation5], 1 }
 0x601   :  { %10460 = vsyncpa [#allocation7], 1 }

</bundles_post_ra>
